<compile_context>
chip_gen: v7x
topology: tpu7x:2x2x1
jax: 0.10.0
libtpu: 0.0.40
codegen_flags: <defaults>
</compile_context>

<pallas_src>
import functools

import jax
import jax.numpy as jnp
from jax.experimental import pallas as pl
from jax.experimental.pallas import tpu as pltpu


# ---------------------------------------------------------------------------
# Fused kernel: per batch element, run MHA over every title + additive attention
# ---------------------------------------------------------------------------
def news_encoder_kernel(x_ref, wq_ref, bq_ref, wk_ref, bk_ref, wv_ref, bv_ref,
                        wo_ref, bo_ref, wva_ref, bva_ref, wqa_ref,
                        o_ref, ctx_ref, h_ref, *, num_heads):
    _, N, S, D = x_ref.shape
    hd = D // num_heads
    scale = 1.0 / (hd ** 0.5)

    # Weights (pre-transposed / pre-split on the host) — loaded once per grid step.
    wq = wq_ref[...]; bq = bq_ref[...]
    wk = wk_ref[...]; bk = bk_ref[...]
    wv = wv_ref[...]; bv = bv_ref[...]
    wo = wo_ref[...]; bo = bo_ref[...]
    wva = wva_ref[...]; bva = bva_ref[...]
    wqa = wqa_ref[...]

    sc_list = []
    for n in range(N):                                   # static loop, small N
        x_n = x_ref[0, n]                                # (S, D)

        # --- multi-head self-attention over the tokens of title n ------------
        q_n = (jnp.dot(x_n, wq, preferred_element_type=jnp.float32) + bq) * scale
        k_n = jnp.dot(x_n, wk, preferred_element_type=jnp.float32) + bk
        v_n = jnp.dot(x_n, wv, preferred_element_type=jnp.float32) + bv

        for h in range(num_heads):                       # static loop, small H
            lo, hi = h * hd, (h + 1) * hd
            s = jnp.einsum("qd,kd->qk", q_n[:, lo:hi], k_n[:, lo:hi],
                           preferred_element_type=jnp.float32)        # (S, S)
            s = s - jnp.max(s, axis=-1, keepdims=True)
            p = jnp.exp(s)
            p = p * pl.reciprocal(jnp.sum(p, axis=-1, keepdims=True), approx=True)
            ctx_ref[:, lo:hi] = jnp.dot(p, v_n[:, lo:hi],
                                        preferred_element_type=jnp.float32)

        # single output projection over the assembled all-head context
        h_n = jnp.dot(ctx_ref[...], wo, preferred_element_type=jnp.float32) + bo  # (S, D)
        h_ref[n] = h_n

        # --- additive word attention: score per token ------------------------
        tmp = jnp.tanh(jnp.dot(h_n, wva, preferred_element_type=jnp.float32) + bva)  # (S, A)
        sc_list.append(jnp.sum(tmp * wqa, axis=-1, keepdims=True))                   # (S, 1)

    # Softmax over the TITLE axis (PyTorch Softmax(dim=1) on the (B, N, S, 1) scores).
    m = sc_list[0]
    for n in range(1, N):
        m = jnp.maximum(m, sc_list[n])
    e_list = [jnp.exp(sc - m) for sc in sc_list]
    denom = e_list[0]
    for n in range(1, N):
        denom = denom + e_list[n]
    inv = pl.reciprocal(denom, approx=True)              # (S, 1)

    # r[n, :] = sum_s aw[n, s] * h[n, s, :]
    for n in range(N):
        aw_n = e_list[n] * inv                           # (S, 1)
        r_n = jnp.sum(aw_n * h_ref[n], axis=0, keepdims=True)   # (1, D)
        o_ref[0, n:n + 1, :] = r_n.astype(o_ref.dtype)


# ---------------------------------------------------------------------------
# Wrapper (single pallas_call for the whole forward)
# ---------------------------------------------------------------------------
def my_news_encoder(token_embeddings, kernel_params, *, num_heads):
    B, N, S, D = token_embeddings.shape
    (wq, bq, wk, bk, wv, bv, wo, bo, wva, bva, wqa) = kernel_params
    A = wva.shape[1]

    kern = functools.partial(news_encoder_kernel, num_heads=num_heads)
    w2 = lambda i: (0, 0)                                # whole-weight blocks

    return pl.pallas_call(
        kern,
        out_shape=jax.ShapeDtypeStruct((B, N, D), jnp.float32),
        grid=(B,),
        in_specs=[
            pl.BlockSpec((1, N, S, D), lambda i: (i, 0, 0, 0)),   # token embeddings
            pl.BlockSpec((D, D), w2), pl.BlockSpec((1, D), w2),   # wq_t, bq
            pl.BlockSpec((D, D), w2), pl.BlockSpec((1, D), w2),   # wk_t, bk
            pl.BlockSpec((D, D), w2), pl.BlockSpec((1, D), w2),   # wv_t, bv
            pl.BlockSpec((D, D), w2), pl.BlockSpec((1, D), w2),   # wo_t, bo
            pl.BlockSpec((D, A), w2), pl.BlockSpec((1, A), w2),   # wva_t, bva
            pl.BlockSpec((1, A), w2),                             # wqa (lin_q weight)
        ],
        out_specs=pl.BlockSpec((1, N, D), lambda i: (i, 0, 0)),
        scratch_shapes=[
            pltpu.VMEM((S, D), jnp.float32),       # per-title all-head context
            pltpu.VMEM((N, S, D), jnp.float32),    # per-title MHA outputs (stage fusion)
        ],
        compiler_params=pltpu.CompilerParams(dimension_semantics=("parallel",)),
    )(token_embeddings, wq, bq, wk, bk, wv, bv, wo, bo, wva, bva, wqa)


# ---------------------------------------------------------------------------
# Parameters: PyTorch-convention init + host-side pre-split / pre-transpose
# ---------------------------------------------------------------------------
def init_torch_params(key, D, additive_dim=200):
    ks = iter(jax.random.split(key, 8))

    def w(shape):
        return jax.random.normal(next(ks), shape, jnp.float32) * 0.05

    in_proj_w = w((3 * D, D))        # nn.MultiheadAttention.in_proj_weight
    in_proj_b = w((3 * D,))          # in_proj_bias
    out_w = w((D, D))                # out_proj.weight
    out_b = w((D,))                  # out_proj.bias
    vw_w = w((additive_dim, D))      # AdditiveWordAttention.lin_vw.weight
    vw_b = w((additive_dim,))        # lin_vw.bias
    q_w = w((1, additive_dim))       # lin_q.weight (no bias)
    return (in_proj_w, in_proj_b, out_w, out_b, vw_w, vw_b, q_w)


def prepare_kernel_params(torch_params, D):
    """Pre-split q/k/v and pre-transpose every weight so in-kernel dots are (M,K)@(K,N)."""
    in_w, in_b, out_w, out_b, vw_w, vw_b, q_w = torch_params
    wq_t = in_w[:D].T
    wk_t = in_w[D:2 * D].T
    wv_t = in_w[2 * D:].T
    bq = in_b[:D][None]
    bk = in_b[D:2 * D][None]
    bv = in_b[2 * D:][None]
    return (wq_t, bq, wk_t, bk, wv_t, bv,
            out_w.T, out_b[None], vw_w.T, vw_b[None], q_w)


# ---------------------------------------------------------------------------
# Pure-JAX reference (mirrors the PyTorch math) for a correctness check
# ---------------------------------------------------------------------------
def _ref_forward(te, torch_params, num_heads):
    B, N, S, D = te.shape
    in_w, in_b, out_w, out_b, vw_w, vw_b, q_w = torch_params
    hd = D // num_heads

    x = te.reshape(B * N, S, D)
    qkv = jnp.einsum("bsd,ed->bse", x, in_w) + in_b
    q, k, v = jnp.split(qkv, 3, axis=-1)

    def split_heads(t):
        return t.reshape(B * N, S, num_heads, hd).transpose(0, 2, 1, 3)

    q, k, v = split_heads(q), split_heads(k), split_heads(v)
    s = jnp.einsum("bhqd,bhkd->bhqk", q, k) / jnp.sqrt(jnp.float32(hd))
    a = jax.nn.softmax(s, axis=-1)
    ctx = jnp.einsum("bhqk,bhkd->bhqd", a, v).transpose(0, 2, 1, 3).reshape(B * N, S, D)
    h = (jnp.einsum("bsd,ed->bse", ctx, out_w) + out_b).reshape(B, N, S, D)

    tmp = jnp.tanh(jnp.einsum("bnsd,ad->bnsa", h, vw_w) + vw_b)
    aw = jax.nn.softmax(jnp.einsum("bnsa,a->bns", tmp, q_w[0]), axis=1)  # Softmax(dim=1) -> title axis
    return jnp.einsum("bns,bnsd->bnd", aw, h)


if __name__ == "__main__":
    # Small shapes consistent with the module: S fixed at 30 by the tokenizer,
    # D = head_count * head_vector_size (D=128 keeps the output lane-dense).
    B, N, S = 2, 3, 30
    HEADS, HEAD_VEC = 4, 32
    D = HEADS * HEAD_VEC          # 128

    key = jax.random.PRNGKey(0)
    k_emb, k_par = jax.random.split(key)
    # Synthetic stand-in for the XLM-RoBERTa token embeddings (see TODO above).
    token_embeddings = jax.random.normal(k_emb, (B, N, S, D), jnp.float32)
    torch_params = init_torch_params(k_par, D)
    kernel_params = prepare_kernel_params(torch_params, D)

    fwd = jax.jit(functools.partial(my_news_encoder, num_heads=HEADS))
    r = fwd(token_embeddings, kernel_params)
    jax.block_until_ready(r)

    r_ref = _ref_forward(token_embeddings, torch_params, HEADS)
    assert r.shape == (B, N, D), r.shape
    max_err = float(jnp.max(jnp.abs(r - r_ref)))
    # tolerance accounts for the approximate EUP reciprocal in the softmax denominators
    assert jnp.allclose(r, r_ref, rtol=5e-3, atol=5e-3), max_err

    print("KERNEL_OK")
</pallas_src>

<mosaic_0001>
module attributes {stable_mosaic.version = 11 : i64} {
  func.func @news_encoder_kernel(%arg0: i32, %arg1: memref<1x3x30x128xf32, #tpu.memory_space<vmem>>, %arg2: memref<128x128xf32, #tpu.memory_space<vmem>>, %arg3: memref<1x128xf32, #tpu.memory_space<vmem>>, %arg4: memref<128x128xf32, #tpu.memory_space<vmem>>, %arg5: memref<1x128xf32, #tpu.memory_space<vmem>>, %arg6: memref<128x128xf32, #tpu.memory_space<vmem>>, %arg7: memref<1x128xf32, #tpu.memory_space<vmem>>, %arg8: memref<128x128xf32, #tpu.memory_space<vmem>>, %arg9: memref<1x128xf32, #tpu.memory_space<vmem>>, %arg10: memref<128x200xf32, #tpu.memory_space<vmem>>, %arg11: memref<1x200xf32, #tpu.memory_space<vmem>>, %arg12: memref<1x200xf32, #tpu.memory_space<vmem>>, %arg13: memref<1x3x128xf32, #tpu.memory_space<vmem>>, %arg14: memref<30x128xf32, #tpu.memory_space<vmem>>, %arg15: memref<3x30x128xf32, #tpu.memory_space<vmem>>) attributes {dimension_semantics = [#tpu.dimension_semantics<parallel>], iteration_bounds = array<i64: 2>, scalar_prefetch = 0 : i64, scratch_operands = 2 : i64, tpu.core_type = #tpu.core_type<tc>, window_params = [{transform_indices = @transform_0, window_bounds = array<i64: 1, 3, 30, 128>}, {pipeline_mode = #tpu.pipeline_mode<synchronous>, transform_indices = @transform_1, window_bounds = array<i64: 128, 128>}, {pipeline_mode = #tpu.pipeline_mode<synchronous>, transform_indices = @transform_2, window_bounds = array<i64: 1, 128>}, {pipeline_mode = #tpu.pipeline_mode<synchronous>, transform_indices = @transform_3, window_bounds = array<i64: 128, 128>}, {pipeline_mode = #tpu.pipeline_mode<synchronous>, transform_indices = @transform_4, window_bounds = array<i64: 1, 128>}, {pipeline_mode = #tpu.pipeline_mode<synchronous>, transform_indices = @transform_5, window_bounds = array<i64: 128, 128>}, {pipeline_mode = #tpu.pipeline_mode<synchronous>, transform_indices = @transform_6, window_bounds = array<i64: 1, 128>}, {pipeline_mode = #tpu.pipeline_mode<synchronous>, transform_indices = @transform_7, window_bounds = array<i64: 128, 128>}, {pipeline_mode = #tpu.pipeline_mode<synchronous>, transform_indices = @transform_8, window_bounds = array<i64: 1, 128>}, {pipeline_mode = #tpu.pipeline_mode<synchronous>, transform_indices = @transform_9, window_bounds = array<i64: 128, 200>}, {pipeline_mode = #tpu.pipeline_mode<synchronous>, transform_indices = @transform_10, window_bounds = array<i64: 1, 200>}, {pipeline_mode = #tpu.pipeline_mode<synchronous>, transform_indices = @transform_11, window_bounds = array<i64: 1, 200>}, {transform_indices = @transform_12, window_bounds = array<i64: 1, 3, 128>}]} {
    %c0 = arith.constant 0 : index
    %c0_0 = arith.constant 0 : index
    %0 = vector.load %arg2[%c0, %c0_0] : memref<128x128xf32, #tpu.memory_space<vmem>>, vector<128x128xf32>
    %c0_1 = arith.constant 0 : index
    %c0_2 = arith.constant 0 : index
    %1 = vector.load %arg3[%c0_1, %c0_2] : memref<1x128xf32, #tpu.memory_space<vmem>>, vector<1x128xf32>
    %c0_3 = arith.constant 0 : index
    %c0_4 = arith.constant 0 : index
    %2 = vector.load %arg4[%c0_3, %c0_4] : memref<128x128xf32, #tpu.memory_space<vmem>>, vector<128x128xf32>
    %c0_5 = arith.constant 0 : index
    %c0_6 = arith.constant 0 : index
    %3 = vector.load %arg5[%c0_5, %c0_6] : memref<1x128xf32, #tpu.memory_space<vmem>>, vector<1x128xf32>
    %c0_7 = arith.constant 0 : index
    %c0_8 = arith.constant 0 : index
    %4 = vector.load %arg6[%c0_7, %c0_8] : memref<128x128xf32, #tpu.memory_space<vmem>>, vector<128x128xf32>
    %c0_9 = arith.constant 0 : index
    %c0_10 = arith.constant 0 : index
    %5 = vector.load %arg7[%c0_9, %c0_10] : memref<1x128xf32, #tpu.memory_space<vmem>>, vector<1x128xf32>
    %c0_11 = arith.constant 0 : index
    %c0_12 = arith.constant 0 : index
    %6 = vector.load %arg8[%c0_11, %c0_12] : memref<128x128xf32, #tpu.memory_space<vmem>>, vector<128x128xf32>
    %c0_13 = arith.constant 0 : index
    %c0_14 = arith.constant 0 : index
    %7 = vector.load %arg9[%c0_13, %c0_14] : memref<1x128xf32, #tpu.memory_space<vmem>>, vector<1x128xf32>
    %c0_15 = arith.constant 0 : index
    %c0_16 = arith.constant 0 : index
    %8 = vector.load %arg10[%c0_15, %c0_16] : memref<128x200xf32, #tpu.memory_space<vmem>>, vector<128x200xf32>
    %c0_17 = arith.constant 0 : index
    %c0_18 = arith.constant 0 : index
    %9 = vector.load %arg11[%c0_17, %c0_18] : memref<1x200xf32, #tpu.memory_space<vmem>>, vector<1x200xf32>
    %c0_19 = arith.constant 0 : index
    %c0_20 = arith.constant 0 : index
    %10 = vector.load %arg12[%c0_19, %c0_20] : memref<1x200xf32, #tpu.memory_space<vmem>>, vector<1x200xf32>
    %c0_21 = arith.constant 0 : index
    %c0_22 = arith.constant 0 : index
    %c0_23 = arith.constant 0 : index
    %c0_24 = arith.constant 0 : index
    %11 = vector.load %arg1[%c0_21, %c0_22, %c0_23, %c0_24] : memref<1x3x30x128xf32, #tpu.memory_space<vmem>>, vector<1x1x30x128xf32>
    %12 = vector.shape_cast %11 : vector<1x1x30x128xf32> to vector<30x128xf32>
    %cst = arith.constant dense<0.000000e+00> : vector<30x128xf32>
    %13 = tpu.matmul %12, %0, %cst {dimension_numbers = #tpu.dot_dimension_numbers<[1], [0], [0], [1], [0, 0, 1, 1], [], []>} : vector<30x128xf32>, vector<128x128xf32>, vector<30x128xf32> -> vector<30x128xf32>
    %14 = vector.broadcast %1 : vector<1x128xf32> to vector<30x128xf32>
    %15 = arith.addf %13, %14 : vector<30x128xf32>
    %cst_25 = arith.constant 0.176776692 : f32
    %16 = vector.broadcast %cst_25 : f32 to vector<30x128xf32>
    %17 = arith.mulf %15, %16 : vector<30x128xf32>
    %cst_26 = arith.constant dense<0.000000e+00> : vector<30x128xf32>
    %18 = tpu.matmul %12, %2, %cst_26 {dimension_numbers = #tpu.dot_dimension_numbers<[1], [0], [0], [1], [0, 0, 1, 1], [], []>} : vector<30x128xf32>, vector<128x128xf32>, vector<30x128xf32> -> vector<30x128xf32>
    %19 = vector.broadcast %3 : vector<1x128xf32> to vector<30x128xf32>
    %20 = arith.addf %18, %19 : vector<30x128xf32>
    %cst_27 = arith.constant dense<0.000000e+00> : vector<30x128xf32>
    %21 = tpu.matmul %12, %4, %cst_27 {dimension_numbers = #tpu.dot_dimension_numbers<[1], [0], [0], [1], [0, 0, 1, 1], [], []>} : vector<30x128xf32>, vector<128x128xf32>, vector<30x128xf32> -> vector<30x128xf32>
    %22 = vector.broadcast %5 : vector<1x128xf32> to vector<30x128xf32>
    %23 = arith.addf %21, %22 : vector<30x128xf32>
    %24 = vector.extract_strided_slice %17 {offsets = [0, 0], sizes = [30, 32], strides = [1, 1]} : vector<30x128xf32> to vector<30x32xf32>
    %25 = vector.extract_strided_slice %20 {offsets = [0, 0], sizes = [30, 32], strides = [1, 1]} : vector<30x128xf32> to vector<30x32xf32>
    "tpu.trace_start"() <{level = 10 : i32, message = "qd,kd->qk"}> : () -> ()
    %cst_28 = arith.constant dense<0.000000e+00> : vector<30x30xf32>
    %26 = tpu.matmul %24, %25, %cst_28 {dimension_numbers = #tpu.dot_dimension_numbers<[1], [1], [0], [0], [0, 0, 1, 0], [], []>} : vector<30x32xf32>, vector<30x32xf32>, vector<30x30xf32> -> vector<30x30xf32>
    "tpu.trace_stop"() : () -> ()
    %cst_29 = arith.constant dense<0xFF800000> : vector<30xf32>
    %27 = vector.multi_reduction <maximumf>, %26, %cst_29 [1] : vector<30x30xf32> to vector<30xf32>
    %28 = vector.shape_cast %27 : vector<30xf32> to vector<30x1xf32>
    %29 = vector.broadcast %28 : vector<30x1xf32> to vector<30x30xf32>
    %30 = arith.subf %26, %29 : vector<30x30xf32>
    %31 = math.exp %30 : vector<30x30xf32>
    %cst_30 = arith.constant dense<0.000000e+00> : vector<30xf32>
    %32 = vector.multi_reduction <add>, %31, %cst_30 [1] : vector<30x30xf32> to vector<30xf32>
    %33 = vector.shape_cast %32 : vector<30xf32> to vector<30x1xf32>
    %34 = tpu.reciprocal %33 {approx = true} : vector<30x1xf32> -> vector<30x1xf32>
    %35 = vector.broadcast %34 : vector<30x1xf32> to vector<30x30xf32>
    %36 = arith.mulf %31, %35 : vector<30x30xf32>
    %37 = vector.extract_strided_slice %23 {offsets = [0, 0], sizes = [30, 32], strides = [1, 1]} : vector<30x128xf32> to vector<30x32xf32>
    %cst_31 = arith.constant dense<0.000000e+00> : vector<30x32xf32>
    %38 = tpu.matmul %36, %37, %cst_31 {dimension_numbers = #tpu.dot_dimension_numbers<[1], [0], [0], [1], [0, 0, 1, 1], [], []>} : vector<30x30xf32>, vector<30x32xf32>, vector<30x32xf32> -> vector<30x32xf32>
    %c0_32 = arith.constant 0 : index
    %c0_33 = arith.constant 0 : index
    %39 = vector.load %arg14[%c0_32, %c0_33] : memref<30x128xf32, #tpu.memory_space<vmem>>, vector<30x32xf32>
    tpu.vector_store %arg14[%c0_32, %c0_33], %38 {strides = array<i32>} : memref<30x128xf32, #tpu.memory_space<vmem>>, vector<30x32xf32>,
    %40 = vector.extract_strided_slice %17 {offsets = [0, 32], sizes = [30, 32], strides = [1, 1]} : vector<30x128xf32> to vector<30x32xf32>
    %41 = vector.extract_strided_slice %20 {offsets = [0, 32], sizes = [30, 32], strides = [1, 1]} : vector<30x128xf32> to vector<30x32xf32>
    "tpu.trace_start"() <{level = 10 : i32, message = "qd,kd->qk"}> : () -> ()
    %cst_34 = arith.constant dense<0.000000e+00> : vector<30x30xf32>
    %42 = tpu.matmul %40, %41, %cst_34 {dimension_numbers = #tpu.dot_dimension_numbers<[1], [1], [0], [0], [0, 0, 1, 0], [], []>} : vector<30x32xf32>, vector<30x32xf32>, vector<30x30xf32> -> vector<30x30xf32>
    "tpu.trace_stop"() : () -> ()
    %cst_35 = arith.constant dense<0xFF800000> : vector<30xf32>
    %43 = vector.multi_reduction <maximumf>, %42, %cst_35 [1] : vector<30x30xf32> to vector<30xf32>
    %44 = vector.shape_cast %43 : vector<30xf32> to vector<30x1xf32>
    %45 = vector.broadcast %44 : vector<30x1xf32> to vector<30x30xf32>
    %46 = arith.subf %42, %45 : vector<30x30xf32>
    %47 = math.exp %46 : vector<30x30xf32>
    %cst_36 = arith.constant dense<0.000000e+00> : vector<30xf32>
    %48 = vector.multi_reduction <add>, %47, %cst_36 [1] : vector<30x30xf32> to vector<30xf32>
    %49 = vector.shape_cast %48 : vector<30xf32> to vector<30x1xf32>
    %50 = tpu.reciprocal %49 {approx = true} : vector<30x1xf32> -> vector<30x1xf32>
    %51 = vector.broadcast %50 : vector<30x1xf32> to vector<30x30xf32>
    %52 = arith.mulf %47, %51 : vector<30x30xf32>
    %53 = vector.extract_strided_slice %23 {offsets = [0, 32], sizes = [30, 32], strides = [1, 1]} : vector<30x128xf32> to vector<30x32xf32>
    %cst_37 = arith.constant dense<0.000000e+00> : vector<30x32xf32>
    %54 = tpu.matmul %52, %53, %cst_37 {dimension_numbers = #tpu.dot_dimension_numbers<[1], [0], [0], [1], [0, 0, 1, 1], [], []>} : vector<30x30xf32>, vector<30x32xf32>, vector<30x32xf32> -> vector<30x32xf32>
    %c0_38 = arith.constant 0 : index
    %c32 = arith.constant 32 : index
    %55 = vector.load %arg14[%c0_38, %c32] : memref<30x128xf32, #tpu.memory_space<vmem>>, vector<30x32xf32>
    tpu.vector_store %arg14[%c0_38, %c32], %54 {strides = array<i32>} : memref<30x128xf32, #tpu.memory_space<vmem>>, vector<30x32xf32>,
    %56 = vector.extract_strided_slice %17 {offsets = [0, 64], sizes = [30, 32], strides = [1, 1]} : vector<30x128xf32> to vector<30x32xf32>
    %57 = vector.extract_strided_slice %20 {offsets = [0, 64], sizes = [30, 32], strides = [1, 1]} : vector<30x128xf32> to vector<30x32xf32>
    "tpu.trace_start"() <{level = 10 : i32, message = "qd,kd->qk"}> : () -> ()
    %cst_39 = arith.constant dense<0.000000e+00> : vector<30x30xf32>
    %58 = tpu.matmul %56, %57, %cst_39 {dimension_numbers = #tpu.dot_dimension_numbers<[1], [1], [0], [0], [0, 0, 1, 0], [], []>} : vector<30x32xf32>, vector<30x32xf32>, vector<30x30xf32> -> vector<30x30xf32>
    "tpu.trace_stop"() : () -> ()
    %cst_40 = arith.constant dense<0xFF800000> : vector<30xf32>
    %59 = vector.multi_reduction <maximumf>, %58, %cst_40 [1] : vector<30x30xf32> to vector<30xf32>
    %60 = vector.shape_cast %59 : vector<30xf32> to vector<30x1xf32>
    %61 = vector.broadcast %60 : vector<30x1xf32> to vector<30x30xf32>
    %62 = arith.subf %58, %61 : vector<30x30xf32>
    %63 = math.exp %62 : vector<30x30xf32>
    %cst_41 = arith.constant dense<0.000000e+00> : vector<30xf32>
    %64 = vector.multi_reduction <add>, %63, %cst_41 [1] : vector<30x30xf32> to vector<30xf32>
    %65 = vector.shape_cast %64 : vector<30xf32> to vector<30x1xf32>
    %66 = tpu.reciprocal %65 {approx = true} : vector<30x1xf32> -> vector<30x1xf32>
    %67 = vector.broadcast %66 : vector<30x1xf32> to vector<30x30xf32>
    %68 = arith.mulf %63, %67 : vector<30x30xf32>
    %69 = vector.extract_strided_slice %23 {offsets = [0, 64], sizes = [30, 32], strides = [1, 1]} : vector<30x128xf32> to vector<30x32xf32>
    %cst_42 = arith.constant dense<0.000000e+00> : vector<30x32xf32>
    %70 = tpu.matmul %68, %69, %cst_42 {dimension_numbers = #tpu.dot_dimension_numbers<[1], [0], [0], [1], [0, 0, 1, 1], [], []>} : vector<30x30xf32>, vector<30x32xf32>, vector<30x32xf32> -> vector<30x32xf32>
    %c0_43 = arith.constant 0 : index
    %c64 = arith.constant 64 : index
    %71 = vector.load %arg14[%c0_43, %c64] : memref<30x128xf32, #tpu.memory_space<vmem>>, vector<30x32xf32>
    tpu.vector_store %arg14[%c0_43, %c64], %70 {strides = array<i32>} : memref<30x128xf32, #tpu.memory_space<vmem>>, vector<30x32xf32>,
    %72 = vector.extract_strided_slice %17 {offsets = [0, 96], sizes = [30, 32], strides = [1, 1]} : vector<30x128xf32> to vector<30x32xf32>
    %73 = vector.extract_strided_slice %20 {offsets = [0, 96], sizes = [30, 32], strides = [1, 1]} : vector<30x128xf32> to vector<30x32xf32>
    "tpu.trace_start"() <{level = 10 : i32, message = "qd,kd->qk"}> : () -> ()
    %cst_44 = arith.constant dense<0.000000e+00> : vector<30x30xf32>
    %74 = tpu.matmul %72, %73, %cst_44 {dimension_numbers = #tpu.dot_dimension_numbers<[1], [1], [0], [0], [0, 0, 1, 0], [], []>} : vector<30x32xf32>, vector<30x32xf32>, vector<30x30xf32> -> vector<30x30xf32>
    "tpu.trace_stop"() : () -> ()
    %cst_45 = arith.constant dense<0xFF800000> : vector<30xf32>
    %75 = vector.multi_reduction <maximumf>, %74, %cst_45 [1] : vector<30x30xf32> to vector<30xf32>
    %76 = vector.shape_cast %75 : vector<30xf32> to vector<30x1xf32>
    %77 = vector.broadcast %76 : vector<30x1xf32> to vector<30x30xf32>
    %78 = arith.subf %74, %77 : vector<30x30xf32>
    %79 = math.exp %78 : vector<30x30xf32>
    %cst_46 = arith.constant dense<0.000000e+00> : vector<30xf32>
    %80 = vector.multi_reduction <add>, %79, %cst_46 [1] : vector<30x30xf32> to vector<30xf32>
    %81 = vector.shape_cast %80 : vector<30xf32> to vector<30x1xf32>
    %82 = tpu.reciprocal %81 {approx = true} : vector<30x1xf32> -> vector<30x1xf32>
    %83 = vector.broadcast %82 : vector<30x1xf32> to vector<30x30xf32>
    %84 = arith.mulf %79, %83 : vector<30x30xf32>
    %85 = vector.extract_strided_slice %23 {offsets = [0, 96], sizes = [30, 32], strides = [1, 1]} : vector<30x128xf32> to vector<30x32xf32>
    %cst_47 = arith.constant dense<0.000000e+00> : vector<30x32xf32>
    %86 = tpu.matmul %84, %85, %cst_47 {dimension_numbers = #tpu.dot_dimension_numbers<[1], [0], [0], [1], [0, 0, 1, 1], [], []>} : vector<30x30xf32>, vector<30x32xf32>, vector<30x32xf32> -> vector<30x32xf32>
    %c0_48 = arith.constant 0 : index
    %c96 = arith.constant 96 : index
    %87 = vector.load %arg14[%c0_48, %c96] : memref<30x128xf32, #tpu.memory_space<vmem>>, vector<30x32xf32>
    tpu.vector_store %arg14[%c0_48, %c96], %86 {strides = array<i32>} : memref<30x128xf32, #tpu.memory_space<vmem>>, vector<30x32xf32>,
    %c0_49 = arith.constant 0 : index
    %c0_50 = arith.constant 0 : index
    %88 = vector.load %arg14[%c0_49, %c0_50] : memref<30x128xf32, #tpu.memory_space<vmem>>, vector<30x128xf32>
    %cst_51 = arith.constant dense<0.000000e+00> : vector<30x128xf32>
    %89 = tpu.matmul %88, %6, %cst_51 {dimension_numbers = #tpu.dot_dimension_numbers<[1], [0], [0], [1], [0, 0, 1, 1], [], []>} : vector<30x128xf32>, vector<128x128xf32>, vector<30x128xf32> -> vector<30x128xf32>
    %90 = vector.broadcast %7 : vector<1x128xf32> to vector<30x128xf32>
    %91 = arith.addf %89, %90 : vector<30x128xf32>
    %c0_52 = arith.constant 0 : index
    %c0_53 = arith.constant 0 : index
    %c0_54 = arith.constant 0 : index
    %92 = vector.load %arg15[%c0_52, %c0_53, %c0_54] : memref<3x30x128xf32, #tpu.memory_space<vmem>>, vector<1x30x128xf32>
    %93 = vector.shape_cast %92 : vector<1x30x128xf32> to vector<30x128xf32>
    %94 = vector.shape_cast %91 : vector<30x128xf32> to vector<1x30x128xf32>
    tpu.vector_store %arg15[%c0_52, %c0_53, %c0_54], %94 {strides = array<i32>} : memref<3x30x128xf32, #tpu.memory_space<vmem>>, vector<1x30x128xf32>,
    %cst_55 = arith.constant dense<0.000000e+00> : vector<30x200xf32>
    %95 = tpu.matmul %91, %8, %cst_55 {dimension_numbers = #tpu.dot_dimension_numbers<[1], [0], [0], [1], [0, 0, 1, 1], [], []>} : vector<30x128xf32>, vector<128x200xf32>, vector<30x200xf32> -> vector<30x200xf32>
    %96 = vector.broadcast %9 : vector<1x200xf32> to vector<30x200xf32>
    %97 = arith.addf %95, %96 : vector<30x200xf32>
    %98 = math.tanh %97 : vector<30x200xf32>
    %99 = vector.broadcast %10 : vector<1x200xf32> to vector<30x200xf32>
    %100 = arith.mulf %98, %99 : vector<30x200xf32>
    %cst_56 = arith.constant dense<0.000000e+00> : vector<30xf32>
    %101 = vector.multi_reduction <add>, %100, %cst_56 [1] : vector<30x200xf32> to vector<30xf32>
    %102 = vector.shape_cast %101 : vector<30xf32> to vector<30x1xf32>
    %c0_57 = arith.constant 0 : index
    %c1 = arith.constant 1 : index
    %c0_58 = arith.constant 0 : index
    %c0_59 = arith.constant 0 : index
    %103 = vector.load %arg1[%c0_57, %c1, %c0_58, %c0_59] : memref<1x3x30x128xf32, #tpu.memory_space<vmem>>, vector<1x1x30x128xf32>
    %104 = vector.shape_cast %103 : vector<1x1x30x128xf32> to vector<30x128xf32>
    %cst_60 = arith.constant dense<0.000000e+00> : vector<30x128xf32>
    %105 = tpu.matmul %104, %0, %cst_60 {dimension_numbers = #tpu.dot_dimension_numbers<[1], [0], [0], [1], [0, 0, 1, 1], [], []>} : vector<30x128xf32>, vector<128x128xf32>, vector<30x128xf32> -> vector<30x128xf32>
    %106 = vector.broadcast %1 : vector<1x128xf32> to vector<30x128xf32>
    %107 = arith.addf %105, %106 : vector<30x128xf32>
    %cst_61 = arith.constant 0.176776692 : f32
    %108 = vector.broadcast %cst_61 : f32 to vector<30x128xf32>
    %109 = arith.mulf %107, %108 : vector<30x128xf32>
    %cst_62 = arith.constant dense<0.000000e+00> : vector<30x128xf32>
    %110 = tpu.matmul %104, %2, %cst_62 {dimension_numbers = #tpu.dot_dimension_numbers<[1], [0], [0], [1], [0, 0, 1, 1], [], []>} : vector<30x128xf32>, vector<128x128xf32>, vector<30x128xf32> -> vector<30x128xf32>
    %111 = vector.broadcast %3 : vector<1x128xf32> to vector<30x128xf32>
    %112 = arith.addf %110, %111 : vector<30x128xf32>
    %cst_63 = arith.constant dense<0.000000e+00> : vector<30x128xf32>
    %113 = tpu.matmul %104, %4, %cst_63 {dimension_numbers = #tpu.dot_dimension_numbers<[1], [0], [0], [1], [0, 0, 1, 1], [], []>} : vector<30x128xf32>, vector<128x128xf32>, vector<30x128xf32> -> vector<30x128xf32>
    %114 = vector.broadcast %5 : vector<1x128xf32> to vector<30x128xf32>
    %115 = arith.addf %113, %114 : vector<30x128xf32>
    %116 = vector.extract_strided_slice %109 {offsets = [0, 0], sizes = [30, 32], strides = [1, 1]} : vector<30x128xf32> to vector<30x32xf32>
    %117 = vector.extract_strided_slice %112 {offsets = [0, 0], sizes = [30, 32], strides = [1, 1]} : vector<30x128xf32> to vector<30x32xf32>
    "tpu.trace_start"() <{level = 10 : i32, message = "qd,kd->qk"}> : () -> ()
    %cst_64 = arith.constant dense<0.000000e+00> : vector<30x30xf32>
    %118 = tpu.matmul %116, %117, %cst_64 {dimension_numbers = #tpu.dot_dimension_numbers<[1], [1], [0], [0], [0, 0, 1, 0], [], []>} : vector<30x32xf32>, vector<30x32xf32>, vector<30x30xf32> -> vector<30x30xf32>
    "tpu.trace_stop"() : () -> ()
    %cst_65 = arith.constant dense<0xFF800000> : vector<30xf32>
    %119 = vector.multi_reduction <maximumf>, %118, %cst_65 [1] : vector<30x30xf32> to vector<30xf32>
    %120 = vector.shape_cast %119 : vector<30xf32> to vector<30x1xf32>
    %121 = vector.broadcast %120 : vector<30x1xf32> to vector<30x30xf32>
    %122 = arith.subf %118, %121 : vector<30x30xf32>
    %123 = math.exp %122 : vector<30x30xf32>
    %cst_66 = arith.constant dense<0.000000e+00> : vector<30xf32>
    %124 = vector.multi_reduction <add>, %123, %cst_66 [1] : vector<30x30xf32> to vector<30xf32>
    %125 = vector.shape_cast %124 : vector<30xf32> to vector<30x1xf32>
    %126 = tpu.reciprocal %125 {approx = true} : vector<30x1xf32> -> vector<30x1xf32>
    %127 = vector.broadcast %126 : vector<30x1xf32> to vector<30x30xf32>
    %128 = arith.mulf %123, %127 : vector<30x30xf32>
    %129 = vector.extract_strided_slice %115 {offsets = [0, 0], sizes = [30, 32], strides = [1, 1]} : vector<30x128xf32> to vector<30x32xf32>
    %cst_67 = arith.constant dense<0.000000e+00> : vector<30x32xf32>
    %130 = tpu.matmul %128, %129, %cst_67 {dimension_numbers = #tpu.dot_dimension_numbers<[1], [0], [0], [1], [0, 0, 1, 1], [], []>} : vector<30x30xf32>, vector<30x32xf32>, vector<30x32xf32> -> vector<30x32xf32>
    %c0_68 = arith.constant 0 : index
    %c0_69 = arith.constant 0 : index
    %131 = vector.load %arg14[%c0_68, %c0_69] : memref<30x128xf32, #tpu.memory_space<vmem>>, vector<30x32xf32>
    tpu.vector_store %arg14[%c0_68, %c0_69], %130 {strides = array<i32>} : memref<30x128xf32, #tpu.memory_space<vmem>>, vector<30x32xf32>,
    %132 = vector.extract_strided_slice %109 {offsets = [0, 32], sizes = [30, 32], strides = [1, 1]} : vector<30x128xf32> to vector<30x32xf32>
    %133 = vector.extract_strided_slice %112 {offsets = [0, 32], sizes = [30, 32], strides = [1, 1]} : vector<30x128xf32> to vector<30x32xf32>
    "tpu.trace_start"() <{level = 10 : i32, message = "qd,kd->qk"}> : () -> ()
    %cst_70 = arith.constant dense<0.000000e+00> : vector<30x30xf32>
    %134 = tpu.matmul %132, %133, %cst_70 {dimension_numbers = #tpu.dot_dimension_numbers<[1], [1], [0], [0], [0, 0, 1, 0], [], []>} : vector<30x32xf32>, vector<30x32xf32>, vector<30x30xf32> -> vector<30x30xf32>
    "tpu.trace_stop"() : () -> ()
    %cst_71 = arith.constant dense<0xFF800000> : vector<30xf32>
    %135 = vector.multi_reduction <maximumf>, %134, %cst_71 [1] : vector<30x30xf32> to vector<30xf32>
    %136 = vector.shape_cast %135 : vector<30xf32> to vector<30x1xf32>
    %137 = vector.broadcast %136 : vector<30x1xf32> to vector<30x30xf32>
    %138 = arith.subf %134, %137 : vector<30x30xf32>
    %139 = math.exp %138 : vector<30x30xf32>
    %cst_72 = arith.constant dense<0.000000e+00> : vector<30xf32>
    %140 = vector.multi_reduction <add>, %139, %cst_72 [1] : vector<30x30xf32> to vector<30xf32>
    %141 = vector.shape_cast %140 : vector<30xf32> to vector<30x1xf32>
    %142 = tpu.reciprocal %141 {approx = true} : vector<30x1xf32> -> vector<30x1xf32>
    %143 = vector.broadcast %142 : vector<30x1xf32> to vector<30x30xf32>
    %144 = arith.mulf %139, %143 : vector<30x30xf32>
    %145 = vector.extract_strided_slice %115 {offsets = [0, 32], sizes = [30, 32], strides = [1, 1]} : vector<30x128xf32> to vector<30x32xf32>
    %cst_73 = arith.constant dense<0.000000e+00> : vector<30x32xf32>
    %146 = tpu.matmul %144, %145, %cst_73 {dimension_numbers = #tpu.dot_dimension_numbers<[1], [0], [0], [1], [0, 0, 1, 1], [], []>} : vector<30x30xf32>, vector<30x32xf32>, vector<30x32xf32> -> vector<30x32xf32>
    %c0_74 = arith.constant 0 : index
    %c32_75 = arith.constant 32 : index
    %147 = vector.load %arg14[%c0_74, %c32_75] : memref<30x128xf32, #tpu.memory_space<vmem>>, vector<30x32xf32>
    tpu.vector_store %arg14[%c0_74, %c32_75], %146 {strides = array<i32>} : memref<30x128xf32, #tpu.memory_space<vmem>>, vector<30x32xf32>,
    %148 = vector.extract_strided_slice %109 {offsets = [0, 64], sizes = [30, 32], strides = [1, 1]} : vector<30x128xf32> to vector<30x32xf32>
    %149 = vector.extract_strided_slice %112 {offsets = [0, 64], sizes = [30, 32], strides = [1, 1]} : vector<30x128xf32> to vector<30x32xf32>
    "tpu.trace_start"() <{level = 10 : i32, message = "qd,kd->qk"}> : () -> ()
    %cst_76 = arith.constant dense<0.000000e+00> : vector<30x30xf32>
    %150 = tpu.matmul %148, %149, %cst_76 {dimension_numbers = #tpu.dot_dimension_numbers<[1], [1], [0], [0], [0, 0, 1, 0], [], []>} : vector<30x32xf32>, vector<30x32xf32>, vector<30x30xf32> -> vector<30x30xf32>
    "tpu.trace_stop"() : () -> ()
    %cst_77 = arith.constant dense<0xFF800000> : vector<30xf32>
    %151 = vector.multi_reduction <maximumf>, %150, %cst_77 [1] : vector<30x30xf32> to vector<30xf32>
    %152 = vector.shape_cast %151 : vector<30xf32> to vector<30x1xf32>
    %153 = vector.broadcast %152 : vector<30x1xf32> to vector<30x30xf32>
    %154 = arith.subf %150, %153 : vector<30x30xf32>
    %155 = math.exp %154 : vector<30x30xf32>
    %cst_78 = arith.constant dense<0.000000e+00> : vector<30xf32>
    %156 = vector.multi_reduction <add>, %155, %cst_78 [1] : vector<30x30xf32> to vector<30xf32>
    %157 = vector.shape_cast %156 : vector<30xf32> to vector<30x1xf32>
    %158 = tpu.reciprocal %157 {approx = true} : vector<30x1xf32> -> vector<30x1xf32>
    %159 = vector.broadcast %158 : vector<30x1xf32> to vector<30x30xf32>
    %160 = arith.mulf %155, %159 : vector<30x30xf32>
    %161 = vector.extract_strided_slice %115 {offsets = [0, 64], sizes = [30, 32], strides = [1, 1]} : vector<30x128xf32> to vector<30x32xf32>
    %cst_79 = arith.constant dense<0.000000e+00> : vector<30x32xf32>
    %162 = tpu.matmul %160, %161, %cst_79 {dimension_numbers = #tpu.dot_dimension_numbers<[1], [0], [0], [1], [0, 0, 1, 1], [], []>} : vector<30x30xf32>, vector<30x32xf32>, vector<30x32xf32> -> vector<30x32xf32>
    %c0_80 = arith.constant 0 : index
    %c64_81 = arith.constant 64 : index
    %163 = vector.load %arg14[%c0_80, %c64_81] : memref<30x128xf32, #tpu.memory_space<vmem>>, vector<30x32xf32>
    tpu.vector_store %arg14[%c0_80, %c64_81], %162 {strides = array<i32>} : memref<30x128xf32, #tpu.memory_space<vmem>>, vector<30x32xf32>,
    %164 = vector.extract_strided_slice %109 {offsets = [0, 96], sizes = [30, 32], strides = [1, 1]} : vector<30x128xf32> to vector<30x32xf32>
    %165 = vector.extract_strided_slice %112 {offsets = [0, 96], sizes = [30, 32], strides = [1, 1]} : vector<30x128xf32> to vector<30x32xf32>
    "tpu.trace_start"() <{level = 10 : i32, message = "qd,kd->qk"}> : () -> ()
    %cst_82 = arith.constant dense<0.000000e+00> : vector<30x30xf32>
    %166 = tpu.matmul %164, %165, %cst_82 {dimension_numbers = #tpu.dot_dimension_numbers<[1], [1], [0], [0], [0, 0, 1, 0], [], []>} : vector<30x32xf32>, vector<30x32xf32>, vector<30x30xf32> -> vector<30x30xf32>
    "tpu.trace_stop"() : () -> ()
    %cst_83 = arith.constant dense<0xFF800000> : vector<30xf32>
    %167 = vector.multi_reduction <maximumf>, %166, %cst_83 [1] : vector<30x30xf32> to vector<30xf32>
    %168 = vector.shape_cast %167 : vector<30xf32> to vector<30x1xf32>
    %169 = vector.broadcast %168 : vector<30x1xf32> to vector<30x30xf32>
    %170 = arith.subf %166, %169 : vector<30x30xf32>
    %171 = math.exp %170 : vector<30x30xf32>
    %cst_84 = arith.constant dense<0.000000e+00> : vector<30xf32>
    %172 = vector.multi_reduction <add>, %171, %cst_84 [1] : vector<30x30xf32> to vector<30xf32>
    %173 = vector.shape_cast %172 : vector<30xf32> to vector<30x1xf32>
    %174 = tpu.reciprocal %173 {approx = true} : vector<30x1xf32> -> vector<30x1xf32>
    %175 = vector.broadcast %174 : vector<30x1xf32> to vector<30x30xf32>
    %176 = arith.mulf %171, %175 : vector<30x30xf32>
    %177 = vector.extract_strided_slice %115 {offsets = [0, 96], sizes = [30, 32], strides = [1, 1]} : vector<30x128xf32> to vector<30x32xf32>
    %cst_85 = arith.constant dense<0.000000e+00> : vector<30x32xf32>
    %178 = tpu.matmul %176, %177, %cst_85 {dimension_numbers = #tpu.dot_dimension_numbers<[1], [0], [0], [1], [0, 0, 1, 1], [], []>} : vector<30x30xf32>, vector<30x32xf32>, vector<30x32xf32> -> vector<30x32xf32>
    %c0_86 = arith.constant 0 : index
    %c96_87 = arith.constant 96 : index
    %179 = vector.load %arg14[%c0_86, %c96_87] : memref<30x128xf32, #tpu.memory_space<vmem>>, vector<30x32xf32>
    tpu.vector_store %arg14[%c0_86, %c96_87], %178 {strides = array<i32>} : memref<30x128xf32, #tpu.memory_space<vmem>>, vector<30x32xf32>,
    %c0_88 = arith.constant 0 : index
    %c0_89 = arith.constant 0 : index
    %180 = vector.load %arg14[%c0_88, %c0_89] : memref<30x128xf32, #tpu.memory_space<vmem>>, vector<30x128xf32>
    %cst_90 = arith.constant dense<0.000000e+00> : vector<30x128xf32>
    %181 = tpu.matmul %180, %6, %cst_90 {dimension_numbers = #tpu.dot_dimension_numbers<[1], [0], [0], [1], [0, 0, 1, 1], [], []>} : vector<30x128xf32>, vector<128x128xf32>, vector<30x128xf32> -> vector<30x128xf32>
    %182 = vector.broadcast %7 : vector<1x128xf32> to vector<30x128xf32>
    %183 = arith.addf %181, %182 : vector<30x128xf32>
    %c1_91 = arith.constant 1 : index
    %c0_92 = arith.constant 0 : index
    %c0_93 = arith.constant 0 : index
    %184 = vector.load %arg15[%c1_91, %c0_92, %c0_93] : memref<3x30x128xf32, #tpu.memory_space<vmem>>, vector<1x30x128xf32>
    %185 = vector.shape_cast %184 : vector<1x30x128xf32> to vector<30x128xf32>
    %186 = vector.shape_cast %183 : vector<30x128xf32> to vector<1x30x128xf32>
    tpu.vector_store %arg15[%c1_91, %c0_92, %c0_93], %186 {strides = array<i32>} : memref<3x30x128xf32, #tpu.memory_space<vmem>>, vector<1x30x128xf32>,
    %cst_94 = arith.constant dense<0.000000e+00> : vector<30x200xf32>
    %187 = tpu.matmul %183, %8, %cst_94 {dimension_numbers = #tpu.dot_dimension_numbers<[1], [0], [0], [1], [0, 0, 1, 1], [], []>} : vector<30x128xf32>, vector<128x200xf32>, vector<30x200xf32> -> vector<30x200xf32>
    %188 = vector.broadcast %9 : vector<1x200xf32> to vector<30x200xf32>
    %189 = arith.addf %187, %188 : vector<30x200xf32>
    %190 = math.tanh %189 : vector<30x200xf32>
    %191 = vector.broadcast %10 : vector<1x200xf32> to vector<30x200xf32>
    %192 = arith.mulf %190, %191 : vector<30x200xf32>
    %cst_95 = arith.constant dense<0.000000e+00> : vector<30xf32>
    %193 = vector.multi_reduction <add>, %192, %cst_95 [1] : vector<30x200xf32> to vector<30xf32>
    %194 = vector.shape_cast %193 : vector<30xf32> to vector<30x1xf32>
    %c0_96 = arith.constant 0 : index
    %c2 = arith.constant 2 : index
    %c0_97 = arith.constant 0 : index
    %c0_98 = arith.constant 0 : index
    %195 = vector.load %arg1[%c0_96, %c2, %c0_97, %c0_98] : memref<1x3x30x128xf32, #tpu.memory_space<vmem>>, vector<1x1x30x128xf32>
    %196 = vector.shape_cast %195 : vector<1x1x30x128xf32> to vector<30x128xf32>
    %cst_99 = arith.constant dense<0.000000e+00> : vector<30x128xf32>
    %197 = tpu.matmul %196, %0, %cst_99 {dimension_numbers = #tpu.dot_dimension_numbers<[1], [0], [0], [1], [0, 0, 1, 1], [], []>} : vector<30x128xf32>, vector<128x128xf32>, vector<30x128xf32> -> vector<30x128xf32>
    %198 = vector.broadcast %1 : vector<1x128xf32> to vector<30x128xf32>
    %199 = arith.addf %197, %198 : vector<30x128xf32>
    %cst_100 = arith.constant 0.176776692 : f32
    %200 = vector.broadcast %cst_100 : f32 to vector<30x128xf32>
    %201 = arith.mulf %199, %200 : vector<30x128xf32>
    %cst_101 = arith.constant dense<0.000000e+00> : vector<30x128xf32>
    %202 = tpu.matmul %196, %2, %cst_101 {dimension_numbers = #tpu.dot_dimension_numbers<[1], [0], [0], [1], [0, 0, 1, 1], [], []>} : vector<30x128xf32>, vector<128x128xf32>, vector<30x128xf32> -> vector<30x128xf32>
    %203 = vector.broadcast %3 : vector<1x128xf32> to vector<30x128xf32>
    %204 = arith.addf %202, %203 : vector<30x128xf32>
    %cst_102 = arith.constant dense<0.000000e+00> : vector<30x128xf32>
    %205 = tpu.matmul %196, %4, %cst_102 {dimension_numbers = #tpu.dot_dimension_numbers<[1], [0], [0], [1], [0, 0, 1, 1], [], []>} : vector<30x128xf32>, vector<128x128xf32>, vector<30x128xf32> -> vector<30x128xf32>
    %206 = vector.broadcast %5 : vector<1x128xf32> to vector<30x128xf32>
    %207 = arith.addf %205, %206 : vector<30x128xf32>
    %208 = vector.extract_strided_slice %201 {offsets = [0, 0], sizes = [30, 32], strides = [1, 1]} : vector<30x128xf32> to vector<30x32xf32>
    %209 = vector.extract_strided_slice %204 {offsets = [0, 0], sizes = [30, 32], strides = [1, 1]} : vector<30x128xf32> to vector<30x32xf32>
    "tpu.trace_start"() <{level = 10 : i32, message = "qd,kd->qk"}> : () -> ()
    %cst_103 = arith.constant dense<0.000000e+00> : vector<30x30xf32>
    %210 = tpu.matmul %208, %209, %cst_103 {dimension_numbers = #tpu.dot_dimension_numbers<[1], [1], [0], [0], [0, 0, 1, 0], [], []>} : vector<30x32xf32>, vector<30x32xf32>, vector<30x30xf32> -> vector<30x30xf32>
    "tpu.trace_stop"() : () -> ()
    %cst_104 = arith.constant dense<0xFF800000> : vector<30xf32>
    %211 = vector.multi_reduction <maximumf>, %210, %cst_104 [1] : vector<30x30xf32> to vector<30xf32>
    %212 = vector.shape_cast %211 : vector<30xf32> to vector<30x1xf32>
    %213 = vector.broadcast %212 : vector<30x1xf32> to vector<30x30xf32>
    %214 = arith.subf %210, %213 : vector<30x30xf32>
    %215 = math.exp %214 : vector<30x30xf32>
    %cst_105 = arith.constant dense<0.000000e+00> : vector<30xf32>
    %216 = vector.multi_reduction <add>, %215, %cst_105 [1] : vector<30x30xf32> to vector<30xf32>
    %217 = vector.shape_cast %216 : vector<30xf32> to vector<30x1xf32>
    %218 = tpu.reciprocal %217 {approx = true} : vector<30x1xf32> -> vector<30x1xf32>
    %219 = vector.broadcast %218 : vector<30x1xf32> to vector<30x30xf32>
    %220 = arith.mulf %215, %219 : vector<30x30xf32>
    %221 = vector.extract_strided_slice %207 {offsets = [0, 0], sizes = [30, 32], strides = [1, 1]} : vector<30x128xf32> to vector<30x32xf32>
    %cst_106 = arith.constant dense<0.000000e+00> : vector<30x32xf32>
    %222 = tpu.matmul %220, %221, %cst_106 {dimension_numbers = #tpu.dot_dimension_numbers<[1], [0], [0], [1], [0, 0, 1, 1], [], []>} : vector<30x30xf32>, vector<30x32xf32>, vector<30x32xf32> -> vector<30x32xf32>
    %c0_107 = arith.constant 0 : index
    %c0_108 = arith.constant 0 : index
    %223 = vector.load %arg14[%c0_107, %c0_108] : memref<30x128xf32, #tpu.memory_space<vmem>>, vector<30x32xf32>
    tpu.vector_store %arg14[%c0_107, %c0_108], %222 {strides = array<i32>} : memref<30x128xf32, #tpu.memory_space<vmem>>, vector<30x32xf32>,
    %224 = vector.extract_strided_slice %201 {offsets = [0, 32], sizes = [30, 32], strides = [1, 1]} : vector<30x128xf32> to vector<30x32xf32>
    %225 = vector.extract_strided_slice %204 {offsets = [0, 32], sizes = [30, 32], strides = [1, 1]} : vector<30x128xf32> to vector<30x32xf32>
    "tpu.trace_start"() <{level = 10 : i32, message = "qd,kd->qk"}> : () -> ()
    %cst_109 = arith.constant dense<0.000000e+00> : vector<30x30xf32>
    %226 = tpu.matmul %224, %225, %cst_109 {dimension_numbers = #tpu.dot_dimension_numbers<[1], [1], [0], [0], [0, 0, 1, 0], [], []>} : vector<30x32xf32>, vector<30x32xf32>, vector<30x30xf32> -> vector<30x30xf32>
    "tpu.trace_stop"() : () -> ()
    %cst_110 = arith.constant dense<0xFF800000> : vector<30xf32>
    %227 = vector.multi_reduction <maximumf>, %226, %cst_110 [1] : vector<30x30xf32> to vector<30xf32>
    %228 = vector.shape_cast %227 : vector<30xf32> to vector<30x1xf32>
    %229 = vector.broadcast %228 : vector<30x1xf32> to vector<30x30xf32>
    %230 = arith.subf %226, %229 : vector<30x30xf32>
    %231 = math.exp %230 : vector<30x30xf32>
    %cst_111 = arith.constant dense<0.000000e+00> : vector<30xf32>
    %232 = vector.multi_reduction <add>, %231, %cst_111 [1] : vector<30x30xf32> to vector<30xf32>
    %233 = vector.shape_cast %232 : vector<30xf32> to vector<30x1xf32>
    %234 = tpu.reciprocal %233 {approx = true} : vector<30x1xf32> -> vector<30x1xf32>
    %235 = vector.broadcast %234 : vector<30x1xf32> to vector<30x30xf32>
    %236 = arith.mulf %231, %235 : vector<30x30xf32>
    %237 = vector.extract_strided_slice %207 {offsets = [0, 32], sizes = [30, 32], strides = [1, 1]} : vector<30x128xf32> to vector<30x32xf32>
    %cst_112 = arith.constant dense<0.000000e+00> : vector<30x32xf32>
    %238 = tpu.matmul %236, %237, %cst_112 {dimension_numbers = #tpu.dot_dimension_numbers<[1], [0], [0], [1], [0, 0, 1, 1], [], []>} : vector<30x30xf32>, vector<30x32xf32>, vector<30x32xf32> -> vector<30x32xf32>
    %c0_113 = arith.constant 0 : index
    %c32_114 = arith.constant 32 : index
    %239 = vector.load %arg14[%c0_113, %c32_114] : memref<30x128xf32, #tpu.memory_space<vmem>>, vector<30x32xf32>
    tpu.vector_store %arg14[%c0_113, %c32_114], %238 {strides = array<i32>} : memref<30x128xf32, #tpu.memory_space<vmem>>, vector<30x32xf32>,
    %240 = vector.extract_strided_slice %201 {offsets = [0, 64], sizes = [30, 32], strides = [1, 1]} : vector<30x128xf32> to vector<30x32xf32>
    %241 = vector.extract_strided_slice %204 {offsets = [0, 64], sizes = [30, 32], strides = [1, 1]} : vector<30x128xf32> to vector<30x32xf32>
    "tpu.trace_start"() <{level = 10 : i32, message = "qd,kd->qk"}> : () -> ()
    %cst_115 = arith.constant dense<0.000000e+00> : vector<30x30xf32>
    %242 = tpu.matmul %240, %241, %cst_115 {dimension_numbers = #tpu.dot_dimension_numbers<[1], [1], [0], [0], [0, 0, 1, 0], [], []>} : vector<30x32xf32>, vector<30x32xf32>, vector<30x30xf32> -> vector<30x30xf32>
    "tpu.trace_stop"() : () -> ()
    %cst_116 = arith.constant dense<0xFF800000> : vector<30xf32>
    %243 = vector.multi_reduction <maximumf>, %242, %cst_116 [1] : vector<30x30xf32> to vector<30xf32>
    %244 = vector.shape_cast %243 : vector<30xf32> to vector<30x1xf32>
    %245 = vector.broadcast %244 : vector<30x1xf32> to vector<30x30xf32>
    %246 = arith.subf %242, %245 : vector<30x30xf32>
    %247 = math.exp %246 : vector<30x30xf32>
    %cst_117 = arith.constant dense<0.000000e+00> : vector<30xf32>
    %248 = vector.multi_reduction <add>, %247, %cst_117 [1] : vector<30x30xf32> to vector<30xf32>
    %249 = vector.shape_cast %248 : vector<30xf32> to vector<30x1xf32>
    %250 = tpu.reciprocal %249 {approx = true} : vector<30x1xf32> -> vector<30x1xf32>
    %251 = vector.broadcast %250 : vector<30x1xf32> to vector<30x30xf32>
    %252 = arith.mulf %247, %251 : vector<30x30xf32>
    %253 = vector.extract_strided_slice %207 {offsets = [0, 64], sizes = [30, 32], strides = [1, 1]} : vector<30x128xf32> to vector<30x32xf32>
    %cst_118 = arith.constant dense<0.000000e+00> : vector<30x32xf32>
    %254 = tpu.matmul %252, %253, %cst_118 {dimension_numbers = #tpu.dot_dimension_numbers<[1], [0], [0], [1], [0, 0, 1, 1], [], []>} : vector<30x30xf32>, vector<30x32xf32>, vector<30x32xf32> -> vector<30x32xf32>
    %c0_119 = arith.constant 0 : index
    %c64_120 = arith.constant 64 : index
    %255 = vector.load %arg14[%c0_119, %c64_120] : memref<30x128xf32, #tpu.memory_space<vmem>>, vector<30x32xf32>
    tpu.vector_store %arg14[%c0_119, %c64_120], %254 {strides = array<i32>} : memref<30x128xf32, #tpu.memory_space<vmem>>, vector<30x32xf32>,
    %256 = vector.extract_strided_slice %201 {offsets = [0, 96], sizes = [30, 32], strides = [1, 1]} : vector<30x128xf32> to vector<30x32xf32>
    %257 = vector.extract_strided_slice %204 {offsets = [0, 96], sizes = [30, 32], strides = [1, 1]} : vector<30x128xf32> to vector<30x32xf32>
    "tpu.trace_start"() <{level = 10 : i32, message = "qd,kd->qk"}> : () -> ()
    %cst_121 = arith.constant dense<0.000000e+00> : vector<30x30xf32>
    %258 = tpu.matmul %256, %257, %cst_121 {dimension_numbers = #tpu.dot_dimension_numbers<[1], [1], [0], [0], [0, 0, 1, 0], [], []>} : vector<30x32xf32>, vector<30x32xf32>, vector<30x30xf32> -> vector<30x30xf32>
    "tpu.trace_stop"() : () -> ()
    %cst_122 = arith.constant dense<0xFF800000> : vector<30xf32>
    %259 = vector.multi_reduction <maximumf>, %258, %cst_122 [1] : vector<30x30xf32> to vector<30xf32>
    %260 = vector.shape_cast %259 : vector<30xf32> to vector<30x1xf32>
    %261 = vector.broadcast %260 : vector<30x1xf32> to vector<30x30xf32>
    %262 = arith.subf %258, %261 : vector<30x30xf32>
    %263 = math.exp %262 : vector<30x30xf32>
    %cst_123 = arith.constant dense<0.000000e+00> : vector<30xf32>
    %264 = vector.multi_reduction <add>, %263, %cst_123 [1] : vector<30x30xf32> to vector<30xf32>
    %265 = vector.shape_cast %264 : vector<30xf32> to vector<30x1xf32>
    %266 = tpu.reciprocal %265 {approx = true} : vector<30x1xf32> -> vector<30x1xf32>
    %267 = vector.broadcast %266 : vector<30x1xf32> to vector<30x30xf32>
    %268 = arith.mulf %263, %267 : vector<30x30xf32>
    %269 = vector.extract_strided_slice %207 {offsets = [0, 96], sizes = [30, 32], strides = [1, 1]} : vector<30x128xf32> to vector<30x32xf32>
    %cst_124 = arith.constant dense<0.000000e+00> : vector<30x32xf32>
    %270 = tpu.matmul %268, %269, %cst_124 {dimension_numbers = #tpu.dot_dimension_numbers<[1], [0], [0], [1], [0, 0, 1, 1], [], []>} : vector<30x30xf32>, vector<30x32xf32>, vector<30x32xf32> -> vector<30x32xf32>
    %c0_125 = arith.constant 0 : index
    %c96_126 = arith.constant 96 : index
    %271 = vector.load %arg14[%c0_125, %c96_126] : memref<30x128xf32, #tpu.memory_space<vmem>>, vector<30x32xf32>
    tpu.vector_store %arg14[%c0_125, %c96_126], %270 {strides = array<i32>} : memref<30x128xf32, #tpu.memory_space<vmem>>, vector<30x32xf32>,
    %c0_127 = arith.constant 0 : index
    %c0_128 = arith.constant 0 : index
    %272 = vector.load %arg14[%c0_127, %c0_128] : memref<30x128xf32, #tpu.memory_space<vmem>>, vector<30x128xf32>
    %cst_129 = arith.constant dense<0.000000e+00> : vector<30x128xf32>
    %273 = tpu.matmul %272, %6, %cst_129 {dimension_numbers = #tpu.dot_dimension_numbers<[1], [0], [0], [1], [0, 0, 1, 1], [], []>} : vector<30x128xf32>, vector<128x128xf32>, vector<30x128xf32> -> vector<30x128xf32>
    %274 = vector.broadcast %7 : vector<1x128xf32> to vector<30x128xf32>
    %275 = arith.addf %273, %274 : vector<30x128xf32>
    %c2_130 = arith.constant 2 : index
    %c0_131 = arith.constant 0 : index
    %c0_132 = arith.constant 0 : index
    %276 = vector.load %arg15[%c2_130, %c0_131, %c0_132] : memref<3x30x128xf32, #tpu.memory_space<vmem>>, vector<1x30x128xf32>
    %277 = vector.shape_cast %276 : vector<1x30x128xf32> to vector<30x128xf32>
    %278 = vector.shape_cast %275 : vector<30x128xf32> to vector<1x30x128xf32>
    tpu.vector_store %arg15[%c2_130, %c0_131, %c0_132], %278 {strides = array<i32>} : memref<3x30x128xf32, #tpu.memory_space<vmem>>, vector<1x30x128xf32>,
    %cst_133 = arith.constant dense<0.000000e+00> : vector<30x200xf32>
    %279 = tpu.matmul %275, %8, %cst_133 {dimension_numbers = #tpu.dot_dimension_numbers<[1], [0], [0], [1], [0, 0, 1, 1], [], []>} : vector<30x128xf32>, vector<128x200xf32>, vector<30x200xf32> -> vector<30x200xf32>
    %280 = vector.broadcast %9 : vector<1x200xf32> to vector<30x200xf32>
    %281 = arith.addf %279, %280 : vector<30x200xf32>
    %282 = math.tanh %281 : vector<30x200xf32>
    %283 = vector.broadcast %10 : vector<1x200xf32> to vector<30x200xf32>
    %284 = arith.mulf %282, %283 : vector<30x200xf32>
    %cst_134 = arith.constant dense<0.000000e+00> : vector<30xf32>
    %285 = vector.multi_reduction <add>, %284, %cst_134 [1] : vector<30x200xf32> to vector<30xf32>
    %286 = vector.shape_cast %285 : vector<30xf32> to vector<30x1xf32>
    %287 = arith.maximumf %102, %194 : vector<30x1xf32>
    %288 = arith.maximumf %287, %286 : vector<30x1xf32>
    %289 = arith.subf %102, %288 : vector<30x1xf32>
    %290 = math.exp %289 : vector<30x1xf32>
    %291 = arith.subf %194, %288 : vector<30x1xf32>
    %292 = math.exp %291 : vector<30x1xf32>
    %293 = arith.subf %286, %288 : vector<30x1xf32>
    %294 = math.exp %293 : vector<30x1xf32>
    %295 = arith.addf %290, %292 : vector<30x1xf32>
    %296 = arith.addf %295, %294 : vector<30x1xf32>
    %297 = tpu.reciprocal %296 {approx = true} : vector<30x1xf32> -> vector<30x1xf32>
    %298 = arith.mulf %290, %297 : vector<30x1xf32>
    %c0_135 = arith.constant 0 : index
    %c0_136 = arith.constant 0 : index
    %c0_137 = arith.constant 0 : index
    %299 = vector.load %arg15[%c0_135, %c0_136, %c0_137] : memref<3x30x128xf32, #tpu.memory_space<vmem>>, vector<1x30x128xf32>
    %300 = vector.shape_cast %299 : vector<1x30x128xf32> to vector<30x128xf32>
    %301 = vector.broadcast %298 : vector<30x1xf32> to vector<30x128xf32>
    %302 = arith.mulf %301, %300 : vector<30x128xf32>
    %cst_138 = arith.constant dense<0.000000e+00> : vector<128xf32>
    %303 = vector.multi_reduction <add>, %302, %cst_138 [0] : vector<30x128xf32> to vector<128xf32>
    %304 = vector.shape_cast %303 : vector<128xf32> to vector<1x128xf32>
    %c0_139 = arith.constant 0 : index
    %c0_140 = arith.constant 0 : index
    %c0_141 = arith.constant 0 : index
    %305 = vector.load %arg13[%c0_139, %c0_140, %c0_141] : memref<1x3x128xf32, #tpu.memory_space<vmem>>, vector<1x1x128xf32>
    %306 = vector.shape_cast %305 : vector<1x1x128xf32> to vector<1x128xf32>
    %307 = vector.shape_cast %304 : vector<1x128xf32> to vector<1x1x128xf32>
    tpu.vector_store %arg13[%c0_139, %c0_140, %c0_141], %307 {strides = array<i32>} : memref<1x3x128xf32, #tpu.memory_space<vmem>>, vector<1x1x128xf32>,
    %308 = arith.mulf %292, %297 : vector<30x1xf32>
    %c1_142 = arith.constant 1 : index
    %c0_143 = arith.constant 0 : index
    %c0_144 = arith.constant 0 : index
    %309 = vector.load %arg15[%c1_142, %c0_143, %c0_144] : memref<3x30x128xf32, #tpu.memory_space<vmem>>, vector<1x30x128xf32>
    %310 = vector.shape_cast %309 : vector<1x30x128xf32> to vector<30x128xf32>
    %311 = vector.broadcast %308 : vector<30x1xf32> to vector<30x128xf32>
    %312 = arith.mulf %311, %310 : vector<30x128xf32>
    %cst_145 = arith.constant dense<0.000000e+00> : vector<128xf32>
    %313 = vector.multi_reduction <add>, %312, %cst_145 [0] : vector<30x128xf32> to vector<128xf32>
    %314 = vector.shape_cast %313 : vector<128xf32> to vector<1x128xf32>
    %c0_146 = arith.constant 0 : index
    %c1_147 = arith.constant 1 : index
    %c0_148 = arith.constant 0 : index
    %315 = vector.load %arg13[%c0_146, %c1_147, %c0_148] : memref<1x3x128xf32, #tpu.memory_space<vmem>>, vector<1x1x128xf32>
    %316 = vector.shape_cast %315 : vector<1x1x128xf32> to vector<1x128xf32>
    %317 = vector.shape_cast %314 : vector<1x128xf32> to vector<1x1x128xf32>
    tpu.vector_store %arg13[%c0_146, %c1_147, %c0_148], %317 {strides = array<i32>} : memref<1x3x128xf32, #tpu.memory_space<vmem>>, vector<1x1x128xf32>,
    %318 = arith.mulf %294, %297 : vector<30x1xf32>
    %c2_149 = arith.constant 2 : index
    %c0_150 = arith.constant 0 : index
    %c0_151 = arith.constant 0 : index
    %319 = vector.load %arg15[%c2_149, %c0_150, %c0_151] : memref<3x30x128xf32, #tpu.memory_space<vmem>>, vector<1x30x128xf32>
    %320 = vector.shape_cast %319 : vector<1x30x128xf32> to vector<30x128xf32>
    %321 = vector.broadcast %318 : vector<30x1xf32> to vector<30x128xf32>
    %322 = arith.mulf %321, %320 : vector<30x128xf32>
    %cst_152 = arith.constant dense<0.000000e+00> : vector<128xf32>
    %323 = vector.multi_reduction <add>, %322, %cst_152 [0] : vector<30x128xf32> to vector<128xf32>
    %324 = vector.shape_cast %323 : vector<128xf32> to vector<1x128xf32>
    %c0_153 = arith.constant 0 : index
    %c2_154 = arith.constant 2 : index
    %c0_155 = arith.constant 0 : index
    %325 = vector.load %arg13[%c0_153, %c2_154, %c0_155] : memref<1x3x128xf32, #tpu.memory_space<vmem>>, vector<1x1x128xf32>
    %326 = vector.shape_cast %325 : vector<1x1x128xf32> to vector<1x128xf32>
    %327 = vector.shape_cast %324 : vector<1x128xf32> to vector<1x1x128xf32>
    tpu.vector_store %arg13[%c0_153, %c2_154, %c0_155], %327 {strides = array<i32>} : memref<1x3x128xf32, #tpu.memory_space<vmem>>, vector<1x1x128xf32>,
    return
  }
  func.func @transform_0(%arg0: i32) -> (i32, i32, i32, i32) {
    %c0_i32 = arith.constant 0 : i32
    %c0_i32_0 = arith.constant 0 : i32
    %c0_i32_1 = arith.constant 0 : i32
    %c0_i32_2 = arith.constant 0 : i32
    return %arg0, %c0_i32, %c0_i32_0, %c0_i32_1 : i32, i32, i32, i32
  }
  func.func @transform_1(%arg0: i32) -> (i32, i32) {
    %c0_i32 = arith.constant 0 : i32
    %c0_i32_0 = arith.constant 0 : i32
    %c0_i32_1 = arith.constant 0 : i32
    return %c0_i32, %c0_i32_0 : i32, i32
  }
  func.func @transform_2(%arg0: i32) -> (i32, i32) {
    %c0_i32 = arith.constant 0 : i32
    %c0_i32_0 = arith.constant 0 : i32
    %c0_i32_1 = arith.constant 0 : i32
    return %c0_i32, %c0_i32_0 : i32, i32
  }
  func.func @transform_3(%arg0: i32) -> (i32, i32) {
    %c0_i32 = arith.constant 0 : i32
    %c0_i32_0 = arith.constant 0 : i32
    %c0_i32_1 = arith.constant 0 : i32
    return %c0_i32, %c0_i32_0 : i32, i32
  }
  func.func @transform_4(%arg0: i32) -> (i32, i32) {
    %c0_i32 = arith.constant 0 : i32
    %c0_i32_0 = arith.constant 0 : i32
    %c0_i32_1 = arith.constant 0 : i32
    return %c0_i32, %c0_i32_0 : i32, i32
  }
  func.func @transform_5(%arg0: i32) -> (i32, i32) {
    %c0_i32 = arith.constant 0 : i32
    %c0_i32_0 = arith.constant 0 : i32
    %c0_i32_1 = arith.constant 0 : i32
    return %c0_i32, %c0_i32_0 : i32, i32
  }
  func.func @transform_6(%arg0: i32) -> (i32, i32) {
    %c0_i32 = arith.constant 0 : i32
    %c0_i32_0 = arith.constant 0 : i32
    %c0_i32_1 = arith.constant 0 : i32
    return %c0_i32, %c0_i32_0 : i32, i32
  }
  func.func @transform_7(%arg0: i32) -> (i32, i32) {
    %c0_i32 = arith.constant 0 : i32
    %c0_i32_0 = arith.constant 0 : i32
    %c0_i32_1 = arith.constant 0 : i32
    return %c0_i32, %c0_i32_0 : i32, i32
  }
  func.func @transform_8(%arg0: i32) -> (i32, i32) {
    %c0_i32 = arith.constant 0 : i32
    %c0_i32_0 = arith.constant 0 : i32
    %c0_i32_1 = arith.constant 0 : i32
    return %c0_i32, %c0_i32_0 : i32, i32
  }
  func.func @transform_9(%arg0: i32) -> (i32, i32) {
    %c0_i32 = arith.constant 0 : i32
    %c0_i32_0 = arith.constant 0 : i32
    %c0_i32_1 = arith.constant 0 : i32
    return %c0_i32, %c0_i32_0 : i32, i32
  }
  func.func @transform_10(%arg0: i32) -> (i32, i32) {
    %c0_i32 = arith.constant 0 : i32
    %c0_i32_0 = arith.constant 0 : i32
    %c0_i32_1 = arith.constant 0 : i32
    return %c0_i32, %c0_i32_0 : i32, i32
  }
  func.func @transform_11(%arg0: i32) -> (i32, i32) {
    %c0_i32 = arith.constant 0 : i32
    %c0_i32_0 = arith.constant 0 : i32
    %c0_i32_1 = arith.constant 0 : i32
    return %c0_i32, %c0_i32_0 : i32, i32
  }
  func.func @transform_12(%arg0: i32) -> (i32, i32, i32) {
    %c0_i32 = arith.constant 0 : i32
    %c0_i32_0 = arith.constant 0 : i32
    %c0_i32_1 = arith.constant 0 : i32
    return %arg0, %c0_i32, %c0_i32_0 : i32, i32, i32
  }
}

</mosaic_0001>

<bundles_post_ra>
// kernel: my_news_encoder.1
= control target key start
LH: loop header
LB: loop body
LE: loop exit
PB: predicated region body
PF: predicated region fallthrough
CT: control target
= control target key end

     0   :  { %s8285_s21 = smov 0   ;;  %s9867_s0 = inlined_call_operand.vmem [shape: f32[2,3,30,128], index: 0, kind: input, shape index: {}]   ;;  %s9868_s1 = inlined_call_operand.vmem [shape: f32[128,128], index: 1, kind: input, shape index: {}]   ;;  %s9869_s2 = inlined_call_operand.vmem [shape: f32[1,128], index: 2, kind: input, shape index: {}]   ;;  %s9870_s3 = inlined_call_operand.vmem [shape: f32[128,128], index: 3, kind: input, shape index: {}]   ;;  %s9871_s4 = inlined_call_operand.vmem [shape: f32[1,128], index: 4, kind: input, shape index: {}]   ;;  %s9872_s5 = inlined_call_operand.vmem [shape: f32[128,128], index: 5, kind: input, shape index: {}]   ;;  %s9873_s6 = inlined_call_operand.vmem [shape: f32[1,128], index: 6, kind: input, shape index: {}]   ;;  %s9874_s7 = inlined_call_operand.vmem [shape: f32[128,128], index: 7, kind: input, shape index: {}]   ;;  %s9875_s8 = inlined_call_operand.vmem [shape: f32[1,128], index: 8, kind: input, shape index: {}]   ;;  %s9876_s9 = inlined_call_operand.vmem [shape: f32[128,200], index: 9, kind: input, shape index: {}]   ;;  %s9877_s10 = inlined_call_operand.vmem [shape: f32[1,200], index: 10, kind: input, shape index: {}]   ;;  %s9878_s11 = inlined_call_operand.vmem [shape: f32[1,200], index: 11, kind: input, shape index: {}]   ;;  %s9879_s12 = inlined_call_operand.vmem [shape: f32[2,3,128], index: 12, kind: output, shape index: {}]  }
   0x1 LB: > { %s5588_s22 = sadd.s32 4294967295, %s8213_s21   ;;  %p5592_p0 = scmp.ge.s32.totalorder %s8213_s21, 1  ;;  %s8213_s21 = sphi %s8285_s21, %s22_s21  }
   0x2   : > { %p362_p1 = scmp.lt.s32.totalorder %s8213_s21, 3 }
   0x4   : > { %p363_p2 = pnand %p5592_p0, %p362_p1 }
   0x6   : > { %366 = sbr.rel (%p363_p2) target bundleno = 9733 (0x2605), region = 68 }
   0xd   : > { %v429_v0 = vld [vmem:[%s9870_s3] sm:$0xff]  ;;  %v430_v1 = vld [vmem:[%s9870_s3 + $0x8] sm:$0xff]  ;;  %v431_v2 = vld [vmem:[%s9870_s3 + $0x10] sm:$0xff]  ;;  %p403_p3 = scmp.lt.s32.totalorder %s5588_s22, 1  ;;  %vm795_vm0 = vcmask 261120   ;;  %vm905_vm2 = vcmask 244736  }
   0xe   : > { %v8302_v3 = vpack.c.bf16 %v430_v1, %v429_v0  ;;  %v432_v4 = vld [vmem:[%s9870_s3 + $0x18] sm:$0xff]  ;;  %v433_v6 = vld [vmem:[%s9870_s3 + $0x20] sm:$0xff]  ;;  %v434_v7 = vld [vmem:[%s9870_s3 + $0x28] sm:$0xff]  ;;  %vm915_vm3 = vcmask 242688   ;;  %vm963_vm4 = vcmask 1045504   ;;  %vm8215_vm5 = vmmov 1  }
   0xf   : > { %v8307_v5 = vpack.c.bf16 %v432_v4, %v431_v2  ;;  %v412_v8 = vld [vmem:[%s9868_s1] sm:$0xff]  ;;  %s9978_s22 = smov (!%p403_p3, %s5588_s22), 1  ;;  %v413_v9 = vld [vmem:[%s9868_s1 + $0x8] sm:$0xff]  ;;  %v414_v11 = vld [vmem:[%s9868_s1 + $0x10] sm:$0xff]  ;;  %v8335_v13 = vpack.c.bf16 %v434_v7, %v433_v6  ;;  %s8216_s19 = smov 96   ;;  %vm1055_vm7 = vcmask 259072  }
  0x10   : > { %7022 = vmatprep.subr.bf16.mxu1 %v8302_v3  ;;  %v8325_v10 = vpack.c.bf16 %v413_v9, %v412_v8  ;;  %v415_v12 = vld [vmem:[%s9868_s1 + $0x18] sm:$0xff]  ;;  %s7733_s27 = smul.u32 96, %s9978_s22  ;;  %v416_v15 = vld [vmem:[%s9868_s1 + $0x20] sm:$0xff]  ;;  %v417_v16 = vld [vmem:[%s9868_s1 + $0x28] sm:$0xff]  ;;  %s8217_s23 = smov 64   ;;  %vm1347_vm8 = vcmask 523520  }
  0x11   : > { %9923 = vst [vmem:[#allocation4_spill] sm:$0xff] %v8307_v5  ;;  %7024 = vmatpush3.bf16.msra.mxu1 %v8302_v3  ;;  %9924 = vst [vmem:[#allocation5_spill] sm:$0xff] %v8335_v13  ;;  %v8337_v14 = vpack.c.bf16 %v415_v12, %v414_v11  ;;  %v435_v17 = vld [vmem:[%s9870_s3 + $0x30] sm:$0xff]  ;;  %v436_v18 = vld [vmem:[%s9870_s3 + $0x38] sm:$0xff]  ;;  %v8360_v19 = vpack.c.bf16 %v417_v16, %v416_v15  ;;  %s8218_s24 = smov 32   ;;  %vm1640_vm9 = vcmask 785920  }
  0x12   : > { %7026 = vmatprep.subr.bf16.mxu1 %v8307_v5  ;;  %6990 = vmatprep.subr.bf16.mxu0 %v8325_v10  ;;  %s8355_s20 = scalar_lea.vmem %s9867_s0, %s7733_s27  ;;  %v8366_v21 = vpack.c.bf16 %v436_v18, %v435_v17  ;;  %v418_v22 = vld [vmem:[%s9868_s1 + $0x30] sm:$0xff]  ;;  %v419_v23 = vld [vmem:[%s9868_s1 + $0x38] sm:$0xff]  ;;  %v437_v24 = vld [vmem:[%s9870_s3 + $0x40] sm:$0xff]  ;;  %vm1933_vm10 = vcmask 1048320   ;;  %vm1351_vm11 = vcmask 521472   ;;  %vm1644_vm12 = vcmask 783872  }
  0x13   : > { %6992 = vmatpush3.bf16.msra.mxu0 %v8325_v10  ;;  %v8363_v20 = vld [vmem:[%s8355_s20] sm:$0xff]  ;;  %v438_v25 = vld [vmem:[%s9870_s3 + $0x48] sm:$0xff]  ;;  %v8385_v26 = vpack.c.bf16 %v419_v23, %v418_v22  ;;  %v439_v30 = vld [vmem:[%s9870_s3 + $0x50] sm:$0xff]  ;;  %vm1937_vm13 = vcmask 1046272   ;;  %vm2165_vm14 = vcmask 588800   ;;  %vm2179_vm15 = vcmask 586752  }
  0x14   : > { %6994 = vmatprep.subr.bf16.mxu0 %v8337_v14  ;;  %9925 = vst [vmem:[#allocation6_spill] sm:$0xff] %v8366_v21  ;;  %6267 = vmatprep.mubr.f32.mxu1 %v8363_v20  ;;  %v8388_v27 = vpack.c.bf16 %v438_v25, %v437_v24  ;;  %v420_v28 = vld [vmem:[%s9868_s1 + $0x40] sm:$0xff]  ;;  %v421_v29 = vld [vmem:[%s9868_s1 + $0x48] sm:$0xff]  ;;  %v440_v31 = vld [vmem:[%s9870_s3 + $0x58] sm:$0xff] }
  0x15   : > { %7028 = vmatpush3.bf16.msra.mxu1 %v8307_v5  ;;  %6229 = vmatprep.mubr.f32.mxu0 %v8363_v20  ;;  %v8405_v32 = vpack.c.bf16 %v421_v29, %v420_v28  ;;  %v8408_v33 = vpack.c.bf16 %v440_v31, %v439_v30  ;;  %v422_v34 = vld [vmem:[%s9868_s1 + $0x50] sm:$0xff]  ;;  %v423_v35 = vld [vmem:[%s9868_s1 + $0x58] sm:$0xff]  ;;  %v441_v36 = vld [vmem:[%s9870_s3 + $0x60] sm:$0xff] }
  0x16   : > { %7030 = vmatprep.subr.bf16.mxu1 %v8335_v13  ;;  %9926 = vst [vmem:[#allocation7_spill] sm:$0xff] %v8388_v27  ;;  %v442_v37 = vld [vmem:[%s9870_s3 + $0x68] sm:$0xff]  ;;  %v8425_v38 = vpack.c.bf16 %v423_v35, %v422_v34  ;;  %v424_v40 = vld [vmem:[%s9868_s1 + $0x60] sm:$0xff]  ;;  %v443_v42 = vld [vmem:[%s9870_s3 + $0x70] sm:$0xff] }
  0x17   : > { %6996 = vmatpush3.bf16.msra.mxu0 %v8337_v14  ;;  %9927 = vst [vmem:[#allocation8_spill] sm:$0xff] %v8408_v33  ;;  %v8428_v39 = vpack.c.bf16 %v442_v37, %v441_v36  ;;  %v425_v41 = vld [vmem:[%s9868_s1 + $0x68] sm:$0xff]  ;;  %v444_v43 = vld [vmem:[%s9870_s3 + $0x78] sm:$0xff]  ;;  %v426_v46 = vld [vmem:[%s9868_s1 + $0x70] sm:$0xff] }
  0x18   : > { %6998 = vmatprep.subr.bf16.mxu0 %v8360_v19  ;;  %v8445_v44 = vpack.c.bf16 %v425_v41, %v424_v40  ;;  %v8448_v45 = vpack.c.bf16 %v444_v43, %v443_v42  ;;  %v427_v47 = vld [vmem:[%s9868_s1 + $0x78] sm:$0xff]  ;;  %v8465_v49 = vld [vmem:[%s8355_s20 + $0x8] sm:$0xff]  ;;  %v8469_v50 = vld [vmem:[%s8355_s20 + $0x10] sm:$0xff] }
  0x19   : > { %7032 = vmatpush3.bf16.msra.mxu1 %v8335_v13  ;;  %9928 = vst [vmem:[#allocation9_spill] sm:$0xff] %v8428_v39  ;;  %v8459_v48 = vpack.c.bf16 %v427_v47, %v426_v46  ;;  %v8475_v51 = vld [vmem:[%s8355_s20 + $0x18] sm:$0x3f]  ;;  %v5596_v52 = vld [vmem:[%s9871_s4] ss:$0 sm:$0xff]  ;;  %vm8490_vm1 = vmpackc.low %vm795_vm0, %vm795_vm0 }
  0x1a   : > { %7034 = vmatprep.subr.bf16.mxu1 %v8366_v21  ;;  %9929 = vst [vmem:[#allocation10_spill] sm:$0xff] %v8448_v45  ;;  %v5595_v57 = vld [vmem:[%s9869_s2] ss:$0 sm:$0xff]  ;;  %v447_v23 = vld [vmem:[%s9872_s5 + $0x8] sm:$0xff]  ;;  %v448_v24 = vld [vmem:[%s9872_s5 + $0x10] sm:$0xff] }
  0x1b   : > { %7000 = vmatpush3.bf16.msra.mxu0 %v8360_v19  ;;  %9930 = vst [vmem:[#allocation11_spill] sm:$0xff] %v8459_v48  ;;  %v446_v22 = vld [vmem:[%s9872_s5] sm:$0xff]  ;;  %v449_v28 = vld [vmem:[%s9872_s5 + $0x18] sm:$0xff]  ;;  %v451_v31 = vld [vmem:[%s9872_s5 + $0x28] sm:$0xff] }
  0x1c   : > { %7002 = vmatprep.subr.bf16.mxu0 %v8385_v26  ;;  %v8531_v25 = vpack.c.bf16 %v447_v23, %v446_v22  ;;  %v8536_v29 = vpack.c.bf16 %v449_v28, %v448_v24  ;;  %v450_v30 = vld [vmem:[%s9872_s5 + $0x20] sm:$0xff]  ;;  %v452_v35 = vld [vmem:[%s9872_s5 + $0x30] sm:$0xff]  ;;  %v453_v36 = vld [vmem:[%s9872_s5 + $0x38] sm:$0xff] }
  0x1d   : > { %7036 = vmatpush3.bf16.msra.mxu1 %v8366_v21  ;;  %v8547_v34 = vpack.c.bf16 %v451_v31, %v450_v30  ;;  %v8557_v37 = vpack.c.bf16 %v453_v36, %v452_v35  ;;  %v454_v40 = vld [vmem:[%s9872_s5 + $0x40] sm:$0xff]  ;;  %v455_v41 = vld [vmem:[%s9872_s5 + $0x48] sm:$0xff]  ;;  %v456_v43 = vld [vmem:[%s9872_s5 + $0x50] sm:$0xff] }
  0x1e   : > { %7038 = vmatprep.subr.bf16.mxu1 %v8388_v27  ;;  %9933 = vst [vmem:[#allocation12_spill] sm:$0xff] %v8531_v25  ;;  %9934 = vst [vmem:[#allocation13_spill] sm:$0xff] %v8536_v29  ;;  %v8567_v42 = vpack.c.bf16 %v455_v41, %v454_v40  ;;  %v457_v46 = vld [vmem:[%s9872_s5 + $0x58] sm:$0xff] }
  0x1f   : > { %7004 = vmatpush3.bf16.msra.mxu0 %v8385_v26  ;;  %9935 = vst [vmem:[#allocation14_spill] sm:$0xff] %v8547_v34  ;;  %9936 = vst [vmem:[#allocation15_spill] sm:$0xff] %v8557_v37  ;;  %v8577_v47 = vpack.c.bf16 %v457_v46, %v456_v43 }
  0x20   : > { %7006 = vmatprep.subr.bf16.mxu0 %v8405_v32  ;;  %9937 = vst [vmem:[#allocation16_spill] sm:$0xff] %v8567_v42  ;;  %vm8619_vm6 = vmpackc.low %vm963_vm4, %vm8215_vm5 }
  0x21   : > { %7040 = vmatpush3.bf16.msra.mxu1 %v8388_v27  ;;  %9938 = vst [vmem:[#allocation17_spill] sm:$0xff] %v8577_v47 }
  0x22   : > { %7042 = vmatprep.subr.bf16.mxu1 %v8408_v33 }
  0x23   : > { %7008 = vmatpush3.bf16.msra.mxu0 %v8405_v32 }
  0x24   : > { %7010 = vmatprep.subr.bf16.mxu0 %v8425_v38 }
  0x25   : > { %7044 = vmatpush3.bf16.msra.mxu1 %v8408_v33 }
  0x26   : > { %7046 = vmatprep.subr.bf16.mxu1 %v8428_v39 }
  0x27   : > { %7012 = vmatpush3.bf16.msra.mxu0 %v8425_v38 }
  0x28   : > { %7014 = vmatprep.subr.bf16.mxu0 %v8445_v44 }
  0x29   : > { %7048 = vmatpush3.bf16.msra.mxu1 %v8428_v39 }
  0x2a   : > { %7050 = vmatprep.subr.bf16.mxu1 %v8448_v45 }
  0x2b   : > { %7016 = vmatpush3.bf16.msra.mxu0 %v8445_v44 }
  0x2c   : > { %7018 = vmatprep.subr.bf16.mxu0 %v8459_v48 }
  0x2d   : > { %7052 = vmatpush3.bf16.msra.mxu1 %v8448_v45 }
  0x2f   : > { %7020 = vmatpush3.bf16.msra.mxu0 %v8459_v48 }
  0x30   : > { %6268 = vmatmul.mubr.f32.vlgmr.msra.gmra.mrb[0].mxu1 %v8465_v49  ;;  %7054 = vmatprep.subr.bf16.mxu0 %v8531_v25 }
  0x31   : > { %6270 = vmatprep.mubr.f32.mxu1 %v8469_v50 }
  0x32   : > { %6230 = vmatmul.mubr.f32.vlgmr.msra.gmra.mrb[0].mxu0 %v8465_v49 }
  0x33   : > { %6232 = vmatprep.mubr.f32.mxu0 %v8469_v50  ;;  %7056 = vmatpush3.bf16.msra.mxu0 %v8531_v25 }
  0x34   : > { %6271 = vmatmul.mubr.f32.gmra.mrb[2].mxu1 %v8475_v51  ;;  %7058 = vmatprep.subr.bf16.mxu0 %v8536_v29 }
  0x36   : > { %6233 = vmatmul.mubr.f32.gmra.mrb[2].mxu0 %v8475_v51 }
  0x37   : > { %6305 = vmatprep.mubr.f32.mxu0 %v8363_v20  ;;  %7060 = vmatpush3.bf16.msra.mxu0 %v8536_v29 }
  0x38   : > { %7062 = vmatprep.subr.bf16.mxu0 %v8547_v34 }
  0x3b   : > { %7064 = vmatpush3.bf16.msra.mxu0 %v8547_v34 }
  0x3c   : > { %7066 = vmatprep.subr.bf16.mxu0 %v8557_v37 }
  0x3f   : > { %7068 = vmatpush3.bf16.msra.mxu0 %v8557_v37 }
  0x40   : > { %7070 = vmatprep.subr.bf16.mxu0 %v8567_v42 }
  0x43   : > { %7072 = vmatpush3.bf16.msra.mxu0 %v8567_v42 }
  0x44   : > { %7074 = vmatprep.subr.bf16.mxu0 %v8577_v47 }
  0x47   : > { %7076 = vmatpush3.bf16.msra.mxu0 %v8577_v47 }
 0x103   : > { %v6269_v53 = vpop.f32.mrb[0].mxu1 }
 0x104   : > { %v691_v54 = vadd.f32 %v6269_v53, %v5596_v52  ;;  %v685_v55 = vpop.f32.mrb[1].mxu1  ;;  %v459_v53 = vld [vmem:[%s9872_s5 + $0x68] sm:$0xff] }
 0x105   : > { %v686_v56 = vadd.f32 %v5596_v52, %v685_v55  ;;  %v6231_v59 = vpop.f32.mrb[0].mxu0  ;;  %v460_v55 = vld [vmem:[%s9872_s5 + $0x70] sm:$0xff] }
 0x106   : > { %v590_v62 = vpop.f32.mrb[1].mxu0  ;;  %v596_v15 = vadd.f32 %v6231_v59, %v5595_v57 }
 0x107   : > { %v7085_v60 = vpack.c.bf16 %v691_v54, %v686_v56  ;;  %v6272_v61 = vpop.f32.mrb[2].mxu1  ;;  %v8494_v63 = vpack.i.bf16 %v691_v54, %v686_v56  ;;  %v591_v2 = vadd.f32 %v5595_v57, %v590_v62  ;;  %v461_v56 = vld [vmem:[%s9872_s5 + $0x78] sm:$0xff] }
 0x108   : > { %v701_v0 = vadd.f32 %v6272_v61, %v5596_v52  ;;  %v695_v1 = vpop.f32.mrb[3].mxu1  ;;  %v8512_v18 = vmul.f32 0.17677669, %v596_v15 }
 0x109   : > { %7087 = vmatprep.subr.msk.bf16.mxu1 %vm8490_vm1, %v7085_v60  ;;  %v696_v4 = vadd.f32 %v5596_v52, %v695_v1  ;;  %v8500_v6 = vmul.f32 0.17677669, %v591_v2  ;;  %v6234_v7 = vpop.f32.mrb[2].mxu0  ;;  %v458_v52 = vld [vmem:[%s9872_s5 + $0x60] sm:$0xff] }
 0x10a   : > { %7090 = vmatpush3.bf16.xpose.msk.msra.mxu1 %vm8490_vm1, %v7085_v60  ;;  %v600_v9 = vpop.f32.mrb[3].mxu0  ;;  %v606_v16 = vadd.f32 %v6234_v7, %v5595_v57  ;;  %v8587_v54 = vpack.c.bf16 %v459_v53, %v458_v52 }
 0x10b   : > { %v7091_v8 = vpack.c.bf16 %v701_v0, %v696_v4  ;;  %v8502_v11 = vpack.i.bf16 %v701_v0, %v696_v4  ;;  %6319 = vmatprep.mubr.msk.f32.mxu1 %vm795_vm0, %v8500_v6  ;;  %v601_v12 = vadd.f32 %v5595_v57, %v600_v9  ;;  %v8597_v57 = vpack.c.bf16 %v461_v56, %v460_v55  ;;  %v5597_v55 = vld [vmem:[%s9873_s6] ss:$0 sm:$0xff] }
 0x10c   : > { %v8514_v20 = vmul.f32 0.17677669, %v606_v16  ;;  %9939 = vst [vmem:[#allocation18_spill] sm:$0xff] %v8587_v54  ;;  %7078 = vmatprep.subr.bf16.mxu0 %v8587_v54 }
 0x10d   : > { %7093 = vmatprep.subr.msk.bf16.mxu1 %vm8490_vm1, %v7091_v8  ;;  %v8510_v17 = vmul.f32 0.17677669, %v601_v12  ;;  %9940 = vst [vmem:[#allocation19_spill] sm:$0xff] %v8597_v57  ;;  %7080 = vmatpush3.bf16.msra.mxu0 %v8587_v54 }
 0x10e   : > { %7082 = vmatprep.subr.bf16.mxu0 %v8597_v57 }
 0x111   : > { %7084 = vmatpush3.bf16.msra.mxu0 %v8597_v57 }
 0x112   : > { %7096 = vmatpush3.bf16.xpose.msk.msra.mxu1 %vm8490_vm1, %v7091_v8 }
 0x114   : > { %6306 = vmatmul.mubr.f32.vlgmr.msra.gmra.mrb[4].mxu0 %v8465_v49 }
 0x115   : > { %6308 = vmatprep.mubr.f32.mxu0 %v8469_v50 }
 0x118   : > { %6309 = vmatmul.mubr.f32.gmra.mrb[6].mxu0 %v8475_v51 }
 0x119   : > { %6320 = vmatmul.mubr.msk.f32.vlgmr.msra.gmra.mrb[4].mxu1 %vm795_vm0, %v8512_v18 }
 0x11a   : > { %6322 = vmatprep.mubr.msk.f32.mxu1 %vm795_vm0, %v8510_v17 }
 0x11d   : > { %6323 = vmatmul.mubr.msk.f32.gmra.mrb[6].mxu1 %vm795_vm0, %v8514_v20 }
 0x1e7   : > { %v6307_v50 = vpop.f32.mrb[4].mxu0 }
 0x1e8   : > { %v776_v51 = vpop.f32.mrb[5].mxu0  ;;  %v782_v56 = vadd.f32 %v6307_v50, %v5597_v55 }
 0x1eb   : > { %v6310_v4 = vpop.f32.mrb[6].mxu0 }
 0x1ec   : > { %v6321_v59 = vpop.f32.mrb[4].mxu1 }
 0x1ed   : > { %v886_v60 = vpop.f32.mrb[5].mxu1  ;;  %v909_v1 = vsel %vm905_vm2, %v6321_v59, -inf }
 0x1ee   : > { %v906_v61 = vsel %vm905_vm2, %v886_v60, -inf }
 0x1ef   : > { %907 = vmax.xlane.f32.xlu0 %v906_v61  ;;  %v786_v61 = vpop.f32.mrb[7].mxu0 }
 0x1f0   : > { %v6324_v62 = vpop.f32.mrb[6].mxu1 }
 0x1f1   : > { %v896_v0 = vpop.f32.mrb[7].mxu1  ;;  %v916_v49 = vsel %vm915_vm3, %v6324_v62, -inf }
 0x1f2   : > { %v912_v2 = vsel %vm905_vm2, %v896_v0, -inf }
 0x1f3   : > { %910 = vmax.xlane.f32.xlu0 %v909_v1  ;;  %913 = vmax.xlane.f32.xlu1 %v912_v2 }
 0x1f7   : > { %917 = vmax.xlane.f32.xlu1 %v916_v49 }
 0x27c   : > { %v908_v7 = vpop.xlane.xlu0 %907 }
 0x27d   : > { %v919_v8 = vsub.f32 %v886_v60, %v908_v7  ;;  %v792_v60 = vadd.f32 %v6310_v4, %v5597_v55 }
 0x27f   : > { %v923_v9 = vmul.f32 1.442695, %v919_v8 }
 0x280   : > { %v911_v12 = vpop.xlane.xlu0 %910  ;;  %v914_v15 = vpop.xlane.xlu1 %913 }
 0x281   : > { %7927 = vpow2.f32 %v923_v9  ;;  %v920_v16 = vsub.f32 %v6321_v59, %v911_v12  ;;  %v921_v22 = vsub.f32 %v896_v0, %v914_v15  ;;  %v777_v59 = vadd.f32 %v5597_v55, %v776_v51 }
 0x282   : > { %v787_v0 = vadd.f32 %v5597_v55, %v786_v61 }
 0x283   : > { %v925_v23 = vmul.f32 1.442695, %v920_v16  ;;  %v927_v24 = vmul.f32 1.442695, %v921_v22  ;;  %v8616_v1 = vpack.i.bf16 %v782_v56, %v777_v59 }
 0x284   : > { %v918_v28 = vpop.xlane.xlu1 %917  ;;  %v7101_v2 = vpack.c.bf16 %v792_v60, %v787_v0  ;;  %v8623_v7 = vpack.i.bf16 %v792_v60, %v787_v0 }
 0x285   : > { %7929 = vpow2.f32 %v925_v23  ;;  %v922_v30 = vsub.f32 %v6324_v62, %v918_v28  ;;  %v7097_v62 = vpack.c.bf16 %v782_v56, %v777_v59 }
 0x286   : > { %7931 = vpow2.f32 %v927_v24 }
 0x287   : > { %v929_v31 = vmul.f32 1.442695, %v922_v30  ;;  %7098 = vmatprep.subr.bf16.mxu1 %v7097_v62 }
 0x288   : > { %7100 = vmatpush3.bf16.msra.mxu1 %v7097_v62 }
 0x289   : > { %7933 = vpow2.f32 %v929_v31  ;;  %7103 = vmatprep.subr.msk.bf16.mxu1 %vm8619_vm6, %v7101_v2 }
 0x28b   : > { %v7928_v35 = vpop.eup %7927 }
 0x28c   : > { %v931_v36 = vsel %vm905_vm2, %v7928_v35, 0.0  ;;  %7106 = vmatpush3.bf16.msk.msra.mxu1 %vm8619_vm6, %v7101_v2 }
 0x28d   : > { %932 = vadd.xlane.f32.xlu0 %v931_v36 }
 0x28f   : > { %v7930_v40 = vpop.eup %7929 }
 0x290   : > { %v7932_v41 = vpop.eup %7931  ;;  %v934_v43 = vsel %vm905_vm2, %v7930_v40, 0.0 }
 0x291   : > { %935 = vadd.xlane.f32.xlu1 %v934_v43  ;;  %v937_v46 = vsel %vm905_vm2, %v7932_v41, 0.0 }
 0x292   : > { %938 = vadd.xlane.f32.xlu0 %v937_v46 }
 0x293   : > { %v7934_v52 = vpop.eup %7933 }
 0x294   : > { %v940_v53 = vsel %vm915_vm3, %v7934_v52, 0.0 }
 0x295   : > { %941 = vadd.xlane.f32.xlu1 %v940_v53 }
 0x2a6   : > { %7753 = vrot.lane.b32.xlu1 %v8502_v11, %s8216_s19 }
 0x2a8   : > { %7748 = vrot.lane.b32.xlu0 %v8494_v63, %s8216_s19 }
 0x2aa   : > { %1057 = vrot.lane.b32.xlu1 %v8500_v6, %s8216_s19 }
 0x2ac   : > { %1061 = vrot.lane.b32.xlu0 %v8510_v17, %s8216_s19 }
 0x2ae   : > { %1059 = vrot.lane.b32.xlu1 %v8512_v18, %s8216_s19 }
 0x2b2   : > { %1063 = vrot.lane.b32.xlu1 %v8514_v20, %s8216_s19 }
 0x31a   : > { %v933_v50 = vpop.xlane.xlu0 %932 }
 0x31b   : > { %7935 = vrcp.f32 %v933_v50 }
 0x31e   : > { %v936_v51 = vpop.xlane.xlu1 %935 }
 0x31f   : > { %v939_v4 = vpop.xlane.xlu0 %938  ;;  %7937 = vrcp.f32 %v936_v51 }
 0x320   : > { %7939 = vrcp.f32 %v939_v4 }
 0x322   : > { %v942_v8 = vpop.xlane.xlu1 %941 }
 0x323   : > { %v7749_v9 = vpop.permute.xlu0 %7748  ;;  %7941 = vrcp.f32 %v942_v8 }
 0x324   : > { %v7751_v12 = vunpack.i.h.bf16 %v7749_v9  ;;  %v7750_v15 = vunpack.i.l.bf16 %v7749_v9 }
 0x325   : > { %v7936_v16 = vpop.eup %7935 }
 0x326   : > { %v7107_v22 = vpack.c.bf16 %v7751_v12, %v7750_v15  ;;  %v7754_v23 = vpop.permute.xlu1 %7753  ;;  %v947_v24 = vmul.f32 %v7936_v16, %v7928_v35 }
 0x327   : > { %v7756_v28 = vunpack.i.h.bf16 %v7754_v23  ;;  %v7755_v30 = vunpack.i.l.bf16 %v7754_v23 }
 0x328   : > { %7109 = vmatprep.subr.msk.bf16.mxu1 %vm8490_vm1, %v7107_v22  ;;  %6333 = vmatprep.mubr.msk.f32.mxu1 %vm905_vm2, %v947_v24 }
 0x329   : > { %v7938_v31 = vpop.eup %7937  ;;  %v7113_v53 = vpack.c.bf16 %v7756_v28, %v7755_v30 }
 0x32a   : > { %v7940_v36 = vpop.eup %7939  ;;  %v948_v43 = vmul.f32 %v7938_v31, %v7930_v40  ;;  %v1058_v56 = vpop.permute.xlu1 %1057 }
 0x32b   : > { %v949_v46 = vmul.f32 %v7940_v36, %v7932_v41  ;;  %v1062_v41 = vpop.permute.xlu0 %1061 }
 0x32c   : > { %6334 = vmatmul.mubr.msk.f32.vlgmr.msra.gmra.mrb[8].mxu1 %vm905_vm2, %v948_v43 }
 0x32d   : > { %v7942_v55 = vpop.eup %7941  ;;  %7112 = vmatpush3.bf16.xpose.msk.msra.mxu1 %vm8490_vm1, %v7107_v22  ;;  %6336 = vmatprep.mubr.msk.f32.mxu1 %vm905_vm2, %v949_v46 }
 0x32e   : > { %7115 = vmatprep.subr.msk.bf16.mxu1 %vm8490_vm1, %v7113_v53  ;;  %v950_v35 = vmul.f32 %v7942_v55, %v7934_v52  ;;  %v1060_v40 = vpop.permute.xlu1 %1059 }
 0x330   : > { %6337 = vmatmul.mubr.msk.f32.gmra.mrb[10].mxu1 %vm905_vm2, %v950_v35 }
 0x331   : > { %6347 = vmatprep.mubr.msk.f32.mxu1 %vm795_vm0, %v1058_v56 }
 0x332   : > { %v1064_v59 = vpop.permute.xlu1 %1063 }
 0x335   : > { %7118 = vmatpush3.bf16.xpose.msk.msra.mxu1 %vm8490_vm1, %v7113_v53 }
 0x33c   : > { %6348 = vmatmul.mubr.msk.f32.vlgmr.msra.gmra.mrb[12].mxu1 %vm795_vm0, %v1060_v40 }
 0x33d   : > { %6350 = vmatprep.mubr.msk.f32.mxu1 %vm795_vm0, %v1062_v41 }
 0x340   : > { %6351 = vmatmul.mubr.msk.f32.gmra.mrb[14].mxu1 %vm795_vm0, %v1064_v59 }
 0x3ff   : > { %v6335_v60 = vpop.f32.mrb[8].mxu1 }
 0x400   : > { %1053 = vst.msk [vmem:[#allocation2 + $0x8] sm:$0xff] %vm795_vm0, %v6335_v60  ;;  %v1033_v52 = vpop.f32.mrb[9].mxu1 }
 0x401   : > { %1052 = vst.msk [vmem:[#allocation2] sm:$0xff] %vm795_vm0, %v1033_v52 }
 0x403   : > { %v6338_v61 = vpop.f32.mrb[10].mxu1 }
 0x404   : > { %1056 = vst.msk [vmem:[#allocation2 + $0x18] sm:$0x3f] %vm1055_vm7, %v6338_v61  ;;  %v1043_v62 = vpop.f32.mrb[11].mxu1 }
 0x405   : > { %1054 = vst.msk [vmem:[#allocation2 + $0x10] sm:$0xff] %vm795_vm0, %v1043_v62 }
 0x40f   : > { %v6349_v0 = vpop.f32.mrb[12].mxu1 }
 0x410   : > { %v1155_v2 = vpop.f32.mrb[13].mxu1  ;;  %v1177_v50 = vsel %vm905_vm2, %v6349_v0, -inf }
 0x411   : > { %1178 = vmax.xlane.f32.xlu1 %v1177_v50  ;;  %v1174_v51 = vsel %vm905_vm2, %v1155_v2, -inf }
 0x412   : > { %1175 = vmax.xlane.f32.xlu0 %v1174_v51 }
 0x413   : > { %v6352_v4 = vpop.f32.mrb[14].mxu1 }
 0x414   : > { %v1165_v8 = vpop.f32.mrb[15].mxu1  ;;  %v1183_v12 = vsel %vm915_vm3, %v6352_v4, -inf }
 0x415   : > { %v1180_v9 = vsel %vm905_vm2, %v1165_v8, -inf }
 0x416   : > { %1181 = vmax.xlane.f32.xlu0 %v1180_v9 }
 0x41a   : > { %1184 = vmax.xlane.f32.xlu0 %v1183_v12 }
 0x49e   : > { %v1179_v15 = vpop.xlane.xlu1 %1178 }
 0x49f   : > { %v1187_v16 = vsub.f32 %v6349_v0, %v1179_v15  ;;  %v1176_v22 = vpop.xlane.xlu0 %1175 }
 0x4a0   : > { %v1186_v23 = vsub.f32 %v1155_v2, %v1176_v22 }
 0x4a1   : > { %v1192_v24 = vmul.f32 1.442695, %v1187_v16 }
 0x4a2   : > { %v1190_v28 = vmul.f32 1.442695, %v1186_v23 }
 0x4a3   : > { %7943 = vpow2.f32 %v1192_v24  ;;  %v1182_v46 = vpop.xlane.xlu0 %1181 }
 0x4a4   : > { %7945 = vpow2.f32 %v1190_v28  ;;  %v1188_v53 = vsub.f32 %v1165_v8, %v1182_v46 }
 0x4a6   : > { %v1194_v55 = vmul.f32 1.442695, %v1188_v53 }
 0x4a7   : > { %v1185_v35 = vpop.xlane.xlu0 %1184 }
 0x4a8   : > { %v1189_v56 = vsub.f32 %v6352_v4, %v1185_v35  ;;  %7947 = vpow2.f32 %v1194_v55 }
 0x4aa   : > { %v1196_v40 = vmul.f32 1.442695, %v1189_v56 }
 0x4ac   : > { %7949 = vpow2.f32 %v1196_v40 }
 0x4ad   : > { %v7944_v30 = vpop.eup %7943 }
 0x4ae   : > { %v7946_v31 = vpop.eup %7945  ;;  %v1201_v36 = vsel %vm905_vm2, %v7944_v30, 0.0 }
 0x4af   : > { %1202 = vadd.xlane.f32.xlu1 %v1201_v36  ;;  %v1198_v43 = vsel %vm905_vm2, %v7946_v31, 0.0 }
 0x4b0   : > { %1199 = vadd.xlane.f32.xlu0 %v1198_v43 }
 0x4b2   : > { %v7948_v41 = vpop.eup %7947 }
 0x4b3   : > { %v1204_v59 = vsel %vm905_vm2, %v7948_v41, 0.0 }
 0x4b6   : > { %v7950_v60 = vpop.eup %7949 }
 0x4b7   : > { %v1207_v52 = vsel %vm915_vm3, %v7950_v60, 0.0 }
 0x4c0   : > { %7763 = vrot.lane.b32.xlu1 %v8623_v7, %s8216_s19 }
 0x4c4   : > { %7768 = vrot.lane.b32.xlu1 %v8494_v63, %s8217_s23 }
 0x4c6   : > { %7758 = vrot.lane.b32.xlu0 %v8616_v1, %s8216_s19 }
 0x4c8   : > { %7773 = vrot.lane.b32.xlu1 %v8502_v11, %s8217_s23 }
 0x4e5   : > { %1205 = vadd.xlane.f32.xlu0 %v1204_v59 }
 0x4ec   : > { %1208 = vadd.xlane.f32.xlu1 %v1207_v52 }
 0x4fb   : > { %1353 = vrot.lane.b32.xlu0 %v8500_v6, %s8217_s23 }
 0x4fd   : > { %1355 = vrot.lane.b32.xlu1 %v8512_v18, %s8217_s23 }
 0x4ff   : > { %1357 = vrot.lane.b32.xlu0 %v8510_v17, %s8217_s23 }
 0x501   : > { %1359 = vrot.lane.b32.xlu1 %v8514_v20, %s8217_s23 }
 0x53c   : > { %v1203_v61 = vpop.xlane.xlu1 %1202 }
 0x53d   : > { %v1200_v62 = vpop.xlane.xlu0 %1199 }
 0x53e   : > { %7951 = vrcp.f32 %v1200_v62 }
 0x53f   : > { %7953 = vrcp.f32 %v1203_v61 }
 0x540   : > { %v7764_v0 = vpop.permute.xlu1 %7763 }
 0x541   : > { %v7759_v2 = vpop.permute.xlu0 %7758  ;;  %v7766_v50 = vunpack.i.h.bf16 %v7764_v0  ;;  %v7765_v51 = vunpack.i.l.bf16 %v7764_v0 }
 0x542   : > { %v7761_v4 = vunpack.i.h.bf16 %v7759_v2  ;;  %v7760_v8 = vunpack.i.l.bf16 %v7759_v2 }
 0x543   : > { %v7123_v15 = vpack.c.bf16 %v7766_v50, %v7765_v51 }
 0x544   : > { %v7769_v9 = vpop.permute.xlu1 %7768  ;;  %v7119_v12 = vpack.c.bf16 %v7761_v4, %v7760_v8 }
 0x545   : > { %v7771_v16 = vunpack.i.h.bf16 %v7769_v9  ;;  %v7770_v22 = vunpack.i.l.bf16 %v7769_v9 }
 0x546   : > { %7120 = vmatprep.subr.bf16.mxu0 %v7119_v12 }
 0x547   : > { %7122 = vmatpush3.bf16.msra.mxu0 %v7119_v12  ;;  %v7129_v36 = vpack.c.bf16 %v7771_v16, %v7770_v22 }
 0x548   : > { %v7952_v23 = vpop.eup %7951  ;;  %7125 = vmatprep.subr.msk.bf16.mxu0 %vm8619_vm6, %v7123_v15  ;;  %v7774_v46 = vpop.permute.xlu1 %7773 }
 0x549   : > { %v7954_v24 = vpop.eup %7953  ;;  %v1214_v28 = vmul.f32 %v7952_v23, %v7946_v31  ;;  %v7776_v53 = vunpack.i.h.bf16 %v7774_v46  ;;  %v7775_v55 = vunpack.i.l.bf16 %v7774_v46 }
 0x54a   : > { %v1215_v43 = vmul.f32 %v7954_v24, %v7944_v30 }
 0x54b   : > { %7128 = vmatpush3.bf16.msk.msra.mxu0 %vm8619_vm6, %v7123_v15  ;;  %6361 = vmatprep.mubr.msk.f32.mxu0 %vm905_vm2, %v1214_v28  ;;  %v7135_v35 = vpack.c.bf16 %v7776_v53, %v7775_v55 }
 0x54c   : > { %7131 = vmatprep.subr.msk.bf16.mxu0 %vm8490_vm1, %v7129_v36 }
 0x54e   : > { %6362 = vmatmul.mubr.msk.f32.vlgmr.msra.gmra.mrb[8].mxu0 %vm905_vm2, %v1215_v43 }
 0x554   : > { %7134 = vmatpush3.bf16.xpose.msk.msra.mxu0 %vm8490_vm1, %v7129_v36 }
 0x555   : > { %7137 = vmatprep.subr.msk.bf16.mxu0 %vm8490_vm1, %v7135_v35 }
 0x55c   : > { %7140 = vmatpush3.bf16.xpose.msk.msra.mxu0 %vm8490_vm1, %v7135_v35 }
 0x572   : > { %v1206_v31 = vpop.xlane.xlu0 %1205 }
 0x573   : > { %7955 = vrcp.f32 %v1206_v31 }
 0x576   : > { %v1354_v52 = vpop.permute.xlu0 %1353 }
 0x579   : > { %v1209_v30 = vpop.xlane.xlu1 %1208 }
 0x57a   : > { %7957 = vrcp.f32 %v1209_v30  ;;  %v1358_v0 = vpop.permute.xlu0 %1357 }
 0x57d   : > { %v7956_v56 = vpop.eup %7955  ;;  %v1356_v62 = vpop.permute.xlu1 %1355 }
 0x57e   : > { %v1216_v40 = vmul.f32 %v7956_v56, %v7948_v41 }
 0x580   : > { %6364 = vmatprep.mubr.msk.f32.mxu0 %vm905_vm2, %v1216_v40 }
 0x581   : > { %v1360_v2 = vpop.permute.xlu1 %1359 }
 0x584   : > { %v7958_v59 = vpop.eup %7957 }
 0x585   : > { %v1217_v61 = vmul.f32 %v7958_v59, %v7950_v60 }
 0x587   : > { %6365 = vmatmul.mubr.msk.f32.gmra.mrb[10].mxu0 %vm905_vm2, %v1217_v61 }
 0x588   : > { %6375 = vmatprep.mubr.msk.f32.mxu0 %vm795_vm0, %v1354_v52 }
 0x58b   : > { %6376 = vmatmul.mubr.msk.f32.vlgmr.msra.gmra.mrb[12].mxu0 %vm795_vm0, %v1356_v62 }
 0x58c   : > { %6378 = vmatprep.mubr.msk.f32.mxu0 %vm795_vm0, %v1358_v0 }
 0x58f   : > { %6379 = vmatmul.mubr.msk.f32.gmra.mrb[14].mxu0 %vm795_vm0, %v1360_v2 }
 0x621   : > { %v8705_v50 = vpop.f32.mrb[8].mxu0 }
 0x622   : > { %v8707_v41 = vpop.f32.mrb[9].mxu0 }
 0x65a   : > { %v8709_v51 = vpop.f32.mrb[10].mxu0 }
 0x65b   : > { %v8711_v60 = vpop.f32.mrb[11].mxu0 }
 0x65e   : > { %v6377_v4 = vpop.f32.mrb[12].mxu0 }
 0x65f   : > { %v1451_v8 = vpop.f32.mrb[13].mxu0  ;;  %v1473_v9 = vsel %vm905_vm2, %v6377_v4, -inf }
 0x660   : > { %1474 = vmax.xlane.f32.xlu1 %v1473_v9  ;;  %v1470_v12 = vsel %vm905_vm2, %v1451_v8, -inf }
 0x661   : > { %1471 = vmax.xlane.f32.xlu0 %v1470_v12 }
 0x662   : > { %v6380_v15 = vpop.f32.mrb[14].mxu0 }
 0x663   : > { %v1461_v16 = vpop.f32.mrb[15].mxu0  ;;  %v1479_v23 = vsel %vm915_vm3, %v6380_v15, -inf }
 0x664   : > { %v1476_v22 = vsel %vm905_vm2, %v1461_v16, -inf }
 0x665   : > { %1477 = vmax.xlane.f32.xlu0 %v1476_v22 }
 0x669   : > { %1480 = vmax.xlane.f32.xlu0 %v1479_v23 }
 0x6ed   : > { %v1475_v24 = vpop.xlane.xlu1 %1474 }
 0x6ee   : > { %v1483_v28 = vsub.f32 %v6377_v4, %v1475_v24  ;;  %v1472_v36 = vpop.xlane.xlu0 %1471 }
 0x6ef   : > { %v1482_v43 = vsub.f32 %v1451_v8, %v1472_v36 }
 0x6f0   : > { %v1488_v46 = vmul.f32 1.442695, %v1483_v28 }
 0x6f1   : > { %v1486_v53 = vmul.f32 1.442695, %v1482_v43 }
 0x6f2   : > { %7959 = vpow2.f32 %v1488_v46  ;;  %v1478_v56 = vpop.xlane.xlu0 %1477 }
 0x6f3   : > { %7961 = vpow2.f32 %v1486_v53  ;;  %v1484_v40 = vsub.f32 %v1461_v16, %v1478_v56 }
 0x6f5   : > { %v1490_v59 = vmul.f32 1.442695, %v1484_v40 }
 0x6f6   : > { %v1481_v52 = vpop.xlane.xlu0 %1480 }
 0x6f7   : > { %v1485_v61 = vsub.f32 %v6380_v15, %v1481_v52  ;;  %7963 = vpow2.f32 %v1490_v59 }
 0x6f9   : > { %v1492_v62 = vmul.f32 1.442695, %v1485_v61 }
 0x6fb   : > { %7965 = vpow2.f32 %v1492_v62 }
 0x6fc   : > { %v7960_v55 = vpop.eup %7959 }
 0x6fd   : > { %v7962_v35 = vpop.eup %7961  ;;  %v1497_v31 = vsel %vm905_vm2, %v7960_v55, 0.0 }
 0x6fe   : > { %1498 = vadd.xlane.f32.xlu1 %v1497_v31  ;;  %v1494_v30 = vsel %vm905_vm2, %v7962_v35, 0.0 }
 0x6ff   : > { %1495 = vadd.xlane.f32.xlu0 %v1494_v30 }
 0x701   : > { %v7964_v0 = vpop.eup %7963 }
 0x702   : > { %v1500_v2 = vsel %vm905_vm2, %v7964_v0, 0.0 }
 0x705   : > { %v7966_v4 = vpop.eup %7965 }
 0x70f   : > { %7783 = vrot.lane.b32.xlu1 %v8623_v7, %s8217_s23 }
 0x713   : > { %7788 = vrot.lane.b32.xlu1 %v8494_v63, %s8218_s24  ;;  %v1503_v63 = vsel %vm915_vm3, %v7966_v4, 0.0 }
 0x715   : > { %7778 = vrot.lane.b32.xlu0 %v8616_v1, %s8217_s23 }
 0x717   : > { %7793 = vrot.lane.b32.xlu1 %v8502_v11, %s8218_s24 }
 0x734   : > { %1501 = vadd.xlane.f32.xlu0 %v1500_v2 }
 0x73b   : > { %1504 = vadd.xlane.f32.xlu1 %v1503_v63 }
 0x74a   : > { %1646 = vrot.lane.b32.xlu0 %v8500_v6, %s8218_s24 }
 0x74c   : > { %1648 = vrot.lane.b32.xlu1 %v8512_v18, %s8218_s24 }
 0x74e   : > { %1650 = vrot.lane.b32.xlu0 %v8510_v17, %s8218_s24 }
 0x750   : > { %1652 = vrot.lane.b32.xlu1 %v8514_v20, %s8218_s24 }
 0x78b   : > { %v1499_v11 = vpop.xlane.xlu1 %1498 }
 0x78c   : > { %v1496_v8 = vpop.xlane.xlu0 %1495 }
 0x78d   : > { %7967 = vrcp.f32 %v1496_v8 }
 0x78e   : > { %7969 = vrcp.f32 %v1499_v11 }
 0x78f   : > { %v7784_v9 = vpop.permute.xlu1 %7783 }
 0x790   : > { %v7779_v12 = vpop.permute.xlu0 %7778  ;;  %v7786_v15 = vunpack.i.h.bf16 %v7784_v9  ;;  %v7785_v16 = vunpack.i.l.bf16 %v7784_v9 }
 0x791   : > { %v7781_v22 = vunpack.i.h.bf16 %v7779_v12  ;;  %v7780_v23 = vunpack.i.l.bf16 %v7779_v12 }
 0x792   : > { %v7145_v28 = vpack.c.bf16 %v7786_v15, %v7785_v16 }
 0x793   : > { %v7789_v6 = vpop.permute.xlu1 %7788  ;;  %v7141_v24 = vpack.c.bf16 %v7781_v22, %v7780_v23 }
 0x794   : > { %v7791_v18 = vunpack.i.h.bf16 %v7789_v6  ;;  %v7790_v36 = vunpack.i.l.bf16 %v7789_v6 }
 0x795   : > { %7142 = vmatprep.subr.bf16.mxu1 %v7141_v24 }
 0x796   : > { %7144 = vmatpush3.bf16.msra.mxu1 %v7141_v24  ;;  %v7151_v46 = vpack.c.bf16 %v7791_v18, %v7790_v36 }
 0x797   : > { %v7968_v17 = vpop.eup %7967  ;;  %7147 = vmatprep.subr.msk.bf16.mxu1 %vm8619_vm6, %v7145_v28  ;;  %v7794_v31 = vpop.permute.xlu1 %7793 }
 0x798   : > { %v7970_v20 = vpop.eup %7969  ;;  %v1510_v43 = vmul.f32 %v7968_v17, %v7962_v35  ;;  %v7796_v30 = vunpack.i.h.bf16 %v7794_v31  ;;  %v7795_v56 = vunpack.i.l.bf16 %v7794_v31 }
 0x799   : > { %v1511_v53 = vmul.f32 %v7970_v20, %v7960_v55 }
 0x79a   : > { %7150 = vmatpush3.bf16.msk.msra.mxu1 %vm8619_vm6, %v7145_v28  ;;  %6389 = vmatprep.mubr.msk.f32.mxu1 %vm905_vm2, %v1510_v43  ;;  %v7157_v40 = vpack.c.bf16 %v7796_v30, %v7795_v56 }
 0x79b   : > { %7153 = vmatprep.subr.msk.bf16.mxu1 %vm8490_vm1, %v7151_v46 }
 0x79d   : > { %6390 = vmatmul.mubr.msk.f32.vlgmr.msra.gmra.mrb[16].mxu1 %vm905_vm2, %v1511_v53 }
 0x7a3   : > { %7156 = vmatpush3.bf16.xpose.msk.msra.mxu1 %vm8490_vm1, %v7151_v46 }
 0x7a4   : > { %7159 = vmatprep.subr.msk.bf16.mxu1 %vm8490_vm1, %v7157_v40 }
 0x7ab   : > { %7162 = vmatpush3.bf16.xpose.msk.msra.mxu1 %vm8490_vm1, %v7157_v40 }
 0x7c1   : > { %v1502_v35 = vpop.xlane.xlu0 %1501 }
 0x7c2   : > { %7971 = vrcp.f32 %v1502_v35 }
 0x7c5   : > { %v1647_v62 = vpop.permute.xlu0 %1646 }
 0x7c8   : > { %v1505_v55 = vpop.xlane.xlu1 %1504 }
 0x7c9   : > { %7973 = vrcp.f32 %v1505_v55  ;;  %v1651_v11 = vpop.permute.xlu0 %1650 }
 0x7cc   : > { %v7972_v59 = vpop.eup %7971  ;;  %v1649_v63 = vpop.permute.xlu1 %1648 }
 0x7cd   : > { %v1512_v52 = vmul.f32 %v7972_v59, %v7964_v0 }
 0x7cf   : > { %6392 = vmatprep.mubr.msk.f32.mxu1 %vm905_vm2, %v1512_v52 }
 0x7d0   : > { %v1653_v8 = vpop.permute.xlu1 %1652 }
 0x7d3   : > { %v7974_v61 = vpop.eup %7973 }
 0x7d4   : > { %v1513_v2 = vmul.f32 %v7974_v61, %v7966_v4 }
 0x7d6   : > { %6393 = vmatmul.mubr.msk.f32.gmra.mrb[18].mxu1 %vm905_vm2, %v1513_v2 }
 0x7d7   : > { %6403 = vmatprep.mubr.msk.f32.mxu1 %vm795_vm0, %v1647_v62 }
 0x7da   : > { %6404 = vmatmul.mubr.msk.f32.vlgmr.msra.gmra.mrb[20].mxu1 %vm795_vm0, %v1649_v63 }
 0x7db   : > { %6406 = vmatprep.mubr.msk.f32.mxu1 %vm795_vm0, %v1651_v11 }
 0x7de   : > { %6407 = vmatmul.mubr.msk.f32.gmra.mrb[22].mxu1 %vm795_vm0, %v1653_v8 }
 0x870   : > { %v6391_v9 = vpop.f32.mrb[16].mxu1 }
 0x871   : > { %v1605_v0 = vpop.f32.mrb[17].mxu1 }
 0x8a9   : > { %v8757_v12 = vpop.f32.mrb[18].mxu1 }
 0x8aa   : > { %v8759_v15 = vpop.f32.mrb[19].mxu1 }
 0x8ad   : > { %v6405_v4 = vpop.f32.mrb[20].mxu1 }
 0x8ae   : > { %v1744_v16 = vpop.f32.mrb[21].mxu1  ;;  %v1766_v22 = vsel %vm905_vm2, %v6405_v4, -inf }
 0x8af   : > { %1767 = vmax.xlane.f32.xlu1 %v1766_v22  ;;  %v1763_v23 = vsel %vm905_vm2, %v1744_v16, -inf }
 0x8b0   : > { %1764 = vmax.xlane.f32.xlu0 %v1763_v23 }
 0x8b1   : > { %v6408_v6 = vpop.f32.mrb[22].mxu1 }
 0x8b2   : > { %v1754_v24 = vpop.f32.mrb[23].mxu1  ;;  %v1772_v18 = vsel %vm915_vm3, %v6408_v6, -inf }
 0x8b3   : > { %v1769_v28 = vsel %vm905_vm2, %v1754_v24, -inf }
 0x8b4   : > { %1770 = vmax.xlane.f32.xlu0 %v1769_v28 }
 0x8b8   : > { %1773 = vmax.xlane.f32.xlu0 %v1772_v18 }
 0x93c   : > { %v1768_v36 = vpop.xlane.xlu1 %1767 }
 0x93d   : > { %v1776_v17 = vsub.f32 %v6405_v4, %v1768_v36  ;;  %v1765_v20 = vpop.xlane.xlu0 %1764 }
 0x93e   : > { %v1775_v43 = vsub.f32 %v1744_v16, %v1765_v20 }
 0x93f   : > { %v1781_v46 = vmul.f32 1.442695, %v1776_v17 }
 0x940   : > { %v1779_v53 = vmul.f32 1.442695, %v1775_v43 }
 0x941   : > { %7975 = vpow2.f32 %v1781_v46  ;;  %v1771_v35 = vpop.xlane.xlu0 %1770 }
 0x942   : > { %7977 = vpow2.f32 %v1779_v53  ;;  %v1777_v59 = vsub.f32 %v1754_v24, %v1771_v35  ;;  %v463_v35 = vld [vmem:[%s9874_s7] sm:$0xff] }
 0x944   : > { %v1783_v61 = vmul.f32 1.442695, %v1777_v59  ;;  %v465_v59 = vld [vmem:[%s9874_s7 + $0x10] sm:$0xff] }
 0x945   : > { %v1774_v55 = vpop.xlane.xlu0 %1773 }
 0x946   : > { %v1778_v52 = vsub.f32 %v6408_v6, %v1774_v55  ;;  %7979 = vpow2.f32 %v1783_v61  ;;  %v464_v55 = vld [vmem:[%s9874_s7 + $0x8] sm:$0xff]  ;;  %v466_v61 = vld [vmem:[%s9874_s7 + $0x18] sm:$0xff] }
 0x948   : > { %v1785_v62 = vmul.f32 1.442695, %v1778_v52  ;;  %v8800_v52 = vpack.c.bf16 %v464_v55, %v463_v35  ;;  %v489_v35 = vld [vmem:[%s9876_s9 + $0x48] sm:$0xff] }
 0x94a   : > { %7981 = vpow2.f32 %v1785_v62  ;;  %v8805_v62 = vpack.c.bf16 %v466_v61, %v465_v59  ;;  %v491_v59 = vld [vmem:[%s9876_s9 + $0x58] sm:$0xff] }
 0x94b   : > { %v7976_v31 = vpop.eup %7975 }
 0x94c   : > { %v7978_v30 = vpop.eup %7977  ;;  %v1790_v56 = vsel %vm905_vm2, %v7976_v31, 0.0 }
 0x94d   : > { %1791 = vadd.xlane.f32.xlu1 %v1790_v56  ;;  %v1787_v40 = vsel %vm905_vm2, %v7978_v30, 0.0 }
 0x94e   : > { %1788 = vadd.xlane.f32.xlu0 %v1787_v40 }
 0x950   : > { %v7980_v2 = vpop.eup %7979 }
 0x951   : > { %v1793_v11 = vsel %vm905_vm2, %v7980_v2, 0.0 }
 0x954   : > { %v7982_v63 = vpop.eup %7981 }
 0x955   : > { %v1796_v8 = vsel %vm915_vm3, %v7982_v63, 0.0 }
 0x95e   : > { %7803 = vrot.lane.b32.xlu1 %v8623_v7, %s8218_s24 }
 0x964   : > { %7798 = vrot.lane.b32.xlu0 %v8616_v1, %s8218_s24 }
 0x982   : > { %1794 = vadd.xlane.f32.xlu1 %v1793_v11 }
 0x983   : > { %1797 = vadd.xlane.f32.xlu0 %v1796_v8  ;;  %v469_v8 = vld [vmem:[%s9874_s7 + $0x30] sm:$0xff] }
 0x993   : > { %1337 = vrot.lane.b32.xlu1 %v8705_v50, %s8218_s24 }
 0x997   : > { %1628 = vrot.lane.b32.xlu1 %v1605_v0, %s8217_s23 }
 0x999   : > { %1335 = vrot.lane.b32.xlu0 %v8707_v41, %s8218_s24 }
 0x99b   : > { %1630 = vrot.lane.b32.xlu1 %v6391_v9, %s8217_s23 }
 0x9da   : > { %v1792_v1 = vpop.xlane.xlu1 %1791 }
 0x9db   : > { %v1789_v7 = vpop.xlane.xlu0 %1788 }
 0x9dc   : > { %7983 = vrcp.f32 %v1789_v7 }
 0x9dd   : > { %7985 = vrcp.f32 %v1792_v1  ;;  %v470_v1 = vld [vmem:[%s9874_s7 + $0x38] sm:$0xff] }
 0x9de   : > { %v7804_v4 = vpop.permute.xlu1 %7803  ;;  %v8826_v7 = vpack.c.bf16 %v470_v1, %v469_v8  ;;  %v490_v8 = vld [vmem:[%s9876_s9 + $0x50] sm:$0xff]  ;;  %v493_v1 = vld [vmem:[%s9876_s9 + $0x68] sm:$0xff] }
 0x9df   : > { %v7799_v16 = vpop.permute.xlu0 %7798  ;;  %v7806_v22 = vunpack.i.h.bf16 %v7804_v4  ;;  %v7805_v23 = vunpack.i.l.bf16 %v7804_v4  ;;  %v471_v4 = vld [vmem:[%s9874_s7 + $0x40] sm:$0xff] }
 0x9e0   : > { %v7801_v6 = vunpack.i.h.bf16 %v7799_v16  ;;  %v7800_v24 = vunpack.i.l.bf16 %v7799_v16  ;;  %v472_v16 = vld [vmem:[%s9874_s7 + $0x48] sm:$0xff] }
 0x9e1   : > { %v7167_v18 = vpack.c.bf16 %v7806_v22, %v7805_v23  ;;  %v8836_v22 = vpack.c.bf16 %v472_v16, %v471_v4  ;;  %v473_v23 = vld [vmem:[%s9874_s7 + $0x50] sm:$0xff]  ;;  %v495_v4 = vld [vmem:[%s9876_s9 + $0x78] sm:$0xff] }
 0x9e2   : > { %v7163_v28 = vpack.c.bf16 %v7801_v6, %v7800_v24  ;;  %v474_v6 = vld [vmem:[%s9874_s7 + $0x58] sm:$0xff] }
 0x9e3   : > { %v8846_v24 = vpack.c.bf16 %v474_v6, %v473_v23  ;;  %v8943_v23 = vpack.c.bf16 %v495_v4, %v493_v1  ;;  %v492_v6 = vld [vmem:[%s9876_s9 + $0x60] sm:$0xff] }
 0x9e4   : > { %7164 = vmatprep.subr.bf16.mxu0 %v7163_v28 }
 0x9e5   : > { %7166 = vmatpush3.bf16.msra.mxu0 %v7163_v28  ;;  %v475_v28 = vld [vmem:[%s9874_s7 + $0x60] sm:$0xff] }
 0x9e6   : > { %v7984_v50 = vpop.eup %7983  ;;  %7169 = vmatprep.subr.msk.bf16.mxu0 %vm8619_vm6, %v7167_v18 }
 0x9e7   : > { %v7986_v41 = vpop.eup %7985  ;;  %v1803_v9 = vmul.f32 %v7984_v50, %v7978_v30 }
 0x9e8   : > { %v1804_v0 = vmul.f32 %v7986_v41, %v7976_v31  ;;  %v477_v41 = vld [vmem:[%s9874_s7 + $0x70] sm:$0xff] }
 0x9e9   : > { %7172 = vmatpush3.bf16.msk.msra.mxu0 %vm8619_vm6, %v7167_v18  ;;  %6417 = vmatprep.mubr.msk.f32.mxu0 %vm905_vm2, %v1803_v9  ;;  %v476_v18 = vld [vmem:[%s9874_s7 + $0x68] sm:$0xff]  ;;  %v478_v9 = vld [vmem:[%s9874_s7 + $0x78] sm:$0xff] }
 0x9ea   : > { %7174 = vmatprep.subr.bf16.mxu0 %v8800_v52  ;;  %v8857_v50 = vpack.c.bf16 %v476_v18, %v475_v28  ;;  %v494_v28 = vld [vmem:[%s9876_s9 + $0x70] sm:$0xff]  ;;  %v497_v18 = vld [vmem:[%s9876_s9 + $0x88] sm:$0xff] }
 0x9ec   : > { %6418 = vmatmul.mubr.msk.f32.vlgmr.msra.gmra.mrb[16].mxu0 %vm905_vm2, %v1804_v0  ;;  %v8867_v0 = vpack.c.bf16 %v478_v9, %v477_v41  ;;  %v499_v41 = vld [vmem:[%s9876_s9 + $0x98] sm:$0xff]  ;;  %v8958_v9 = vpack.c.bf16 %v494_v28, %v492_v6 }
 0x9ed   : > { %7176 = vmatpush3.bf16.msra.mxu0 %v8800_v52 }
 0x9ee   : > { %7178 = vmatprep.subr.bf16.mxu0 %v8805_v62 }
 0x9f1   : > { %7180 = vmatpush3.bf16.msra.mxu0 %v8805_v62 }
 0xa0f   : > { %v1795_v36 = vpop.xlane.xlu1 %1794 }
 0xa10   : > { %7987 = vrcp.f32 %v1795_v36  ;;  %v1798_v17 = vpop.xlane.xlu0 %1797 }
 0xa11   : > { %7989 = vrcp.f32 %v1798_v17 }
 0xa13   : > { %v1338_v20 = vpop.permute.xlu1 %1337 }
 0xa14   : > { %1349 = vst.msk [vmem:[#allocation2 + $0x8] sm:$0xff] %vm1347_vm8, %v1338_v20  ;;  %v1336_v43 = vpop.permute.xlu0 %1335  ;;  %v481_v20 = vld [vmem:[%s9876_s9 + $0x8] sm:$0xff] }
 0xa15   : > { %1348 = vst.msk [vmem:[#allocation2] sm:$0xff] %vm1347_vm8, %v1336_v43  ;;  %v483_v43 = vld [vmem:[%s9876_s9 + $0x18] sm:$0xff] }
 0xa17   : > { %v1629_v46 = vpop.permute.xlu1 %1628 }
 0xa18   : > { %1641 = vst.msk [vmem:[#allocation2] sm:$0xff] %vm1640_vm9, %v1629_v46  ;;  %v8891_v46 = vpack.c.bf16 %v483_v43, %v481_v20  ;;  %v498_v20 = vld [vmem:[%s9876_s9 + $0x90] sm:$0xff]  ;;  %v501_v43 = vld [vmem:[%s9876_s9 + $0xa8] sm:$0xff] }
 0xa1a   : > { %v7988_v53 = vpop.eup %7987  ;;  %7206 = vmatprep.subr.bf16.mxu1 %v8891_v46 }
 0xa1b   : > { %v7990_v30 = vpop.eup %7989  ;;  %v1631_v31 = vpop.permute.xlu1 %1630  ;;  %v1805_v56 = vmul.f32 %v7988_v53, %v7980_v2  ;;  %v467_v2 = vld [vmem:[%s9874_s7 + $0x20] sm:$0xff] }
 0xa1c   : > { %1642 = vst.msk [vmem:[#allocation2 + $0x8] sm:$0xff] %vm1640_vm9, %v1631_v31  ;;  %v1806_v40 = vmul.f32 %v7990_v30, %v7982_v63  ;;  %v468_v63 = vld [vmem:[%s9874_s7 + $0x28] sm:$0xff] }
 0xa1d   : > { %6420 = vmatprep.mubr.msk.f32.mxu0 %vm905_vm2, %v1805_v56  ;;  %v8816_v11 = vpack.c.bf16 %v468_v63, %v467_v2  ;;  %v484_v56 = vld [vmem:[%s9876_s9 + $0x20] sm:$0xff]  ;;  %v8925_v2 = vpack.c.bf16 %v491_v59, %v489_v35 }
 0xa1e   : > { %6421 = vmatmul.mubr.msk.f32.gmra.mrb[18].mxu0 %vm905_vm2, %v1806_v40  ;;  %v486_v40 = vld [vmem:[%s9876_s9 + $0x30] sm:$0xff]  ;;  %v488_v63 = vld [vmem:[%s9876_s9 + $0x40] sm:$0xff] }
 0xa1f   : > { %7182 = vmatprep.subr.bf16.mxu0 %v8816_v11  ;;  %v8922_v61 = vpack.c.bf16 %v486_v40, %v484_v56  ;;  %v8940_v16 = vpack.c.bf16 %v490_v8, %v488_v63  ;;  %v505_v56 = vld [vmem:[%s9876_s9 + $0xc8] sm:$0xff]  ;;  %v507_v40 = vld [vmem:[%s9876_s9 + $0xd8] sm:$0xff]  ;;  %v504_v59 = vld [vmem:[%s9876_s9 + $0xc0] sm:$0xff] }
 0xa20   : > { %7184 = vmatpush3.bf16.msra.mxu0 %v8816_v11  ;;  %v506_v63 = vld [vmem:[%s9876_s9 + $0xd0] sm:$0xff] }
 0xa21   : > { %7186 = vmatprep.subr.bf16.mxu0 %v8826_v7  ;;  %v9006_v8 = vpack.c.bf16 %v506_v63, %v504_v59  ;;  %v508_v63 = vld [vmem:[%s9876_s9 + $0xe0] sm:$0xff] }
 0xa24   : > { %7188 = vmatpush3.bf16.msra.mxu0 %v8826_v7 }
 0xa25   : > { %7190 = vmatprep.subr.bf16.mxu0 %v8836_v22 }
 0xa28   : > { %7192 = vmatpush3.bf16.msra.mxu0 %v8836_v22 }
 0xa29   : > { %7194 = vmatprep.subr.bf16.mxu0 %v8846_v24 }
 0xa2c   : > { %7196 = vmatpush3.bf16.msra.mxu0 %v8846_v24 }
 0xa2d   : > { %7198 = vmatprep.subr.bf16.mxu0 %v8857_v50 }
 0xa30   : > { %7200 = vmatpush3.bf16.msra.mxu0 %v8857_v50 }
 0xa31   : > { %7202 = vmatprep.subr.bf16.mxu0 %v8867_v0 }
 0xa34   : > { %7204 = vmatpush3.bf16.msra.mxu0 %v8867_v0 }
 0xa35   : > { %7238 = vmatprep.subr.bf16.mxu0 %v8325_v10 }
 0xabf   : > { %v6419_v36 = vpop.f32.mrb[16].mxu0 }
 0xac0   : > { %1923 = vrot.lane.b32.xlu1 %v6419_v36, %s8216_s19  ;;  %v1898_v17 = vpop.f32.mrb[17].mxu0  ;;  %v8961_v36 = vpack.c.bf16 %v499_v41, %v497_v18 }
 0xac1   : > { %1921 = vrot.lane.b32.xlu0 %v1898_v17, %s8216_s19  ;;  %v496_v17 = vld [vmem:[%s9876_s9 + $0x80] sm:$0xff] }
 0xac4   : > { %1341 = vrot.lane.b32.xlu1 %v8709_v51, %s8218_s24  ;;  %v480_v51 = vld [vmem:[%s9876_s9] sm:$0xff] }
 0xac5   : > { %1339 = vrot.lane.b32.xlu0 %v8711_v60, %s8218_s24  ;;  %v482_v60 = vld [vmem:[%s9876_s9 + $0x10] sm:$0xff] }
 0xac6   : > { %v8902_v30 = vpack.c.bf16 %v482_v60, %v480_v51  ;;  %v503_v51 = vld [vmem:[%s9876_s9 + $0xb8] sm:$0xff]  ;;  %v8976_v60 = vpack.c.bf16 %v498_v20, %v496_v17 }
 0xac8   : > { %1634 = vrot.lane.b32.xlu1 %v8757_v12, %s8217_s23  ;;  %v485_v12 = vld [vmem:[%s9876_s9 + $0x28] sm:$0xff]  ;;  %7208 = vmatpush1.bf16.msra.mxu1 %v8902_v30 }
 0xac9   : > { %1632 = vrot.lane.b32.xlu0 %v8759_v15, %s8217_s23  ;;  %v487_v15 = vld [vmem:[%s9876_s9 + $0x38] sm:$0xff] }
 0xaca   : > { %v8904_v31 = vpack.c.bf16 %v487_v15, %v485_v12  ;;  %v8979_v12 = vpack.c.bf16 %v503_v51, %v501_v43  ;;  %v500_v15 = vld [vmem:[%s9876_s9 + $0xa0] sm:$0xff] }
 0xacc   : > { %7210 = vmatprep.subr.bf16.mxu1 %v8904_v31 }
 0xacd   : > { %7212 = vmatpush1.bf16.msra.mxu1 %v8922_v61 }
 0xace   : > { %7214 = vmatprep.subr.bf16.mxu1 %v8925_v2 }
 0xad1   : > { %7216 = vmatpush1.bf16.msra.mxu1 %v8940_v16 }
 0xad2   : > { %7218 = vmatprep.subr.bf16.mxu1 %v8943_v23 }
 0xad5   : > { %7220 = vmatpush1.bf16.msra.mxu1 %v8958_v9 }
 0xad6   : > { %7222 = vmatprep.subr.bf16.mxu1 %v8961_v36 }
 0xad9   : > { %7224 = vmatpush1.bf16.msra.mxu1 %v8976_v60 }
 0xada   : > { %7226 = vmatprep.subr.bf16.mxu1 %v8979_v12 }
 0xaf1   : > { %v6422_v53 = vpop.f32.mrb[18].mxu0 }
 0xaf2   : > { %1927 = vrot.lane.b32.xlu1 %v6422_v53, %s8216_s19  ;;  %v1908_v55 = vpop.f32.mrb[19].mxu0  ;;  %v502_v53 = vld [vmem:[%s9876_s9 + $0xb0] sm:$0xff] }
 0xaf3   : > { %1925 = vrot.lane.b32.xlu0 %v1908_v55, %s8216_s19  ;;  %v8994_v35 = vpack.c.bf16 %v502_v53, %v500_v15  ;;  %v8997_v55 = vpack.c.bf16 %v507_v40, %v505_v56  ;;  %v509_v56 = vld [vmem:[%s9876_s9 + $0xe8] sm:$0xff]  ;;  %v511_v40 = vld [vmem:[%s9876_s9 + $0xf8] sm:$0xff] }
 0xaf4   : > { %v9040_v59 = vpack.c.bf16 %v511_v40, %v509_v56 }
 0xaf5   : > { %7228 = vmatpush1.bf16.msra.mxu1 %v8994_v35 }
 0xaf6   : > { %7230 = vmatprep.subr.bf16.mxu1 %v8997_v55 }
 0xaf9   : > { %7232 = vmatpush1.bf16.msra.mxu1 %v9006_v8 }
 0xafa   : > { %7234 = vmatprep.subr.bf16.mxu1 %v9040_v59 }
 0xb32   : > { %v1924_v1 = vpop.permute.xlu1 %1923 }
 0xb33   : > { %1935 = vst.msk [vmem:[#allocation2 + $0x8] sm:$0xff] %vm1933_vm10, %v1924_v1  ;;  %v1922_v4 = vpop.permute.xlu0 %1921  ;;  %v510_v1 = vld [vmem:[%s9876_s9 + $0xf0] sm:$0xff] }
 0xb34   : > { %1934 = vst.msk [vmem:[#allocation2] sm:$0xff] %vm1933_vm10, %v1922_v4  ;;  %v9048_v4 = vpack.c.bf16 %v510_v1, %v508_v63 }
 0xb36   : > { %v1342_v6 = vpop.permute.xlu1 %1341  ;;  %7236 = vmatpush1.bf16.msra.mxu1 %v9048_v4 }
 0xb37   : > { %1352 = vst.msk [vmem:[#allocation2 + $0x18] sm:$0x3f] %vm1351_vm11, %v1342_v6  ;;  %v1340_v28 = vpop.permute.xlu0 %1339  ;;  %7270 = vmatprep.subr.bf16.mxu1 %v8302_v3  ;;  %v9880_v6 = vmov 0.0  }
 0xb38   : > { %1350 = vst.msk [vmem:[#allocation2 + $0x10] sm:$0xff] %vm1347_vm8, %v1340_v28  ;;  %2113 = vmatprep.mubr.f32.mxu1 %v9880_v6  ;;  %v5651_v28 = vld [vmem:[%s8355_s20 + $0x20] sm:$0xff] }
 0xb3a   : > { %v1635_v18 = vpop.permute.xlu1 %1634  ;;  %v1940_v20 = vld [vmem:[#allocation2 + $0x8] sm:$0xff] }
 0xb3b   : > { %1645 = vst.msk [vmem:[#allocation2 + $0x18] sm:$0x3f] %vm1644_vm12, %v1635_v18  ;;  %v1633_v41 = vpop.permute.xlu0 %1632  ;;  %v1939_v17 = vld [vmem:[#allocation2] sm:$0xff] }
 0xb3c   : > { %1643 = vst.msk [vmem:[#allocation2 + $0x10] sm:$0xff] %vm1640_vm9, %v1633_v41  ;;  %6455 = vmatprep.mubr.f32.mxu0 %v1939_v17  ;;  %v5652_v18 = vld [vmem:[%s8355_s20 + $0x28] sm:$0xff]  ;;  %v5653_v41 = vld [vmem:[%s8355_s20 + $0x30] sm:$0xff]  ;;  %v5654_v17 = vld [vmem:[%s8355_s20 + $0x38] sm:$0x3f] }
 0xb3d   : > { %6456 = vmatmul.mubr.f32.vlgmr.msra.gmra.mrb[20].mxu0 %v1940_v20  ;;  %v5650_v20 = vld [vmem:[%s9875_s8] ss:$0 sm:$0xff] }
 0xb3e   : > { %7240 = vmatpush3.bf16.msra.mxu0 %v8325_v10 }
 0xb3f   : > { %7242 = vmatprep.subr.bf16.mxu0 %v8337_v14 }
 0xb42   : > { %7244 = vmatpush3.bf16.msra.mxu0 %v8337_v14 }
 0xb43   : > { %7246 = vmatprep.subr.bf16.mxu0 %v8360_v19 }
 0xb46   : > { %7248 = vmatpush3.bf16.msra.mxu0 %v8360_v19 }
 0xb47   : > { %7250 = vmatprep.subr.bf16.mxu0 %v8385_v26 }
 0xb4a   : > { %7252 = vmatpush3.bf16.msra.mxu0 %v8385_v26 }
 0xb4b   : > { %7254 = vmatprep.subr.bf16.mxu0 %v8405_v32 }
 0xb4e   : > { %7256 = vmatpush3.bf16.msra.mxu0 %v8405_v32 }
 0xb4f   : > { %7258 = vmatprep.subr.bf16.mxu0 %v8425_v38 }
 0xb52   : > { %7260 = vmatpush3.bf16.msra.mxu0 %v8425_v38 }
 0xb53   : > { %7262 = vmatprep.subr.bf16.mxu0 %v8445_v44 }
 0xb56   : > { %7264 = vmatpush3.bf16.msra.mxu0 %v8445_v44 }
 0xb57   : > { %7266 = vmatprep.subr.bf16.mxu0 %v8459_v48 }
 0xb5a   : > { %7268 = vmatpush3.bf16.msra.mxu0 %v8459_v48 }
 0xb5b   : > { %7302 = vmatprep.subr.bf16.mxu0 %v8531_v25 }
 0xb64   : > { %v1928_v43 = vpop.permute.xlu1 %1927 }
 0xb65   : > { %1938 = vst.msk [vmem:[#allocation2 + $0x18] sm:$0x3f] %vm1937_vm13, %v1928_v43  ;;  %v1926_v51 = vpop.permute.xlu0 %1925 }
 0xb66   : > { %1936 = vst.msk [vmem:[#allocation2 + $0x10] sm:$0xff] %vm1933_vm10, %v1926_v51 }
 0xb6c   : > { %v1942_v53 = vld [vmem:[#allocation2 + $0x18] sm:$0x3f] }
 0xb6d   : > { %v1941_v15 = vld [vmem:[#allocation2 + $0x10] sm:$0xff] }
 0xb6e   : > { %6458 = vmatprep.mubr.f32.mxu0 %v1941_v15 }
 0xb6f   : > { %6459 = vmatmul.mubr.f32.gmra.mrb[22].mxu0 %v1942_v53 }
 0xb70   : > { %6493 = vmatprep.mubr.f32.mxu0 %v5651_v28 }
 0xb73   : > { %6494 = vmatmul.mubr.f32.vlgmr.msra.gmra.mrb[24].mxu0 %v5652_v18 }
 0xb74   : > { %7304 = vmatpush3.bf16.msra.mxu0 %v8531_v25  ;;  %6496 = vmatprep.mubr.f32.mxu0 %v5653_v41 }
 0xb75   : > { %7306 = vmatprep.subr.bf16.mxu0 %v8536_v29 }
 0xb77   : > { %6497 = vmatmul.mubr.f32.gmra.mrb[26].mxu0 %v5654_v17 }
 0xb78   : > { %7308 = vmatpush3.bf16.msra.mxu0 %v8536_v29  ;;  %6569 = vmatprep.mubr.f32.mxu0 %v5651_v28 }
 0xb79   : > { %7310 = vmatprep.subr.bf16.mxu0 %v8547_v34 }
 0xb7c   : > { %7312 = vmatpush3.bf16.msra.mxu0 %v8547_v34 }
 0xb7d   : > { %7314 = vmatprep.subr.bf16.mxu0 %v8557_v37 }
 0xb80   : > { %7316 = vmatpush3.bf16.msra.mxu0 %v8557_v37 }
 0xb81   : > { %7318 = vmatprep.subr.bf16.mxu0 %v8567_v42 }
 0xb84   : > { %7320 = vmatpush3.bf16.msra.mxu0 %v8567_v42 }
 0xb85   : > { %7322 = vmatprep.subr.bf16.mxu0 %v8577_v47 }
 0xb88   : > { %7324 = vmatpush3.bf16.msra.mxu0 %v8577_v47 }
 0xb89   : > { %7326 = vmatprep.subr.bf16.mxu0 %v8587_v54 }
 0xb8c   : > { %7328 = vmatpush3.bf16.msra.mxu0 %v8587_v54 }
 0xb8d   : > { %7330 = vmatprep.subr.bf16.mxu0 %v8597_v57 }
 0xb90   : > { %7332 = vmatpush3.bf16.msra.mxu0 %v8597_v57 }
 0xb93   : > { %6570 = vmatmul.mubr.f32.vlgmr.msra.gmra.mrb[28].mxu0 %v5652_v18 }
 0xb94   : > { %6572 = vmatprep.mubr.f32.mxu0 %v5653_v41 }
 0xb97   : > { %6573 = vmatmul.mubr.f32.gmra.mrb[30].mxu0 %v5654_v17 }
 0xc10   : > { %v6457_v43 = vpop.f32.mrb[20].mxu0 }
 0xc11   : > { %v2021_v51 = vadd.f32 %v6457_v43, %v5650_v20  ;;  %v2015_v15 = vpop.f32.mrb[21].mxu0 }
 0xc12   : > { %v2016_v53 = vadd.f32 %v5650_v20, %v2015_v15  ;;  %v9099_v15 = vld [vmem:[%s9869_s2] ss:$0 sm:$0xff] }
 0xc13   : > { %2035 = vst [vmem:[#allocation3 + $0x8] sm:$0xff] %v2021_v51 }
 0xc14   : > { %2034 = vst [vmem:[#allocation3] sm:$0xff] %v2016_v53  ;;  %2114 = vmatmul.mubr.f32.vlgmr.msra.gmra.mrb[24].mxu1 %v2016_v53 }
 0xc15   : > { %2119 = vmatprep.mubr.f32.mxu1 %v9880_v6  ;;  %7272 = vmatpush3.bf16.msra.mxu1 %v8302_v3 }
 0xc16   : > { %7274 = vmatprep.subr.bf16.mxu1 %v8307_v5 }
 0xc18   : > { %2120 = vmatmul.mubr.f32.gmra.mrb[26].mxu1 %v2021_v51 }
 0xc19   : > { %7276 = vmatpush3.bf16.msra.mxu1 %v8307_v5  ;;  %2125 = vmatprep.mubr.f32.mxu1 %v9880_v6 }
 0xc1a   : > { %7278 = vmatprep.subr.bf16.mxu1 %v8335_v13 }
 0xc1d   : > { %7280 = vmatpush3.bf16.msra.mxu1 %v8335_v13 }
 0xc1e   : > { %7282 = vmatprep.subr.bf16.mxu1 %v8366_v21 }
 0xc21   : > { %7284 = vmatpush3.bf16.msra.mxu1 %v8366_v21 }
 0xc22   : > { %7286 = vmatprep.subr.bf16.mxu1 %v8388_v27 }
 0xc25   : > { %7288 = vmatpush3.bf16.msra.mxu1 %v8388_v27 }
 0xc26   : > { %7290 = vmatprep.subr.bf16.mxu1 %v8408_v33 }
 0xc29   : > { %7292 = vmatpush3.bf16.msra.mxu1 %v8408_v33 }
 0xc2a   : > { %7294 = vmatprep.subr.bf16.mxu1 %v8428_v39 }
 0xc2d   : > { %7296 = vmatpush3.bf16.msra.mxu1 %v8428_v39 }
 0xc2e   : > { %7298 = vmatprep.subr.bf16.mxu1 %v8448_v45 }
 0xc31   : > { %7300 = vmatpush3.bf16.msra.mxu1 %v8448_v45 }
 0xc42   : > { %v6460_v56 = vpop.f32.mrb[22].mxu0 }
 0xc43   : > { %v2031_v40 = vadd.f32 %v6460_v56, %v5650_v20  ;;  %v2025_v63 = vpop.f32.mrb[23].mxu0 }
 0xc44   : > { %v2026_v1 = vadd.f32 %v5650_v20, %v2025_v63 }
 0xc45   : > { %2037 = vst [vmem:[#allocation3 + $0x18] sm:$0x3f] %v2031_v40 }
 0xc46   : > { %2036 = vst [vmem:[#allocation3 + $0x10] sm:$0xff] %v2026_v1  ;;  %2126 = vmatmul.mubr.f32.gmra.mrb[28].mxu1 %v2026_v1  ;;  %v9094_v43 = vpop.f32.mrb[24].mxu0 }
 0xc47   : > { %2131 = vmatprep.mubr.f32.mxu1 %v9880_v6  ;;  %v2255_v51 = vpop.f32.mrb[25].mxu0 }
 0xc48   : > { %v2256_v20 = vadd.f32 %v9099_v15, %v2255_v51 }
 0xc4a   : > { %2132 = vmatmul.mubr.f32.gmra.mrb[30].mxu1 %v2031_v40  ;;  %v9102_v53 = vmul.f32 0.17677669, %v2256_v20  ;;  %v9104_v56 = vpop.f32.mrb[26].mxu0 }
 0xc4b   : > { %6531 = vmatprep.mubr.f32.mxu1 %v5651_v28  ;;  %v9106_v63 = vpop.f32.mrb[27].mxu0  ;;  %v2039_v28 = vlaneseq }
 0xc4e   : > { %6532 = vmatmul.mubr.f32.vlgmr.msra.gmra.mrb[32].mxu1 %v5652_v18  ;;  %v2040_v18 = vshrl.u32 %v2039_v28, 7 }
 0xc4f   : > { %6534 = vmatprep.mubr.f32.mxu1 %v5653_v41 }
 0xc50   : > { %v2041_v41 = vsub.s32 0, %v2040_v18  ;;  %v2045_v40 = vsub.s32 1, %v2040_v18  ;;  %v513_v18 = vld [vmem:[%s9878_s11] sm:$0x3] }
 0xc52   : > { %6535 = vmatmul.mubr.f32.gmra.mrb[34].mxu1 %v5654_v17  ;;  %v512_v17 = vld [vmem:[%s9877_s10] sm:$0x3] }
 0xc53   : > { %6583 = vmatprep.mubr.msk.f32.mxu1 %vm795_vm0, %v9102_v53  ;;  %v9113_v1 = vrot.slane %v512_v17, %v2041_v41  ;;  %v9115_v51 = vrot.slane %v512_v17, %v2045_v40  ;;  %v9124_v17 = vrot.slane %v513_v18, %v2045_v40 }
 0xc55   : > { %9943 = vst [vmem:[#allocation20_spill] sm:$0xff] %v9113_v1  ;;  %9944 = vst [vmem:[#allocation21_spill] sm:$0xff] %v9115_v51 }
 0xc56   : > { %9945 = vst [vmem:[#allocation22_spill] sm:$0xff] %v9124_v17 }
 0xce7   : > { %v2115_v20 = vpop.f32.mrb[24].mxu1 }
 0xce8   : > { %v2116_v6 = vadd.f32 %v2115_v20, %v9113_v1  ;;  %v2117_v45 = vpop.f32.mrb[25].mxu1  ;;  %v9126_v20 = vrot.slane %v513_v18, %v2041_v41 }
 0xce9   : > { %v2118_v39 = vadd.f32 %v2117_v45, %v9115_v51 }
 0xcea   : > { %7991 = vtanh.f32 %v2116_v6  ;;  %9946 = vst [vmem:[#allocation23_spill] sm:$0xff] %v9126_v20 }
 0xceb   : > { %7993 = vtanh.f32 %v2118_v39  ;;  %v2121_v33 = vpop.f32.mrb[26].mxu1 }
 0xcec   : > { %v2122_v28 = vadd.f32 %v2121_v33, %v9113_v1  ;;  %v2123_v27 = vpop.f32.mrb[27].mxu1 }
 0xced   : > { %v2124_v21 = vadd.f32 %v2123_v27, %v9115_v51 }
 0xcee   : > { %7995 = vtanh.f32 %v2122_v28 }
 0xcef   : > { %7997 = vtanh.f32 %v2124_v21 }
 0xcf4   : > { %v7992_v13 = vpop.eup %7991 }
 0xcf5   : > { %v7994_v45 = vpop.eup %7993  ;;  %v2157_v33 = vmul.f32 %v7992_v13, %v9126_v20 }
 0xcf6   : > { %v2158_v39 = vmul.f32 %v7994_v45, %v9124_v17 }
 0xcf8   : > { %v7996_v6 = vpop.eup %7995  ;;  %v2166_v27 = vsel %vm2165_vm14, %v2158_v39, 0.0 }
 0xcf9   : > { %v7998_v28 = vpop.eup %7997  ;;  %v9131_v5 = vadd.f32 %v2166_v27, %v2157_v33  ;;  %v2159_v21 = vmul.f32 %v7996_v6, %v9126_v20 }
 0xcfa   : > { %v2160_v57 = vmul.f32 %v7998_v28, %v9124_v17 }
 0xcfb   : > { %9947 = vst [vmem:[#allocation24_spill] sm:$0xff] %v9131_v5 }
 0xcfc   : > { %v2170_v41 = vsel %vm2165_vm14, %v2160_v57, 0.0  ;;  %v8200_v57 = vld [vmem:[%s9871_s4] ss:$0 sm:$0xff] }
 0xcfd   : > { %v9136_v40 = vadd.f32 %v2170_v41, %v2159_v21 }
 0xcff   : > { %9948 = vst [vmem:[#allocation25_spill] sm:$0xff] %v9136_v40 }
 0xd19   : > { %v2127_v18 = vpop.f32.mrb[28].mxu1 }
 0xd1a   : > { %v2128_v54 = vadd.f32 %v2127_v18, %v9113_v1  ;;  %v2129_v45 = vpop.f32.mrb[29].mxu1 }
 0xd1b   : > { %v2130_v13 = vadd.f32 %v2129_v45, %v9115_v51 }
 0xd1c   : > { %7999 = vtanh.f32 %v2128_v54 }
 0xd1d   : > { %8001 = vtanh.f32 %v2130_v13  ;;  %v2133_v39 = vpop.f32.mrb[30].mxu1 }
 0xd1e   : > { %v2134_v33 = vadd.f32 %v2133_v39, %v9113_v1  ;;  %v2135_v27 = vpop.f32.mrb[31].mxu1 }
 0xd1f   : > { %v2136_v28 = vadd.f32 %v2135_v27, %v9115_v51 }
 0xd20   : > { %8003 = vtanh.f32 %v2134_v33 }
 0xd21   : > { %8005 = vtanh.f32 %v2136_v28  ;;  %v6533_v6 = vpop.f32.mrb[32].mxu1 }
 0xd22   : > { %v2350_v21 = vadd.f32 %v8200_v57, %v6533_v6  ;;  %v2344_v41 = vpop.f32.mrb[33].mxu1 }
 0xd23   : > { %v2345_v18 = vadd.f32 %v8200_v57, %v2344_v41 }
 0xd25   : > { %v7333_v40 = vpack.c.bf16 %v2350_v21, %v2345_v18  ;;  %v6536_v45 = vpop.f32.mrb[34].mxu1  ;;  %v9145_v54 = vpack.i.bf16 %v2350_v21, %v2345_v18 }
 0xd26   : > { %v8000_v13 = vpop.eup %7999  ;;  %v2360_v5 = vadd.f32 %v8200_v57, %v6536_v45  ;;  %v2354_v39 = vpop.f32.mrb[35].mxu1 }
 0xd27   : > { %v8002_v1 = vpop.eup %8001  ;;  %7335 = vmatprep.subr.msk.bf16.mxu1 %vm8490_vm1, %v7333_v40  ;;  %v2355_v33 = vadd.f32 %v8200_v57, %v2354_v39  ;;  %v2161_v27 = vmul.f32 %v8000_v13, %v9126_v20  ;;  %v2266_v39 = vadd.f32 %v9099_v15, %v9106_v63 }
 0xd28   : > { %7338 = vmatpush3.bf16.xpose.msk.msra.mxu1 %vm8490_vm1, %v7333_v40  ;;  %v2162_v28 = vmul.f32 %v8002_v1, %v9124_v17 }
 0xd29   : > { %v7339_v6 = vpack.c.bf16 %v2360_v5, %v2355_v33  ;;  %v9153_v41 = vpack.i.bf16 %v2360_v5, %v2355_v33  ;;  %v2261_v33 = vadd.f32 %v9099_v15, %v9094_v43 }
 0xd2a   : > { %v8004_v21 = vpop.eup %8003  ;;  %v2174_v18 = vsel %vm2165_vm14, %v2162_v28, 0.0  ;;  %v9174_v28 = vmul.f32 0.17677669, %v2266_v39 }
 0xd2b   : > { %v8006_v45 = vpop.eup %8005  ;;  %7341 = vmatprep.subr.msk.bf16.mxu1 %vm8490_vm1, %v7339_v6  ;;  %v9158_v51 = vadd.f32 %v2174_v18, %v2161_v27  ;;  %v2163_v57 = vmul.f32 %v8004_v21, %v9126_v20  ;;  %v2271_v27 = vadd.f32 %v9099_v15, %v9104_v56  ;;  %v9176_v21 = vmul.f32 0.17677669, %v2261_v33 }
 0xd2c   : > { %v2164_v40 = vmul.f32 %v8006_v45, %v9124_v17 }
 0xd2d   : > { %9949 = vst [vmem:[#allocation26_spill] sm:$0xff] %v9158_v51  ;;  %v2178_v13 = vsel %vm963_vm4, %v2163_v57, 0.0  ;;  %v9178_v18 = vmul.f32 0.17677669, %v2271_v27 }
 0xd2e   : > { %v2180_v1 = vsel %vm2179_vm15, %v2164_v40, 0.0 }
 0xd2f   : > { %v9164_v5 = vadd.f32 %v2180_v1, %v2178_v13  ;;  %v6571_v13 = vpop.f32.mrb[28].mxu0  ;;  %v8201_v1 = vld [vmem:[%s9873_s6] ss:$0 sm:$0xff] }
 0xd30   : > { %7344 = vmatpush3.bf16.xpose.msk.msra.mxu1 %vm8490_vm1, %v7339_v6  ;;  %v9193_v39 = vadd.f32 %v8201_v1, %v6571_v13  ;;  %v2429_v33 = vpop.f32.mrb[29].mxu0 }
 0xd31   : > { %9950 = vst [vmem:[#allocation27_spill] sm:$0xff] %v9164_v5  ;;  %v9195_v27 = vadd.f32 %v8201_v1, %v2429_v33 }
 0xd33   : > { %v7345_v5 = vpack.c.bf16 %v9193_v39, %v9195_v27 }
 0xd35   : > { %7346 = vmatprep.subr.bf16.mxu1 %v7345_v5 }
 0xd37   : > { %6584 = vmatmul.mubr.msk.f32.vlgmr.msra.gmra.mrb[36].mxu1 %vm795_vm0, %v9176_v21 }
 0xd38   : > { %6586 = vmatprep.mubr.msk.f32.mxu1 %vm795_vm0, %v9174_v28  ;;  %7348 = vmatpush3.bf16.msra.mxu1 %v7345_v5 }
 0xd3b   : > { %6587 = vmatmul.mubr.msk.f32.gmra.mrb[38].mxu1 %vm795_vm0, %v9178_v18 }
 0xe0a   : > { %v6585_v63 = vpop.f32.mrb[36].mxu1 }
 0xe0b   : > { %v2538_v43 = vpop.f32.mrb[37].mxu1  ;;  %v2560_v6 = vsel %vm905_vm2, %v6585_v63, -inf }
 0xe0c   : > { %2561 = vmax.xlane.f32.xlu1 %v2560_v6  ;;  %v2557_v15 = vsel %vm905_vm2, %v2538_v43, -inf  ;;  %v6574_v6 = vpop.f32.mrb[30].mxu0 }
 0xe0d   : > { %2558 = vmax.xlane.f32.xlu0 %v2557_v15  ;;  %v2439_v15 = vpop.f32.mrb[31].mxu0 }
 0xe0e   : > { %v6588_v56 = vpop.f32.mrb[38].mxu1 }
 0xe0f   : > { %v2548_v45 = vpop.f32.mrb[39].mxu1  ;;  %v2566_v40 = vsel %vm915_vm3, %v6588_v56, -inf }
 0xe10   : > { %v2563_v57 = vsel %vm905_vm2, %v2548_v45, -inf }
 0xe11   : > { %2564 = vmax.xlane.f32.xlu0 %v2563_v57 }
 0xe15   : > { %2567 = vmax.xlane.f32.xlu0 %v2566_v40 }
 0xe99   : > { %v2562_v57 = vpop.xlane.xlu1 %2561 }
 0xe9a   : > { %v2570_v51 = vsub.f32 %v6585_v63, %v2562_v57  ;;  %v2559_v40 = vpop.xlane.xlu0 %2558 }
 0xe9b   : > { %v2569_v20 = vsub.f32 %v2538_v43, %v2559_v40 }
 0xe9c   : > { %v2575_v17 = vmul.f32 1.442695, %v2570_v51 }
 0xe9d   : > { %v2573_v47 = vmul.f32 1.442695, %v2569_v20  ;;  %v2440_v20 = vadd.f32 %v8201_v1, %v2439_v15 }
 0xe9e   : > { %8007 = vpow2.f32 %v2575_v17  ;;  %v2565_v42 = vpop.xlane.xlu0 %2564 }
 0xe9f   : > { %8009 = vpow2.f32 %v2573_v47  ;;  %v2571_v13 = vsub.f32 %v2548_v45, %v2565_v42 }
 0xea1   : > { %v2577_v37 = vmul.f32 1.442695, %v2571_v13 }
 0xea2   : > { %v2568_v33 = vpop.xlane.xlu0 %2567 }
 0xea3   : > { %8011 = vpow2.f32 %v2577_v37  ;;  %v2572_v34 = vsub.f32 %v6588_v56, %v2568_v33  ;;  %v2445_v37 = vadd.f32 %v8201_v1, %v6574_v6 }
 0xea5   : > { %v2579_v29 = vmul.f32 1.442695, %v2572_v34  ;;  %v7349_v34 = vpack.c.bf16 %v2445_v37, %v2440_v20 }
 0xea7   : > { %8013 = vpow2.f32 %v2579_v29  ;;  %7351 = vmatprep.subr.msk.bf16.mxu1 %vm8619_vm6, %v7349_v34  ;;  %v9205_v29 = vpack.i.bf16 %v2445_v37, %v2440_v20 }
 0xea8   : > { %v8008_v25 = vpop.eup %8007  ;;  %7354 = vmatpush3.bf16.msk.msra.mxu1 %vm8619_vm6, %v7349_v34 }
 0xea9   : > { %v8010_v48 = vpop.eup %8009  ;;  %v2584_v5 = vsel %vm905_vm2, %v8008_v25, 0.0 }
 0xeaa   : > { %2585 = vadd.xlane.f32.xlu1 %v2584_v5  ;;  %v2581_v63 = vsel %vm905_vm2, %v8010_v48, 0.0 }
 0xeab   : > { %2582 = vadd.xlane.f32.xlu0 %v2581_v63 }
 0xead   : > { %v8012_v51 = vpop.eup %8011 }
 0xeae   : > { %v2587_v17 = vsel %vm905_vm2, %v8012_v51, 0.0 }
 0xeaf   : > { %2588 = vadd.xlane.f32.xlu0 %v2587_v17 }
 0xeb1   : > { %v8014_v47 = vpop.eup %8013 }
 0xeb2   : > { %v2590_v42 = vsel %vm915_vm3, %v8014_v47, 0.0 }
 0xeb3   : > { %2591 = vadd.xlane.f32.xlu1 %v2590_v42 }
 0xec4   : > { %7813 = vrot.lane.b32.xlu1 %v9153_v41, %s8216_s19 }
 0xec5   : > { %7808 = vrot.lane.b32.xlu0 %v9145_v54, %s8216_s19 }
 0xec8   : > { %2705 = vrot.lane.b32.xlu1 %v9102_v53, %s8216_s19 }
 0xec9   : > { %2709 = vrot.lane.b32.xlu0 %v9174_v28, %s8216_s19 }
 0xecc   : > { %2707 = vrot.lane.b32.xlu1 %v9176_v21, %s8216_s19 }
 0xed0   : > { %2711 = vrot.lane.b32.xlu1 %v9178_v18, %s8216_s19 }
 0xf37   : > { %v2586_v43 = vpop.xlane.xlu1 %2585 }
 0xf38   : > { %8015 = vrcp.f32 %v2586_v43  ;;  %v2583_v56 = vpop.xlane.xlu0 %2582 }
 0xf39   : > { %8017 = vrcp.f32 %v2583_v56 }
 0xf3c   : > { %v2589_v45 = vpop.xlane.xlu0 %2588 }
 0xf3d   : > { %8019 = vrcp.f32 %v2589_v45 }
 0xf40   : > { %v2592_v1 = vpop.xlane.xlu1 %2591  ;;  %v7809_v6 = vpop.permute.xlu0 %7808 }
 0xf41   : > { %8021 = vrcp.f32 %v2592_v1  ;;  %v7811_v15 = vunpack.i.h.bf16 %v7809_v6  ;;  %v7810_v57 = vunpack.i.l.bf16 %v7809_v6 }
 0xf42   : > { %v8016_v40 = vpop.eup %8015 }
 0xf43   : > { %v8018_v13 = vpop.eup %8017  ;;  %v7355_v33 = vpack.c.bf16 %v7811_v15, %v7810_v57  ;;  %v2598_v17 = vmul.f32 %v8016_v40, %v8008_v25 }
 0xf44   : > { %v7814_v5 = vpop.permute.xlu1 %7813  ;;  %v2597_v63 = vmul.f32 %v8018_v13, %v8010_v48  ;;  %v2710_v1 = vpop.permute.xlu0 %2709 }
 0xf45   : > { %v7816_v42 = vunpack.i.h.bf16 %v7814_v5  ;;  %v7815_v37 = vunpack.i.l.bf16 %v7814_v5  ;;  %7357 = vmatprep.subr.msk.bf16.mxu1 %vm8490_vm1, %v7355_v33 }
 0xf46   : > { %6597 = vmatprep.mubr.msk.f32.mxu1 %vm905_vm2, %v2597_v63 }
 0xf47   : > { %v8020_v20 = vpop.eup %8019  ;;  %v7361_v34 = vpack.c.bf16 %v7816_v42, %v7815_v37  ;;  %6598 = vmatmul.mubr.msk.f32.vlgmr.msra.gmra.mrb[40].mxu1 %vm905_vm2, %v2598_v17 }
 0xf48   : > { %7360 = vmatpush3.bf16.xpose.msk.msra.mxu1 %vm8490_vm1, %v7355_v33  ;;  %v2599_v43 = vmul.f32 %v8020_v20, %v8012_v51  ;;  %v2706_v56 = vpop.permute.xlu1 %2705 }
 0xf49   : > { %7363 = vmatprep.subr.msk.bf16.mxu1 %vm8490_vm1, %v7361_v34 }
 0xf4a   : > { %6600 = vmatprep.mubr.msk.f32.mxu1 %vm905_vm2, %v2599_v43 }
 0xf4b   : > { %v8022_v48 = vpop.eup %8021 }
 0xf4c   : > { %v2600_v25 = vmul.f32 %v8022_v48, %v8014_v47  ;;  %v2708_v45 = vpop.permute.xlu1 %2707 }
 0xf4e   : > { %6601 = vmatmul.mubr.msk.f32.gmra.mrb[42].mxu1 %vm905_vm2, %v2600_v25 }
 0xf4f   : > { %6611 = vmatprep.mubr.msk.f32.mxu1 %vm795_vm0, %v2706_v56 }
 0xf50   : > { %7366 = vmatpush3.bf16.xpose.msk.msra.mxu1 %vm8490_vm1, %v7361_v34  ;;  %v2712_v51 = vpop.permute.xlu1 %2711 }
 0xf57   : > { %6612 = vmatmul.mubr.msk.f32.vlgmr.msra.gmra.mrb[44].mxu1 %vm795_vm0, %v2708_v45 }
 0xf58   : > { %6614 = vmatprep.mubr.msk.f32.mxu1 %vm795_vm0, %v2710_v1 }
 0xf5b   : > { %6615 = vmatmul.mubr.msk.f32.gmra.mrb[46].mxu1 %vm795_vm0, %v2712_v51 }
0x101a   : > { %v6599_v6 = vpop.f32.mrb[40].mxu1 }
0x101b   : > { %2702 = vst.msk [vmem:[#allocation2 + $0x8] sm:$0xff] %vm795_vm0, %v6599_v6  ;;  %v2682_v47 = vpop.f32.mrb[41].mxu1 }
0x101c   : > { %2701 = vst.msk [vmem:[#allocation2] sm:$0xff] %vm795_vm0, %v2682_v47  ;;  %v9253_v47 = vpack.i.bf16 %v9193_v39, %v9195_v27 }
0x1021   : > { %v6602_v15 = vpop.f32.mrb[42].mxu1 }
0x1022   : > { %2704 = vst.msk [vmem:[#allocation2 + $0x18] sm:$0x3f] %vm1055_vm7, %v6602_v15  ;;  %v2692_v57 = vpop.f32.mrb[43].mxu1 }
0x1023   : > { %2703 = vst.msk [vmem:[#allocation2 + $0x10] sm:$0xff] %vm795_vm0, %v2692_v57 }
0x102a   : > { %v6613_v40 = vpop.f32.mrb[44].mxu1 }
0x102b   : > { %v2803_v13 = vpop.f32.mrb[45].mxu1  ;;  %v2825_v33 = vsel %vm905_vm2, %v6613_v40, -inf }
0x102c   : > { %2826 = vmax.xlane.f32.xlu1 %v2825_v33  ;;  %v2822_v5 = vsel %vm905_vm2, %v2803_v13, -inf }
0x102d   : > { %2823 = vmax.xlane.f32.xlu0 %v2822_v5 }
0x102e   : > { %v6616_v63 = vpop.f32.mrb[46].mxu1 }
0x102f   : > { %v2813_v17 = vpop.f32.mrb[47].mxu1  ;;  %v2831_v37 = vsel %vm915_vm3, %v6616_v63, -inf }
0x1030   : > { %v2828_v42 = vsel %vm905_vm2, %v2813_v17, -inf }
0x1031   : > { %2829 = vmax.xlane.f32.xlu0 %v2828_v42 }
0x1035   : > { %2832 = vmax.xlane.f32.xlu0 %v2831_v37 }
0x10b9   : > { %v2827_v20 = vpop.xlane.xlu1 %2826 }
0x10ba   : > { %v2835_v34 = vsub.f32 %v6613_v40, %v2827_v20  ;;  %v2824_v43 = vpop.xlane.xlu0 %2823 }
0x10bb   : > { %v2834_v48 = vsub.f32 %v2803_v13, %v2824_v43 }
0x10bc   : > { %v2840_v25 = vmul.f32 1.442695, %v2835_v34 }
0x10bd   : > { %v2838_v56 = vmul.f32 1.442695, %v2834_v48 }
0x10be   : > { %8023 = vpow2.f32 %v2840_v25  ;;  %v2830_v15 = vpop.xlane.xlu0 %2829 }
0x10bf   : > { %8025 = vpow2.f32 %v2838_v56  ;;  %v2836_v57 = vsub.f32 %v2813_v17, %v2830_v15 }
0x10c1   : > { %v2842_v40 = vmul.f32 1.442695, %v2836_v57 }
0x10c2   : > { %v2833_v13 = vpop.xlane.xlu0 %2832 }
0x10c3   : > { %v2837_v33 = vsub.f32 %v6616_v63, %v2833_v13  ;;  %8027 = vpow2.f32 %v2842_v40 }
0x10c5   : > { %v2844_v5 = vmul.f32 1.442695, %v2837_v33 }
0x10c7   : > { %8029 = vpow2.f32 %v2844_v5 }
0x10c8   : > { %v8024_v45 = vpop.eup %8023 }
0x10c9   : > { %v8026_v1 = vpop.eup %8025  ;;  %v2849_v51 = vsel %vm905_vm2, %v8024_v45, 0.0 }
0x10ca   : > { %2850 = vadd.xlane.f32.xlu1 %v2849_v51  ;;  %v2846_v6 = vsel %vm905_vm2, %v8026_v1, 0.0 }
0x10cb   : > { %2847 = vadd.xlane.f32.xlu0 %v2846_v6 }
0x10cd   : > { %v8028_v42 = vpop.eup %8027 }
0x10ce   : > { %v2852_v37 = vsel %vm905_vm2, %v8028_v42, 0.0 }
0x10d1   : > { %v8030_v39 = vpop.eup %8029 }
0x10d2   : > { %v2855_v27 = vsel %vm915_vm3, %v8030_v39, 0.0 }
0x10db   : > { %7823 = vrot.lane.b32.xlu1 %v9205_v29, %s8216_s19 }
0x10df   : > { %7828 = vrot.lane.b32.xlu1 %v9145_v54, %s8217_s23 }
0x10e1   : > { %7818 = vrot.lane.b32.xlu0 %v9253_v47, %s8216_s19 }
0x10e3   : > { %7833 = vrot.lane.b32.xlu1 %v9153_v41, %s8217_s23 }
0x1100   : > { %2853 = vadd.xlane.f32.xlu0 %v2852_v37 }
0x1107   : > { %2856 = vadd.xlane.f32.xlu1 %v2855_v27 }
0x1116   : > { %2999 = vrot.lane.b32.xlu0 %v9102_v53, %s8217_s23 }
0x1118   : > { %3001 = vrot.lane.b32.xlu1 %v9176_v21, %s8217_s23 }
0x111a   : > { %3003 = vrot.lane.b32.xlu0 %v9174_v28, %s8217_s23 }
0x111c   : > { %3005 = vrot.lane.b32.xlu1 %v9178_v18, %s8217_s23 }
0x1157   : > { %v2851_v63 = vpop.xlane.xlu1 %2850 }
0x1158   : > { %v2848_v17 = vpop.xlane.xlu0 %2847 }
0x1159   : > { %8031 = vrcp.f32 %v2848_v17 }
0x115a   : > { %8033 = vrcp.f32 %v2851_v63 }
0x115b   : > { %v7824_v20 = vpop.permute.xlu1 %7823 }
0x115c   : > { %v7819_v34 = vpop.permute.xlu0 %7818  ;;  %v7826_v43 = vunpack.i.h.bf16 %v7824_v20  ;;  %v7825_v48 = vunpack.i.l.bf16 %v7824_v20 }
0x115d   : > { %v7821_v25 = vunpack.i.h.bf16 %v7819_v34  ;;  %v7820_v56 = vunpack.i.l.bf16 %v7819_v34 }
0x115e   : > { %v7371_v15 = vpack.c.bf16 %v7826_v43, %v7825_v48 }
0x115f   : > { %v7829_v51 = vpop.permute.xlu1 %7828  ;;  %v7367_v6 = vpack.c.bf16 %v7821_v25, %v7820_v56 }
0x1160   : > { %v7831_v57 = vunpack.i.h.bf16 %v7829_v51  ;;  %v7830_v40 = vunpack.i.l.bf16 %v7829_v51 }
0x1161   : > { %7368 = vmatprep.subr.bf16.mxu0 %v7367_v6 }
0x1162   : > { %7370 = vmatpush3.bf16.msra.mxu0 %v7367_v6  ;;  %v7377_v37 = vpack.c.bf16 %v7831_v57, %v7830_v40 }
0x1163   : > { %v8032_v13 = vpop.eup %8031  ;;  %7373 = vmatprep.subr.msk.bf16.mxu0 %vm8619_vm6, %v7371_v15  ;;  %v7834_v63 = vpop.permute.xlu1 %7833 }
0x1164   : > { %v8034_v33 = vpop.eup %8033  ;;  %v2862_v5 = vmul.f32 %v8032_v13, %v8026_v1  ;;  %v7836_v17 = vunpack.i.h.bf16 %v7834_v63  ;;  %v7835_v20 = vunpack.i.l.bf16 %v7834_v63 }
0x1165   : > { %v2863_v27 = vmul.f32 %v8034_v33, %v8024_v45 }
0x1166   : > { %7376 = vmatpush3.bf16.msk.msra.mxu0 %vm8619_vm6, %v7371_v15  ;;  %6625 = vmatprep.mubr.msk.f32.mxu0 %vm905_vm2, %v2862_v5  ;;  %v7383_v34 = vpack.c.bf16 %v7836_v17, %v7835_v20 }
0x1167   : > { %7379 = vmatprep.subr.msk.bf16.mxu0 %vm8490_vm1, %v7377_v37 }
0x1169   : > { %6626 = vmatmul.mubr.msk.f32.vlgmr.msra.gmra.mrb[32].mxu0 %vm905_vm2, %v2863_v27 }
0x116f   : > { %7382 = vmatpush3.bf16.xpose.msk.msra.mxu0 %vm8490_vm1, %v7377_v37 }
0x1170   : > { %7385 = vmatprep.subr.msk.bf16.mxu0 %vm8490_vm1, %v7383_v34 }
0x1177   : > { %7388 = vmatpush3.bf16.xpose.msk.msra.mxu0 %vm8490_vm1, %v7383_v34 }
0x118d   : > { %v2854_v1 = vpop.xlane.xlu0 %2853 }
0x118e   : > { %8035 = vrcp.f32 %v2854_v1 }
0x1191   : > { %v3000_v56 = vpop.permute.xlu0 %2999 }
0x1194   : > { %v2857_v45 = vpop.xlane.xlu1 %2856 }
0x1195   : > { %8037 = vrcp.f32 %v2857_v45  ;;  %v3004_v15 = vpop.permute.xlu0 %3003 }
0x1198   : > { %v8036_v43 = vpop.eup %8035  ;;  %v3002_v6 = vpop.permute.xlu1 %3001 }
0x1199   : > { %v2864_v48 = vmul.f32 %v8036_v43, %v8028_v42 }
0x119b   : > { %6628 = vmatprep.mubr.msk.f32.mxu0 %vm905_vm2, %v2864_v48 }
0x119c   : > { %v3006_v57 = vpop.permute.xlu1 %3005 }
0x119f   : > { %v8038_v25 = vpop.eup %8037 }
0x11a0   : > { %v2865_v51 = vmul.f32 %v8038_v25, %v8030_v39 }
0x11a2   : > { %6629 = vmatmul.mubr.msk.f32.gmra.mrb[34].mxu0 %vm905_vm2, %v2865_v51 }
0x11a3   : > { %6639 = vmatprep.mubr.msk.f32.mxu0 %vm795_vm0, %v3000_v56 }
0x11a6   : > { %6640 = vmatmul.mubr.msk.f32.vlgmr.msra.gmra.mrb[36].mxu0 %vm795_vm0, %v3002_v6 }
0x11a7   : > { %6642 = vmatprep.mubr.msk.f32.mxu0 %vm795_vm0, %v3004_v15 }
0x11aa   : > { %6643 = vmatmul.mubr.msk.f32.gmra.mrb[38].mxu0 %vm795_vm0, %v3006_v57 }
0x123c   : > { %v9289_v40 = vpop.f32.mrb[32].mxu0 }
0x123d   : > { %v9291_v42 = vpop.f32.mrb[33].mxu0 }
0x1275   : > { %v9293_v13 = vpop.f32.mrb[34].mxu0 }
0x1276   : > { %v9295_v39 = vpop.f32.mrb[35].mxu0 }
0x1279   : > { %v6641_v33 = vpop.f32.mrb[36].mxu0 }
0x127a   : > { %v3097_v5 = vpop.f32.mrb[37].mxu0  ;;  %v3119_v37 = vsel %vm905_vm2, %v6641_v33, -inf }
0x127b   : > { %3120 = vmax.xlane.f32.xlu1 %v3119_v37  ;;  %v3116_v27 = vsel %vm905_vm2, %v3097_v5, -inf }
0x127c   : > { %3117 = vmax.xlane.f32.xlu0 %v3116_v27 }
0x127d   : > { %v6644_v63 = vpop.f32.mrb[38].mxu0 }
0x127e   : > { %v3107_v17 = vpop.f32.mrb[39].mxu0  ;;  %v3125_v34 = vsel %vm915_vm3, %v6644_v63, -inf }
0x127f   : > { %v3122_v20 = vsel %vm905_vm2, %v3107_v17, -inf }
0x1280   : > { %3123 = vmax.xlane.f32.xlu0 %v3122_v20 }
0x1284   : > { %3126 = vmax.xlane.f32.xlu0 %v3125_v34 }
0x1308   : > { %v3121_v1 = vpop.xlane.xlu1 %3120 }
0x1309   : > { %v3129_v45 = vsub.f32 %v6641_v33, %v3121_v1  ;;  %v3118_v43 = vpop.xlane.xlu0 %3117 }
0x130a   : > { %v3128_v48 = vsub.f32 %v3097_v5, %v3118_v43 }
0x130b   : > { %v3134_v25 = vmul.f32 1.442695, %v3129_v45 }
0x130c   : > { %v3132_v56 = vmul.f32 1.442695, %v3128_v48 }
0x130d   : > { %8039 = vpow2.f32 %v3134_v25  ;;  %v3124_v33 = vpop.xlane.xlu0 %3123 }
0x130e   : > { %8041 = vpow2.f32 %v3132_v56  ;;  %v3130_v5 = vsub.f32 %v3107_v17, %v3124_v33 }
0x1310   : > { %v3136_v37 = vmul.f32 1.442695, %v3130_v5 }
0x1311   : > { %v3127_v27 = vpop.xlane.xlu0 %3126 }
0x1312   : > { %v3131_v20 = vsub.f32 %v6644_v63, %v3127_v27  ;;  %8043 = vpow2.f32 %v3136_v37 }
0x1314   : > { %v3138_v34 = vmul.f32 1.442695, %v3131_v20 }
0x1316   : > { %8045 = vpow2.f32 %v3138_v34 }
0x1317   : > { %v8040_v51 = vpop.eup %8039 }
0x1318   : > { %v8042_v6 = vpop.eup %8041  ;;  %v3143_v15 = vsel %vm905_vm2, %v8040_v51, 0.0 }
0x1319   : > { %3144 = vadd.xlane.f32.xlu1 %v3143_v15  ;;  %v3140_v57 = vsel %vm905_vm2, %v8042_v6, 0.0 }
0x131a   : > { %3141 = vadd.xlane.f32.xlu0 %v3140_v57 }
0x131c   : > { %v8044_v1 = vpop.eup %8043 }
0x131d   : > { %v3146_v45 = vsel %vm905_vm2, %v8044_v1, 0.0 }
0x1320   : > { %v8046_v43 = vpop.eup %8045 }
0x132a   : > { %7843 = vrot.lane.b32.xlu1 %v9205_v29, %s8217_s23 }
0x132e   : > { %7848 = vrot.lane.b32.xlu1 %v9145_v54, %s8218_s24  ;;  %v3149_v54 = vsel %vm915_vm3, %v8046_v43, 0.0 }
0x1330   : > { %7838 = vrot.lane.b32.xlu0 %v9253_v47, %s8217_s23 }
0x1332   : > { %7853 = vrot.lane.b32.xlu1 %v9153_v41, %s8218_s24 }
0x134f   : > { %3147 = vadd.xlane.f32.xlu0 %v3146_v45 }
0x1356   : > { %3150 = vadd.xlane.f32.xlu1 %v3149_v54 }
0x1365   : > { %3290 = vrot.lane.b32.xlu0 %v9102_v53, %s8218_s24 }
0x1367   : > { %3292 = vrot.lane.b32.xlu1 %v9176_v21, %s8218_s24 }
0x1369   : > { %3294 = vrot.lane.b32.xlu0 %v9174_v28, %s8218_s24 }
0x136b   : > { %3296 = vrot.lane.b32.xlu1 %v9178_v18, %s8218_s24 }
0x13a6   : > { %v3145_v41 = vpop.xlane.xlu1 %3144 }
0x13a7   : > { %v3142_v63 = vpop.xlane.xlu0 %3141 }
0x13a8   : > { %8047 = vrcp.f32 %v3142_v63 }
0x13a9   : > { %8049 = vrcp.f32 %v3145_v41 }
0x13aa   : > { %v7844_v17 = vpop.permute.xlu1 %7843 }
0x13ab   : > { %v7839_v48 = vpop.permute.xlu0 %7838  ;;  %v7846_v25 = vunpack.i.h.bf16 %v7844_v17  ;;  %v7845_v56 = vunpack.i.l.bf16 %v7844_v17 }
0x13ac   : > { %v7841_v15 = vunpack.i.h.bf16 %v7839_v48  ;;  %v7840_v57 = vunpack.i.l.bf16 %v7839_v48 }
0x13ad   : > { %v7393_v5 = vpack.c.bf16 %v7846_v25, %v7845_v56 }
0x13ae   : > { %v7849_v53 = vpop.permute.xlu1 %7848  ;;  %v7389_v33 = vpack.c.bf16 %v7841_v15, %v7840_v57 }
0x13af   : > { %v7851_v21 = vunpack.i.h.bf16 %v7849_v53  ;;  %v7850_v37 = vunpack.i.l.bf16 %v7849_v53 }
0x13b0   : > { %7390 = vmatprep.subr.bf16.mxu1 %v7389_v33 }
0x13b1   : > { %7392 = vmatpush3.bf16.msra.mxu1 %v7389_v33  ;;  %v7399_v20 = vpack.c.bf16 %v7851_v21, %v7850_v37 }
0x13b2   : > { %v8048_v28 = vpop.eup %8047  ;;  %7395 = vmatprep.subr.msk.bf16.mxu1 %vm8619_vm6, %v7393_v5  ;;  %v7854_v45 = vpop.permute.xlu1 %7853 }
0x13b3   : > { %v8050_v18 = vpop.eup %8049  ;;  %v3156_v27 = vmul.f32 %v8048_v28, %v8042_v6  ;;  %v7856_v54 = vunpack.i.h.bf16 %v7854_v45  ;;  %v7855_v41 = vunpack.i.l.bf16 %v7854_v45 }
0x13b4   : > { %v3157_v34 = vmul.f32 %v8050_v18, %v8040_v51 }
0x13b5   : > { %7398 = vmatpush3.bf16.msk.msra.mxu1 %vm8619_vm6, %v7393_v5  ;;  %6653 = vmatprep.mubr.msk.f32.mxu1 %vm905_vm2, %v3156_v27  ;;  %v7405_v63 = vpack.c.bf16 %v7856_v54, %v7855_v41 }
0x13b6   : > { %7401 = vmatprep.subr.msk.bf16.mxu1 %vm8490_vm1, %v7399_v20 }
0x13b8   : > { %6654 = vmatmul.mubr.msk.f32.vlgmr.msra.gmra.mrb[48].mxu1 %vm905_vm2, %v3157_v34 }
0x13be   : > { %7404 = vmatpush3.bf16.xpose.msk.msra.mxu1 %vm8490_vm1, %v7399_v20 }
0x13bf   : > { %7407 = vmatprep.subr.msk.bf16.mxu1 %vm8490_vm1, %v7405_v63 }
0x13c6   : > { %7410 = vmatpush3.bf16.xpose.msk.msra.mxu1 %vm8490_vm1, %v7405_v63 }
0x13c7   : > { %7454 = vmatprep.subr.bf16.mxu1 %v8891_v46 }
0x13dc   : > { %v3148_v51 = vpop.xlane.xlu0 %3147 }
0x13dd   : > { %8051 = vrcp.f32 %v3148_v51 }
0x13e0   : > { %v3291_v56 = vpop.permute.xlu0 %3290 }
0x13e3   : > { %v3151_v6 = vpop.xlane.xlu1 %3150 }
0x13e4   : > { %8053 = vrcp.f32 %v3151_v6  ;;  %v3295_v53 = vpop.permute.xlu0 %3294 }
0x13e7   : > { %v8052_v17 = vpop.eup %8051  ;;  %v3293_v57 = vpop.permute.xlu1 %3292 }
0x13e8   : > { %v3158_v48 = vmul.f32 %v8052_v17, %v8044_v1 }
0x13ea   : > { %6656 = vmatprep.mubr.msk.f32.mxu1 %vm905_vm2, %v3158_v48 }
0x13eb   : > { %v3297_v1 = vpop.permute.xlu1 %3296 }
0x13ee   : > { %v8054_v25 = vpop.eup %8053 }
0x13ef   : > { %v3159_v15 = vmul.f32 %v8054_v25, %v8046_v43  ;;  %v9951_v43 = vmov 0.0  }
0x13f1   : > { %6657 = vmatmul.mubr.msk.f32.gmra.mrb[50].mxu1 %vm905_vm2, %v3159_v15 }
0x13f2   : > { %6667 = vmatprep.mubr.msk.f32.mxu1 %vm795_vm0, %v3291_v56 }
0x13f5   : > { %6668 = vmatmul.mubr.msk.f32.vlgmr.msra.gmra.mrb[52].mxu1 %vm795_vm0, %v3293_v57 }
0x13f6   : > { %6670 = vmatprep.mubr.msk.f32.mxu1 %vm795_vm0, %v3295_v53  ;;  %7456 = vmatpush1.bf16.msra.mxu1 %v8902_v30 }
0x13f7   : > { %7458 = vmatprep.subr.bf16.mxu1 %v8904_v31 }
0x13f9   : > { %6671 = vmatmul.mubr.msk.f32.gmra.mrb[54].mxu1 %vm795_vm0, %v3297_v1 }
0x13fa   : > { %7460 = vmatpush1.bf16.msra.mxu1 %v8922_v61  ;;  %3739 = vmatprep.mubr.f32.mxu1 %v9951_v43 }
0x13fb   : > { %7462 = vmatprep.subr.bf16.mxu1 %v8925_v2 }
0x13fe   : > { %7464 = vmatpush1.bf16.msra.mxu1 %v8940_v16 }
0x13ff   : > { %7466 = vmatprep.subr.bf16.mxu1 %v8943_v23 }
0x1402   : > { %7468 = vmatpush1.bf16.msra.mxu1 %v8958_v9 }
0x1403   : > { %7470 = vmatprep.subr.bf16.mxu1 %v8961_v36 }
0x1406   : > { %7472 = vmatpush1.bf16.msra.mxu1 %v8976_v60 }
0x1407   : > { %7474 = vmatprep.subr.bf16.mxu1 %v8979_v12 }
0x140a   : > { %7476 = vmatpush1.bf16.msra.mxu1 %v8994_v35 }
0x140b   : > { %7478 = vmatprep.subr.bf16.mxu1 %v8997_v55 }
0x140e   : > { %7480 = vmatpush1.bf16.msra.mxu1 %v9006_v8 }
0x140f   : > { %7482 = vmatprep.subr.bf16.mxu1 %v9040_v59 }
0x1412   : > { %7484 = vmatpush1.bf16.msra.mxu1 %v9048_v4 }
0x1413   : > { %7518 = vmatprep.subr.bf16.mxu1 %v8302_v3 }
0x148b   : > { %v6655_v33 = vpop.f32.mrb[48].mxu1 }
0x148c   : > { %v3251_v5 = vpop.f32.mrb[49].mxu1 }
0x14c4   : > { %v9359_v21 = vpop.f32.mrb[50].mxu1 }
0x14c5   : > { %v9361_v37 = vpop.f32.mrb[51].mxu1 }
0x14c8   : > { %v6669_v28 = vpop.f32.mrb[52].mxu1 }
0x14c9   : > { %v3388_v18 = vpop.f32.mrb[53].mxu1  ;;  %v3410_v27 = vsel %vm905_vm2, %v6669_v28, -inf }
0x14ca   : > { %3411 = vmax.xlane.f32.xlu1 %v3410_v27  ;;  %v3407_v20 = vsel %vm905_vm2, %v3388_v18, -inf }
0x14cb   : > { %3408 = vmax.xlane.f32.xlu0 %v3407_v20 }
0x14cc   : > { %v6672_v34 = vpop.f32.mrb[54].mxu1 }
0x14cd   : > { %v3398_v45 = vpop.f32.mrb[55].mxu1  ;;  %v3416_v41 = vsel %vm915_vm3, %v6672_v34, -inf }
0x14ce   : > { %v3413_v54 = vsel %vm905_vm2, %v3398_v45, -inf }
0x14cf   : > { %3414 = vmax.xlane.f32.xlu0 %v3413_v54 }
0x14d3   : > { %3417 = vmax.xlane.f32.xlu0 %v3416_v41 }
0x1557   : > { %v3412_v63 = vpop.xlane.xlu1 %3411 }
0x1558   : > { %v3420_v51 = vsub.f32 %v6669_v28, %v3412_v63  ;;  %v3409_v6 = vpop.xlane.xlu0 %3408 }
0x1559   : > { %v3419_v17 = vsub.f32 %v3388_v18, %v3409_v6 }
0x155a   : > { %v3425_v48 = vmul.f32 1.442695, %v3420_v51 }
0x155b   : > { %v3423_v25 = vmul.f32 1.442695, %v3419_v17 }
0x155c   : > { %8055 = vpow2.f32 %v3425_v48  ;;  %v3415_v1 = vpop.xlane.xlu0 %3414 }
0x155d   : > { %8057 = vpow2.f32 %v3423_v25  ;;  %v3421_v18 = vsub.f32 %v3398_v45, %v3415_v1 }
0x155f   : > { %v3427_v20 = vmul.f32 1.442695, %v3421_v18 }
0x1560   : > { %v3418_v28 = vpop.xlane.xlu0 %3417 }
0x1561   : > { %v3422_v27 = vsub.f32 %v6672_v34, %v3418_v28  ;;  %8059 = vpow2.f32 %v3427_v20 }
0x1563   : > { %v3429_v54 = vmul.f32 1.442695, %v3422_v27 }
0x1565   : > { %8061 = vpow2.f32 %v3429_v54 }
0x1566   : > { %v8056_v56 = vpop.eup %8055 }
0x1567   : > { %v8058_v15 = vpop.eup %8057  ;;  %v3434_v57 = vsel %vm905_vm2, %v8056_v56, 0.0 }
0x1568   : > { %3435 = vadd.xlane.f32.xlu1 %v3434_v57  ;;  %v3431_v53 = vsel %vm905_vm2, %v8058_v15, 0.0 }
0x1569   : > { %3432 = vadd.xlane.f32.xlu0 %v3431_v53 }
0x156b   : > { %v8060_v41 = vpop.eup %8059 }
0x156c   : > { %v3437_v51 = vsel %vm905_vm2, %v8060_v41, 0.0 }
0x156f   : > { %v9373_v63 = vpop.eup %8061 }
0x1579   : > { %7863 = vrot.lane.b32.xlu1 %v9205_v29, %s8218_s24  ;;  %v3440_v29 = vsel %vm915_vm3, %v9373_v63, 0.0 }
0x157f   : > { %7858 = vrot.lane.b32.xlu0 %v9253_v47, %s8218_s24 }
0x159d   : > { %3438 = vadd.xlane.f32.xlu1 %v3437_v51 }
0x159e   : > { %3441 = vadd.xlane.f32.xlu0 %v3440_v29 }
0x15ae   : > { %2985 = vrot.lane.b32.xlu1 %v9289_v40, %s8218_s24 }
0x15b2   : > { %3274 = vrot.lane.b32.xlu1 %v3251_v5, %s8217_s23 }
0x15b4   : > { %2983 = vrot.lane.b32.xlu0 %v9291_v42, %s8218_s24 }
0x15b6   : > { %3276 = vrot.lane.b32.xlu1 %v6655_v33, %s8217_s23 }
0x15f5   : > { %v3436_v47 = vpop.xlane.xlu1 %3435 }
0x15f6   : > { %v3433_v34 = vpop.xlane.xlu0 %3432 }
0x15f7   : > { %8063 = vrcp.f32 %v3433_v34 }
0x15f8   : > { %8065 = vrcp.f32 %v3436_v47 }
0x15f9   : > { %v7864_v45 = vpop.permute.xlu1 %7863 }
0x15fa   : > { %v7859_v6 = vpop.permute.xlu0 %7858  ;;  %v7866_v17 = vunpack.i.h.bf16 %v7864_v45  ;;  %v7865_v48 = vunpack.i.l.bf16 %v7864_v45 }
0x15fb   : > { %v7861_v25 = vunpack.i.h.bf16 %v7859_v6  ;;  %v7860_v57 = vunpack.i.l.bf16 %v7859_v6 }
0x15fc   : > { %v7415_v1 = vpack.c.bf16 %v7866_v17, %v7865_v48 }
0x15fd   : > { %v7411_v53 = vpack.c.bf16 %v7861_v25, %v7860_v57  ;;  %v5707_v57 = vld [vmem:[%s8355_s20 + $0x40] sm:$0xff] }
0x15ff   : > { %7412 = vmatprep.subr.bf16.mxu0 %v7411_v53 }
0x1600   : > { %7414 = vmatpush3.bf16.msra.mxu0 %v7411_v53  ;;  %v5709_v53 = vld [vmem:[%s8355_s20 + $0x50] sm:$0xff] }
0x1601   : > { %v8064_v40 = vpop.eup %8063  ;;  %7417 = vmatprep.subr.msk.bf16.mxu0 %vm8619_vm6, %v7415_v1 }
0x1602   : > { %v8066_v42 = vpop.eup %8065  ;;  %v3447_v33 = vmul.f32 %v8064_v40, %v8058_v15  ;;  %v5710_v40 = vld [vmem:[%s8355_s20 + $0x58] sm:$0x3f] }
0x1603   : > { %v3448_v5 = vmul.f32 %v8066_v42, %v8056_v56  ;;  %v9955_v42 = vld [vmem:[#allocation14_spill] sm:$0xff] }
0x1604   : > { %7420 = vmatpush3.bf16.msk.msra.mxu0 %vm8619_vm6, %v7415_v1  ;;  %6681 = vmatprep.mubr.msk.f32.mxu0 %vm905_vm2, %v3447_v33  ;;  %v9954_v1 = vld [vmem:[#allocation13_spill] sm:$0xff]  ;;  %v9956_v33 = vld [vmem:[#allocation15_spill] sm:$0xff] }
0x1605   : > { %7422 = vmatprep.subr.bf16.mxu0 %v8800_v52 }
0x1607   : > { %6682 = vmatmul.mubr.msk.f32.vlgmr.msra.gmra.mrb[40].mxu0 %vm905_vm2, %v3448_v5  ;;  %v9957_v5 = vld [vmem:[#allocation16_spill] sm:$0xff] }
0x1608   : > { %7424 = vmatpush3.bf16.msra.mxu0 %v8800_v52 }
0x1609   : > { %7426 = vmatprep.subr.bf16.mxu0 %v8805_v62 }
0x160c   : > { %7428 = vmatpush3.bf16.msra.mxu0 %v8805_v62 }
0x160d   : > { %7430 = vmatprep.subr.bf16.mxu0 %v8816_v11 }
0x1610   : > { %7432 = vmatpush3.bf16.msra.mxu0 %v8816_v11 }
0x1611   : > { %7434 = vmatprep.subr.bf16.mxu0 %v8826_v7 }
0x1614   : > { %7436 = vmatpush3.bf16.msra.mxu0 %v8826_v7 }
0x1615   : > { %7438 = vmatprep.subr.bf16.mxu0 %v8836_v22 }
0x1618   : > { %7440 = vmatpush3.bf16.msra.mxu0 %v8836_v22 }
0x1619   : > { %7442 = vmatprep.subr.bf16.mxu0 %v8846_v24 }
0x161c   : > { %7444 = vmatpush3.bf16.msra.mxu0 %v8846_v24 }
0x161d   : > { %7446 = vmatprep.subr.bf16.mxu0 %v8857_v50 }
0x1620   : > { %7448 = vmatpush3.bf16.msra.mxu0 %v8857_v50 }
0x1621   : > { %7450 = vmatprep.subr.bf16.mxu0 %v8867_v0 }
0x1624   : > { %7452 = vmatpush3.bf16.msra.mxu0 %v8867_v0 }
0x1625   : > { %7486 = vmatprep.subr.bf16.mxu0 %v8325_v10 }
0x162a   : > { %v3439_v56 = vpop.xlane.xlu1 %3438 }
0x162b   : > { %8067 = vrcp.f32 %v3439_v56  ;;  %v3442_v15 = vpop.xlane.xlu0 %3441  ;;  %v9958_v56 = vld [vmem:[#allocation17_spill] sm:$0xff] }
0x162c   : > { %8069 = vrcp.f32 %v3442_v15  ;;  %v9959_v15 = vld [vmem:[#allocation18_spill] sm:$0xff] }
0x162e   : > { %v2986_v28 = vpop.permute.xlu1 %2985 }
0x162f   : > { %2996 = vst.msk [vmem:[#allocation2 + $0x8] sm:$0xff] %vm1347_vm8, %v2986_v28  ;;  %v2984_v18 = vpop.permute.xlu0 %2983  ;;  %v9960_v28 = vld [vmem:[#allocation19_spill] sm:$0xff] }
0x1630   : > { %2995 = vst.msk [vmem:[#allocation2] sm:$0xff] %vm1347_vm8, %v2984_v18 }
0x1632   : > { %v3275_v27 = vpop.permute.xlu1 %3274 }
0x1633   : > { %3286 = vst.msk [vmem:[#allocation2] sm:$0xff] %vm1640_vm9, %v3275_v27  ;;  %v8202_v27 = vld [vmem:[%s9875_s8] ss:$0 sm:$0xff] }
0x1635   : > { %v8068_v20 = vpop.eup %8067 }
0x1636   : > { %v8070_v54 = vpop.eup %8069  ;;  %v3277_v51 = vpop.permute.xlu1 %3276  ;;  %v3449_v29 = vmul.f32 %v8068_v20, %v8060_v41 }
0x1637   : > { %3287 = vst.msk [vmem:[#allocation2 + $0x8] sm:$0xff] %vm1640_vm9, %v3277_v51  ;;  %v3450_v47 = vmul.f32 %v8070_v54, %v9373_v63 }
0x1638   : > { %6684 = vmatprep.mubr.msk.f32.mxu0 %vm905_vm2, %v3449_v29  ;;  %v9961_v29 = vld [vmem:[#allocation4_spill] sm:$0xff] }
0x1639   : > { %6685 = vmatmul.mubr.msk.f32.gmra.mrb[42].mxu0 %vm905_vm2, %v3450_v47  ;;  %v9962_v47 = vld [vmem:[#allocation5_spill] sm:$0xff] }
0x16da   : > { %v6683_v34 = vpop.f32.mrb[40].mxu0 }
0x16db   : > { %3567 = vrot.lane.b32.xlu1 %v6683_v34, %s8216_s19  ;;  %v3542_v45 = vpop.f32.mrb[41].mxu0  ;;  %v9963_v34 = vld [vmem:[#allocation6_spill] sm:$0xff] }
0x16dc   : > { %3565 = vrot.lane.b32.xlu0 %v3542_v45, %s8216_s19  ;;  %v9964_v45 = vld [vmem:[#allocation7_spill] sm:$0xff] }
0x16df   : > { %2989 = vrot.lane.b32.xlu1 %v9293_v13, %s8218_s24 }
0x16e0   : > { %2987 = vrot.lane.b32.xlu0 %v9295_v39, %s8218_s24 }
0x16e3   : > { %3280 = vrot.lane.b32.xlu1 %v9359_v21, %s8217_s23 }
0x16e4   : > { %3278 = vrot.lane.b32.xlu0 %v9361_v37, %s8217_s23 }
0x170c   : > { %v6686_v41 = vpop.f32.mrb[42].mxu0 }
0x170d   : > { %3571 = vrot.lane.b32.xlu1 %v6686_v41, %s8216_s19  ;;  %v3552_v63 = vpop.f32.mrb[43].mxu0  ;;  %v9966_v41 = vld [vmem:[#allocation9_spill] sm:$0xff] }
0x170e   : > { %3569 = vrot.lane.b32.xlu0 %v3552_v63, %s8216_s19  ;;  %v9967_v63 = vld [vmem:[#allocation10_spill] sm:$0xff] }
0x174d   : > { %v3568_v6 = vpop.permute.xlu1 %3567 }
0x174e   : > { %3578 = vst.msk [vmem:[#allocation2 + $0x8] sm:$0xff] %vm1933_vm10, %v3568_v6  ;;  %v3566_v17 = vpop.permute.xlu0 %3565 }
0x174f   : > { %3577 = vst.msk [vmem:[#allocation2] sm:$0xff] %vm1933_vm10, %v3566_v17 }
0x1751   : > { %v2990_v13 = vpop.permute.xlu1 %2989 }
0x1752   : > { %2998 = vst.msk [vmem:[#allocation2 + $0x18] sm:$0x3f] %vm1351_vm11, %v2990_v13  ;;  %v2988_v39 = vpop.permute.xlu0 %2987 }
0x1753   : > { %2997 = vst.msk [vmem:[#allocation2 + $0x10] sm:$0xff] %vm1347_vm8, %v2988_v39 }
0x1755   : > { %v3281_v21 = vpop.permute.xlu1 %3280  ;;  %v3582_v25 = vld [vmem:[#allocation2 + $0x8] sm:$0xff] }
0x1756   : > { %3289 = vst.msk [vmem:[#allocation2 + $0x18] sm:$0x3f] %vm1644_vm12, %v3281_v21  ;;  %v3279_v37 = vpop.permute.xlu0 %3278  ;;  %v3581_v48 = vld [vmem:[#allocation2] sm:$0xff] }
0x1757   : > { %3288 = vst.msk [vmem:[#allocation2 + $0x10] sm:$0xff] %vm1640_vm9, %v3279_v37  ;;  %6719 = vmatprep.mubr.f32.mxu0 %v3581_v48  ;;  %v9495_v48 = vld [vmem:[%s9869_s2] ss:$0 sm:$0xff] }
0x1758   : > { %6720 = vmatmul.mubr.f32.vlgmr.msra.gmra.mrb[44].mxu0 %v3582_v25 }
0x1759   : > { %7488 = vmatpush3.bf16.msra.mxu0 %v8325_v10  ;;  %v9952_v10 = vld [vmem:[#allocation11_spill] sm:$0xff] }
0x175a   : > { %7490 = vmatprep.subr.bf16.mxu0 %v8337_v14 }
0x175d   : > { %7492 = vmatpush3.bf16.msra.mxu0 %v8337_v14  ;;  %v9953_v14 = vld [vmem:[#allocation12_spill] sm:$0xff] }
0x175e   : > { %7494 = vmatprep.subr.bf16.mxu0 %v8360_v19 }
0x1761   : > { %7496 = vmatpush3.bf16.msra.mxu0 %v8360_v19 }
0x1762   : > { %7498 = vmatprep.subr.bf16.mxu0 %v8385_v26 }
0x1765   : > { %7500 = vmatpush3.bf16.msra.mxu0 %v8385_v26 }
0x1766   : > { %7502 = vmatprep.subr.bf16.mxu0 %v8405_v32 }
0x1769   : > { %7504 = vmatpush3.bf16.msra.mxu0 %v8405_v32 }
0x176a   : > { %7506 = vmatprep.subr.bf16.mxu0 %v8425_v38 }
0x176d   : > { %7508 = vmatpush3.bf16.msra.mxu0 %v8425_v38 }
0x176e   : > { %7510 = vmatprep.subr.bf16.mxu0 %v8445_v44 }
0x1771   : > { %7512 = vmatpush3.bf16.msra.mxu0 %v8445_v44  ;;  %v5708_v44 = vld [vmem:[%s8355_s20 + $0x48] sm:$0xff] }
0x1772   : > { %7514 = vmatprep.subr.bf16.mxu0 %v9952_v10 }
0x1775   : > { %7516 = vmatpush3.bf16.msra.mxu0 %v9952_v10 }
0x1776   : > { %7550 = vmatprep.subr.bf16.mxu0 %v9953_v14 }
0x177f   : > { %v3572_v19 = vpop.permute.xlu1 %3571 }
0x1780   : > { %3580 = vst.msk [vmem:[#allocation2 + $0x18] sm:$0x3f] %vm1937_vm13, %v3572_v19  ;;  %v3570_v26 = vpop.permute.xlu0 %3569 }
0x1781   : > { %3579 = vst.msk [vmem:[#allocation2 + $0x10] sm:$0xff] %vm1933_vm10, %v3570_v26 }
0x1787   : > { %v3584_v38 = vld [vmem:[#allocation2 + $0x18] sm:$0x3f] }
0x1788   : > { %v3583_v32 = vld [vmem:[#allocation2 + $0x10] sm:$0xff] }
0x1789   : > { %6722 = vmatprep.mubr.f32.mxu0 %v3583_v32  ;;  %v9968_v32 = vld [vmem:[#allocation20_spill] sm:$0xff] }
0x178a   : > { %6723 = vmatmul.mubr.f32.gmra.mrb[46].mxu0 %v3584_v38 }
0x178b   : > { %6757 = vmatprep.mubr.f32.mxu0 %v5707_v57 }
0x178e   : > { %6758 = vmatmul.mubr.f32.vlgmr.msra.gmra.mrb[48].mxu0 %v5708_v44 }
0x178f   : > { %7552 = vmatpush3.bf16.msra.mxu0 %v9953_v14  ;;  %6760 = vmatprep.mubr.f32.mxu0 %v5709_v53 }
0x1790   : > { %7554 = vmatprep.subr.bf16.mxu0 %v9954_v1 }
0x1792   : > { %6761 = vmatmul.mubr.f32.gmra.mrb[50].mxu0 %v5710_v40 }
0x1793   : > { %7556 = vmatpush3.bf16.msra.mxu0 %v9954_v1  ;;  %6833 = vmatprep.mubr.f32.mxu0 %v5707_v57 }
0x1794   : > { %7558 = vmatprep.subr.bf16.mxu0 %v9955_v42 }
0x1797   : > { %7560 = vmatpush3.bf16.msra.mxu0 %v9955_v42 }
0x1798   : > { %7562 = vmatprep.subr.bf16.mxu0 %v9956_v33 }
0x179b   : > { %7564 = vmatpush3.bf16.msra.mxu0 %v9956_v33 }
0x179c   : > { %7566 = vmatprep.subr.bf16.mxu0 %v9957_v5 }
0x179f   : > { %7568 = vmatpush3.bf16.msra.mxu0 %v9957_v5 }
0x17a0   : > { %7570 = vmatprep.subr.bf16.mxu0 %v9958_v56 }
0x17a3   : > { %7572 = vmatpush3.bf16.msra.mxu0 %v9958_v56 }
0x17a4   : > { %7574 = vmatprep.subr.bf16.mxu0 %v9959_v15 }
0x17a7   : > { %7576 = vmatpush3.bf16.msra.mxu0 %v9959_v15  ;;  %v9970_v15 = vld [vmem:[#allocation22_spill] sm:$0xff] }
0x17a8   : > { %7578 = vmatprep.subr.bf16.mxu0 %v9960_v28 }
0x17ab   : > { %7580 = vmatpush3.bf16.msra.mxu0 %v9960_v28 }
0x17ae   : > { %6834 = vmatmul.mubr.f32.vlgmr.msra.gmra.mrb[52].mxu0 %v5708_v44 }
0x17af   : > { %6836 = vmatprep.mubr.f32.mxu0 %v5709_v53 }
0x17b2   : > { %6837 = vmatmul.mubr.f32.gmra.mrb[54].mxu0 %v5710_v40 }
0x182b   : > { %v6721_v18 = vpop.f32.mrb[44].mxu0 }
0x182c   : > { %v3657_v20 = vadd.f32 %v8202_v27, %v6721_v18  ;;  %v3651_v54 = vpop.f32.mrb[45].mxu0  ;;  %v9971_v18 = vld [vmem:[#allocation23_spill] sm:$0xff] }
0x182d   : > { %v3652_v51 = vadd.f32 %v8202_v27, %v3651_v54 }
0x182e   : > { %3672 = vst [vmem:[#allocation3 + $0x28] sm:$0xff] %v3657_v20 }
0x182f   : > { %3671 = vst [vmem:[#allocation3 + $0x20] sm:$0xff] %v3652_v51  ;;  %3740 = vmatmul.mubr.f32.vlgmr.msra.gmra.mrb[56].mxu1 %v3652_v51 }
0x1830   : > { %3745 = vmatprep.mubr.f32.mxu1 %v9951_v43  ;;  %7520 = vmatpush3.bf16.msra.mxu1 %v8302_v3  ;;  %v9965_v3 = vld [vmem:[#allocation8_spill] sm:$0xff] }
0x1831   : > { %7522 = vmatprep.subr.bf16.mxu1 %v9961_v29 }
0x1833   : > { %3746 = vmatmul.mubr.f32.gmra.mrb[58].mxu1 %v3657_v20 }
0x1834   : > { %7524 = vmatpush3.bf16.msra.mxu1 %v9961_v29  ;;  %3751 = vmatprep.mubr.f32.mxu1 %v9951_v43 }
0x1835   : > { %7526 = vmatprep.subr.bf16.mxu1 %v9962_v47 }
0x1838   : > { %7528 = vmatpush3.bf16.msra.mxu1 %v9962_v47 }
0x1839   : > { %7530 = vmatprep.subr.bf16.mxu1 %v9963_v34 }
0x183c   : > { %7532 = vmatpush3.bf16.msra.mxu1 %v9963_v34 }
0x183d   : > { %7534 = vmatprep.subr.bf16.mxu1 %v9964_v45 }
0x1840   : > { %7536 = vmatpush3.bf16.msra.mxu1 %v9964_v45 }
0x1841   : > { %7538 = vmatprep.subr.bf16.mxu1 %v9965_v3 }
0x1844   : > { %7540 = vmatpush3.bf16.msra.mxu1 %v9965_v3 }
0x1845   : > { %7542 = vmatprep.subr.bf16.mxu1 %v9966_v41 }
0x1848   : > { %7544 = vmatpush3.bf16.msra.mxu1 %v9966_v41 }
0x1849   : > { %7546 = vmatprep.subr.bf16.mxu1 %v9967_v63 }
0x184c   : > { %7548 = vmatpush3.bf16.msra.mxu1 %v9967_v63 }
0x185d   : > { %v6724_v6 = vpop.f32.mrb[46].mxu0 }
0x185e   : > { %v3667_v17 = vadd.f32 %v8202_v27, %v6724_v6  ;;  %v3661_v13 = vpop.f32.mrb[47].mxu0 }
0x185f   : > { %v3662_v39 = vadd.f32 %v8202_v27, %v3661_v13 }
0x1860   : > { %3674 = vst [vmem:[#allocation3 + $0x38] sm:$0x3f] %v3667_v17 }
0x1861   : > { %3673 = vst [vmem:[#allocation3 + $0x30] sm:$0xff] %v3662_v39  ;;  %3752 = vmatmul.mubr.f32.gmra.mrb[60].mxu1 %v3662_v39  ;;  %v9490_v21 = vpop.f32.mrb[48].mxu0 }
0x1862   : > { %3757 = vmatprep.mubr.f32.mxu1 %v9951_v43  ;;  %v3868_v37 = vpop.f32.mrb[49].mxu0 }
0x1863   : > { %v3869_v25 = vadd.f32 %v9495_v48, %v3868_v37 }
0x1865   : > { %3758 = vmatmul.mubr.f32.gmra.mrb[62].mxu1 %v3667_v17  ;;  %v9498_v10 = vmul.f32 0.17677669, %v3869_v25  ;;  %v9500_v14 = vpop.f32.mrb[50].mxu0 }
0x1866   : > { %6795 = vmatprep.mubr.f32.mxu1 %v5707_v57  ;;  %v9502_v19 = vpop.f32.mrb[51].mxu0 }
0x1869   : > { %6796 = vmatmul.mubr.f32.vlgmr.msra.gmra.mrb[64].mxu1 %v5708_v44  ;;  %v9969_v44 = vld [vmem:[#allocation21_spill] sm:$0xff] }
0x186a   : > { %6798 = vmatprep.mubr.f32.mxu1 %v5709_v53 }
0x186d   : > { %6799 = vmatmul.mubr.f32.gmra.mrb[66].mxu1 %v5710_v40 }
0x186e   : > { %6847 = vmatprep.mubr.msk.f32.mxu1 %vm795_vm0, %v9498_v10 }
0x1902   : > { %v3741_v26 = vpop.f32.mrb[56].mxu1 }
0x1903   : > { %v3742_v38 = vadd.f32 %v3741_v26, %v9968_v32  ;;  %v3743_v57 = vpop.f32.mrb[57].mxu1 }
0x1904   : > { %v3744_v53 = vadd.f32 %v3743_v57, %v9969_v44 }
0x1905   : > { %8071 = vtanh.f32 %v3742_v38  ;;  %v8204_v38 = vld [vmem:[%s9871_s4] ss:$0 sm:$0xff] }
0x1906   : > { %8073 = vtanh.f32 %v3744_v53  ;;  %v3747_v1 = vpop.f32.mrb[58].mxu1 }
0x1907   : > { %v3748_v40 = vadd.f32 %v3747_v1, %v9968_v32  ;;  %v3749_v42 = vpop.f32.mrb[59].mxu1 }
0x1908   : > { %v3750_v33 = vadd.f32 %v3749_v42, %v9969_v44 }
0x1909   : > { %8075 = vtanh.f32 %v3748_v40 }
0x190a   : > { %8077 = vtanh.f32 %v3750_v33 }
0x190f   : > { %v8072_v5 = vpop.eup %8071 }
0x1910   : > { %v8074_v56 = vpop.eup %8073  ;;  %v3772_v27 = vmul.f32 %v8072_v5, %v9971_v18 }
0x1911   : > { %v3773_v28 = vmul.f32 %v8074_v56, %v9970_v15 }
0x1913   : > { %v8076_v20 = vpop.eup %8075  ;;  %v3780_v54 = vsel %vm2165_vm14, %v3773_v28, 0.0 }
0x1914   : > { %v8078_v51 = vpop.eup %8077  ;;  %v9513_v29 = vadd.f32 %v3780_v54, %v3772_v27  ;;  %v3774_v34 = vmul.f32 %v8076_v20, %v9971_v18 }
0x1915   : > { %v3775_v47 = vmul.f32 %v8078_v51, %v9970_v15 }
0x1917   : > { %v3784_v45 = vsel %vm2165_vm14, %v3775_v47, 0.0 }
0x1918   : > { %v9518_v3 = vadd.f32 %v3784_v45, %v3774_v34 }
0x1934   : > { %v3753_v41 = vpop.f32.mrb[60].mxu1 }
0x1935   : > { %v3754_v63 = vadd.f32 %v3753_v41, %v9968_v32  ;;  %v3755_v6 = vpop.f32.mrb[61].mxu1 }
0x1936   : > { %v3756_v17 = vadd.f32 %v3755_v6, %v9969_v44 }
0x1937   : > { %8079 = vtanh.f32 %v3754_v63 }
0x1938   : > { %8081 = vtanh.f32 %v3756_v17  ;;  %v3759_v13 = vpop.f32.mrb[62].mxu1 }
0x1939   : > { %v3760_v39 = vadd.f32 %v3759_v13, %v9968_v32  ;;  %v3761_v37 = vpop.f32.mrb[63].mxu1 }
0x193a   : > { %v3762_v25 = vadd.f32 %v3761_v37, %v9969_v44 }
0x193b   : > { %8083 = vtanh.f32 %v3760_v39 }
0x193c   : > { %8085 = vtanh.f32 %v3762_v25  ;;  %v6797_v26 = vpop.f32.mrb[64].mxu1 }
0x193d   : > { %v3963_v57 = vadd.f32 %v8204_v38, %v6797_v26  ;;  %v3957_v53 = vpop.f32.mrb[65].mxu1  ;;  %v3879_v26 = vadd.f32 %v9495_v48, %v9502_v19 }
0x193e   : > { %v3958_v1 = vadd.f32 %v8204_v38, %v3957_v53 }
0x193f   : > { %v9556_v53 = vmul.f32 0.17677669, %v3879_v26 }
0x1940   : > { %v7581_v40 = vpack.c.bf16 %v3963_v57, %v3958_v1  ;;  %v6800_v42 = vpop.f32.mrb[66].mxu1  ;;  %v9527_v33 = vpack.i.bf16 %v3963_v57, %v3958_v1  ;;  %v3884_v57 = vadd.f32 %v9495_v48, %v9500_v14 }
0x1941   : > { %v8080_v5 = vpop.eup %8079  ;;  %v3973_v56 = vadd.f32 %v8204_v38, %v6800_v42  ;;  %v3967_v28 = vpop.f32.mrb[67].mxu1 }
0x1942   : > { %v8082_v27 = vpop.eup %8081  ;;  %7583 = vmatprep.subr.msk.bf16.mxu1 %vm8490_vm1, %v7581_v40  ;;  %v3968_v20 = vadd.f32 %v8204_v38, %v3967_v28  ;;  %v3776_v54 = vmul.f32 %v8080_v5, %v9971_v18  ;;  %v3874_v38 = vadd.f32 %v9495_v48, %v9490_v21 }
0x1943   : > { %7586 = vmatpush3.bf16.xpose.msk.msra.mxu1 %vm8490_vm1, %v7581_v40  ;;  %v3777_v51 = vmul.f32 %v8082_v27, %v9970_v15  ;;  %v9560_v40 = vmul.f32 0.17677669, %v3884_v57  ;;  %v6835_v27 = vpop.f32.mrb[52].mxu0 }
0x1944   : > { %v7587_v47 = vpack.c.bf16 %v3973_v56, %v3968_v20  ;;  %v9535_v34 = vpack.i.bf16 %v3973_v56, %v3968_v20  ;;  %v9558_v1 = vmul.f32 0.17677669, %v3874_v38  ;;  %v8205_v20 = vld [vmem:[%s9873_s6] ss:$0 sm:$0xff] }
0x1945   : > { %v8084_v45 = vpop.eup %8083  ;;  %v3788_v41 = vsel %vm2165_vm14, %v3777_v51, 0.0  ;;  %v4042_v51 = vpop.f32.mrb[53].mxu0 }
0x1946   : > { %v8086_v63 = vpop.eup %8085  ;;  %7589 = vmatprep.subr.msk.bf16.mxu1 %vm8490_vm1, %v7587_v47  ;;  %v9540_v6 = vadd.f32 %v3788_v41, %v3776_v54  ;;  %v3778_v17 = vmul.f32 %v8084_v45, %v9971_v18  ;;  %v9575_v54 = vadd.f32 %v8205_v20, %v6835_v27  ;;  %v6838_v45 = vpop.f32.mrb[54].mxu0 }
0x1947   : > { %v3779_v13 = vmul.f32 %v8086_v63, %v9970_v15  ;;  %v4052_v41 = vpop.f32.mrb[55].mxu0 }
0x1948   : > { %v3792_v39 = vsel %vm963_vm4, %v3778_v17, 0.0 }
0x1949   : > { %v3793_v37 = vsel %vm2179_vm15, %v3779_v13, 0.0 }
0x194a   : > { %v9546_v25 = vadd.f32 %v3793_v37, %v3792_v39 }
0x194b   : > { %7592 = vmatpush3.bf16.xpose.msk.msra.mxu1 %vm8490_vm1, %v7587_v47  ;;  %v9577_v47 = vadd.f32 %v8205_v20, %v4042_v51 }
0x194d   : > { %v7593_v63 = vpack.c.bf16 %v9575_v54, %v9577_v47 }
0x194f   : > { %7594 = vmatprep.subr.bf16.mxu1 %v7593_v63 }
0x1952   : > { %6848 = vmatmul.mubr.msk.f32.vlgmr.msra.gmra.mrb[68].mxu1 %vm795_vm0, %v9558_v1 }
0x1953   : > { %6850 = vmatprep.mubr.msk.f32.mxu1 %vm795_vm0, %v9556_v53  ;;  %7596 = vmatpush3.bf16.msra.mxu1 %v7593_v63 }
0x1956   : > { %6851 = vmatmul.mubr.msk.f32.gmra.mrb[70].mxu1 %vm795_vm0, %v9560_v40 }
0x1a25   : > { %v6849_v19 = vpop.f32.mrb[68].mxu1 }
0x1a26   : > { %v4151_v21 = vpop.f32.mrb[69].mxu1  ;;  %v4173_v42 = vsel %vm905_vm2, %v6849_v19, -inf }
0x1a27   : > { %4174 = vmax.xlane.f32.xlu1 %v4173_v42  ;;  %v4170_v48 = vsel %vm905_vm2, %v4151_v21, -inf }
0x1a28   : > { %4171 = vmax.xlane.f32.xlu0 %v4170_v48 }
0x1a29   : > { %v6852_v14 = vpop.f32.mrb[70].mxu1 }
0x1a2a   : > { %v4161_v5 = vpop.f32.mrb[71].mxu1  ;;  %v4179_v28 = vsel %vm915_vm3, %v6852_v14, -inf }
0x1a2b   : > { %v4176_v56 = vsel %vm905_vm2, %v4161_v5, -inf }
0x1a2c   : > { %4177 = vmax.xlane.f32.xlu0 %v4176_v56 }
0x1a30   : > { %4180 = vmax.xlane.f32.xlu0 %v4179_v28 }
0x1ab4   : > { %v4175_v17 = vpop.xlane.xlu1 %4174 }
0x1ab5   : > { %v4183_v13 = vsub.f32 %v6849_v19, %v4175_v17  ;;  %v4172_v39 = vpop.xlane.xlu0 %4171 }
0x1ab6   : > { %v4182_v37 = vsub.f32 %v4151_v21, %v4172_v39  ;;  %v4058_v39 = vadd.f32 %v8205_v20, %v6838_v45 }
0x1ab7   : > { %v4188_v26 = vmul.f32 1.442695, %v4183_v13 }
0x1ab8   : > { %v4186_v38 = vmul.f32 1.442695, %v4182_v37 }
0x1ab9   : > { %8087 = vpow2.f32 %v4188_v26  ;;  %v4178_v57 = vpop.xlane.xlu0 %4177 }
0x1aba   : > { %8089 = vpow2.f32 %v4186_v38  ;;  %v4184_v42 = vsub.f32 %v4161_v5, %v4178_v57 }
0x1abc   : > { %v4190_v48 = vmul.f32 1.442695, %v4184_v42 }
0x1abd   : > { %v4181_v56 = vpop.xlane.xlu0 %4180 }
0x1abe   : > { %8091 = vpow2.f32 %v4190_v48  ;;  %v4185_v28 = vsub.f32 %v6852_v14, %v4181_v56  ;;  %v4053_v14 = vadd.f32 %v8205_v20, %v4052_v41 }
0x1ac0   : > { %v4192_v27 = vmul.f32 1.442695, %v4185_v28  ;;  %v7597_v37 = vpack.c.bf16 %v4058_v39, %v4053_v14  ;;  %v9587_v26 = vpack.i.bf16 %v4058_v39, %v4053_v14 }
0x1ac2   : > { %8093 = vpow2.f32 %v4192_v27  ;;  %7599 = vmatprep.subr.msk.bf16.mxu1 %vm8619_vm6, %v7597_v37 }
0x1ac3   : > { %v8088_v51 = vpop.eup %8087  ;;  %7602 = vmatpush3.bf16.msk.msra.mxu1 %vm8619_vm6, %v7597_v37 }
0x1ac4   : > { %v8090_v18 = vpop.eup %8089  ;;  %v4197_v63 = vsel %vm905_vm2, %v8088_v51, 0.0 }
0x1ac5   : > { %4198 = vadd.xlane.f32.xlu1 %v4197_v63  ;;  %v4194_v19 = vsel %vm905_vm2, %v8090_v18, 0.0 }
0x1ac6   : > { %4195 = vadd.xlane.f32.xlu0 %v4194_v19 }
0x1ac8   : > { %v8092_v21 = vpop.eup %8091 }
0x1ac9   : > { %v4200_v17 = vsel %vm905_vm2, %v8092_v21, 0.0 }
0x1aca   : > { %4201 = vadd.xlane.f32.xlu0 %v4200_v17 }
0x1acc   : > { %v8094_v13 = vpop.eup %8093 }
0x1acd   : > { %v4203_v5 = vsel %vm915_vm3, %v8094_v13, 0.0 }
0x1ace   : > { %4204 = vadd.xlane.f32.xlu1 %v4203_v5 }
0x1adf   : > { %7873 = vrot.lane.b32.xlu1 %v9535_v34, %s8216_s19 }
0x1ae0   : > { %7868 = vrot.lane.b32.xlu0 %v9527_v33, %s8216_s19 }
0x1ae3   : > { %4318 = vrot.lane.b32.xlu1 %v9498_v10, %s8216_s19 }
0x1ae4   : > { %4322 = vrot.lane.b32.xlu0 %v9556_v53, %s8216_s19 }
0x1ae7   : > { %4320 = vrot.lane.b32.xlu1 %v9558_v1, %s8216_s19 }
0x1aeb   : > { %4324 = vrot.lane.b32.xlu1 %v9560_v40, %s8216_s19 }
0x1b52   : > { %v4199_v20 = vpop.xlane.xlu1 %4198 }
0x1b53   : > { %8095 = vrcp.f32 %v4199_v20  ;;  %v4196_v45 = vpop.xlane.xlu0 %4195 }
0x1b54   : > { %8097 = vrcp.f32 %v4196_v45 }
0x1b57   : > { %v4202_v41 = vpop.xlane.xlu0 %4201 }
0x1b58   : > { %8099 = vrcp.f32 %v4202_v41 }
0x1b5b   : > { %v4205_v38 = vpop.xlane.xlu1 %4204  ;;  %v7869_v57 = vpop.permute.xlu0 %7868 }
0x1b5c   : > { %8101 = vrcp.f32 %v4205_v38  ;;  %v7871_v42 = vunpack.i.h.bf16 %v7869_v57  ;;  %v7870_v48 = vunpack.i.l.bf16 %v7869_v57 }
0x1b5d   : > { %v8096_v56 = vpop.eup %8095 }
0x1b5e   : > { %v8098_v28 = vpop.eup %8097  ;;  %v7603_v27 = vpack.c.bf16 %v7871_v42, %v7870_v48  ;;  %v4211_v17 = vmul.f32 %v8096_v56, %v8088_v51 }
0x1b5f   : > { %v7874_v63 = vpop.permute.xlu1 %7873  ;;  %v4210_v19 = vmul.f32 %v8098_v28, %v8090_v18  ;;  %v4323_v38 = vpop.permute.xlu0 %4322 }
0x1b60   : > { %v7876_v5 = vunpack.i.h.bf16 %v7874_v63  ;;  %v7875_v39 = vunpack.i.l.bf16 %v7874_v63  ;;  %7605 = vmatprep.subr.msk.bf16.mxu1 %vm8490_vm1, %v7603_v27 }
0x1b61   : > { %6861 = vmatprep.mubr.msk.f32.mxu1 %vm905_vm2, %v4210_v19 }
0x1b62   : > { %v8100_v14 = vpop.eup %8099  ;;  %v7609_v37 = vpack.c.bf16 %v7876_v5, %v7875_v39  ;;  %6862 = vmatmul.mubr.msk.f32.vlgmr.msra.gmra.mrb[72].mxu1 %vm905_vm2, %v4211_v17 }
0x1b63   : > { %7608 = vmatpush3.bf16.xpose.msk.msra.mxu1 %vm8490_vm1, %v7603_v27  ;;  %v4212_v20 = vmul.f32 %v8100_v14, %v8092_v21  ;;  %v4319_v45 = vpop.permute.xlu1 %4318 }
0x1b64   : > { %7611 = vmatprep.subr.msk.bf16.mxu1 %vm8490_vm1, %v7609_v37 }
0x1b65   : > { %6864 = vmatprep.mubr.msk.f32.mxu1 %vm905_vm2, %v4212_v20 }
0x1b66   : > { %v8102_v18 = vpop.eup %8101 }
0x1b67   : > { %v4213_v51 = vmul.f32 %v8102_v18, %v8094_v13  ;;  %v4321_v41 = vpop.permute.xlu1 %4320 }
0x1b69   : > { %6865 = vmatmul.mubr.msk.f32.gmra.mrb[74].mxu1 %vm905_vm2, %v4213_v51 }
0x1b6a   : > { %6875 = vmatprep.mubr.msk.f32.mxu1 %vm795_vm0, %v4319_v45 }
0x1b6b   : > { %7614 = vmatpush3.bf16.xpose.msk.msra.mxu1 %vm8490_vm1, %v7609_v37  ;;  %v4325_v21 = vpop.permute.xlu1 %4324 }
0x1b72   : > { %6876 = vmatmul.mubr.msk.f32.vlgmr.msra.gmra.mrb[76].mxu1 %vm795_vm0, %v4321_v41 }
0x1b73   : > { %6878 = vmatprep.mubr.msk.f32.mxu1 %vm795_vm0, %v4323_v38 }
0x1b76   : > { %6879 = vmatmul.mubr.msk.f32.gmra.mrb[78].mxu1 %vm795_vm0, %v4325_v21 }
0x1c35   : > { %v6863_v57 = vpop.f32.mrb[72].mxu1 }
0x1c36   : > { %4315 = vst.msk [vmem:[#allocation2 + $0x8] sm:$0xff] %vm795_vm0, %v6863_v57  ;;  %v4295_v13 = vpop.f32.mrb[73].mxu1 }
0x1c37   : > { %4314 = vst.msk [vmem:[#allocation2] sm:$0xff] %vm795_vm0, %v4295_v13  ;;  %v9635_v13 = vpack.i.bf16 %v9575_v54, %v9577_v47 }
0x1c3c   : > { %v6866_v42 = vpop.f32.mrb[74].mxu1 }
0x1c3d   : > { %4317 = vst.msk [vmem:[#allocation2 + $0x18] sm:$0x3f] %vm1055_vm7, %v6866_v42  ;;  %v4305_v48 = vpop.f32.mrb[75].mxu1 }
0x1c3e   : > { %4316 = vst.msk [vmem:[#allocation2 + $0x10] sm:$0xff] %vm795_vm0, %v4305_v48 }
0x1c45   : > { %v6877_v56 = vpop.f32.mrb[76].mxu1 }
0x1c46   : > { %v4416_v28 = vpop.f32.mrb[77].mxu1  ;;  %v4438_v27 = vsel %vm905_vm2, %v6877_v56, -inf }
0x1c47   : > { %4439 = vmax.xlane.f32.xlu1 %v4438_v27  ;;  %v4435_v63 = vsel %vm905_vm2, %v4416_v28, -inf }
0x1c48   : > { %4436 = vmax.xlane.f32.xlu0 %v4435_v63 }
0x1c49   : > { %v6880_v19 = vpop.f32.mrb[78].mxu1 }
0x1c4a   : > { %v4426_v17 = vpop.f32.mrb[79].mxu1  ;;  %v4444_v39 = vsel %vm915_vm3, %v6880_v19, -inf }
0x1c4b   : > { %v4441_v5 = vsel %vm905_vm2, %v4426_v17, -inf }
0x1c4c   : > { %4442 = vmax.xlane.f32.xlu0 %v4441_v5 }
0x1c50   : > { %4445 = vmax.xlane.f32.xlu0 %v4444_v39 }
0x1cd4   : > { %v4440_v14 = vpop.xlane.xlu1 %4439 }
0x1cd5   : > { %v4448_v37 = vsub.f32 %v6877_v56, %v4440_v14  ;;  %v4437_v20 = vpop.xlane.xlu0 %4436 }
0x1cd6   : > { %v4447_v18 = vsub.f32 %v4416_v28, %v4437_v20 }
0x1cd7   : > { %v4453_v51 = vmul.f32 1.442695, %v4448_v37 }
0x1cd8   : > { %v4451_v45 = vmul.f32 1.442695, %v4447_v18 }
0x1cd9   : > { %8103 = vpow2.f32 %v4453_v51  ;;  %v4443_v42 = vpop.xlane.xlu0 %4442 }
0x1cda   : > { %8105 = vpow2.f32 %v4451_v45  ;;  %v4449_v48 = vsub.f32 %v4426_v17, %v4443_v42 }
0x1cdc   : > { %v4455_v56 = vmul.f32 1.442695, %v4449_v48 }
0x1cdd   : > { %v4446_v28 = vpop.xlane.xlu0 %4445 }
0x1cde   : > { %v4450_v27 = vsub.f32 %v6880_v19, %v4446_v28  ;;  %8107 = vpow2.f32 %v4455_v56 }
0x1ce0   : > { %v4457_v63 = vmul.f32 1.442695, %v4450_v27 }
0x1ce2   : > { %8109 = vpow2.f32 %v4457_v63 }
0x1ce3   : > { %v8104_v41 = vpop.eup %8103 }
0x1ce4   : > { %v8106_v38 = vpop.eup %8105  ;;  %v4462_v21 = vsel %vm905_vm2, %v8104_v41, 0.0 }
0x1ce5   : > { %4463 = vadd.xlane.f32.xlu1 %v4462_v21  ;;  %v4459_v57 = vsel %vm905_vm2, %v8106_v38, 0.0 }
0x1ce6   : > { %4460 = vadd.xlane.f32.xlu0 %v4459_v57 }
0x1ce8   : > { %v8108_v5 = vpop.eup %8107 }
0x1ce9   : > { %v4465_v39 = vsel %vm905_vm2, %v8108_v5, 0.0 }
0x1cec   : > { %v8110_v54 = vpop.eup %8109 }
0x1ced   : > { %v4468_v47 = vsel %vm915_vm3, %v8110_v54, 0.0 }
0x1cf6   : > { %7883 = vrot.lane.b32.xlu1 %v9587_v26, %s8216_s19 }
0x1cfa   : > { %7888 = vrot.lane.b32.xlu1 %v9527_v33, %s8217_s23 }
0x1cfc   : > { %7878 = vrot.lane.b32.xlu0 %v9635_v13, %s8216_s19 }
0x1cfe   : > { %7893 = vrot.lane.b32.xlu1 %v9535_v34, %s8217_s23 }
0x1d1b   : > { %4466 = vadd.xlane.f32.xlu0 %v4465_v39 }
0x1d22   : > { %4469 = vadd.xlane.f32.xlu1 %v4468_v47 }
0x1d31   : > { %4612 = vrot.lane.b32.xlu0 %v9498_v10, %s8217_s23 }
0x1d33   : > { %4614 = vrot.lane.b32.xlu1 %v9558_v1, %s8217_s23 }
0x1d35   : > { %4616 = vrot.lane.b32.xlu0 %v9556_v53, %s8217_s23 }
0x1d37   : > { %4618 = vrot.lane.b32.xlu1 %v9560_v40, %s8217_s23 }
0x1d72   : > { %v4464_v19 = vpop.xlane.xlu1 %4463 }
0x1d73   : > { %v4461_v17 = vpop.xlane.xlu0 %4460 }
0x1d74   : > { %8111 = vrcp.f32 %v4461_v17 }
0x1d75   : > { %8113 = vrcp.f32 %v4464_v19 }
0x1d76   : > { %v7884_v14 = vpop.permute.xlu1 %7883 }
0x1d77   : > { %v7879_v37 = vpop.permute.xlu0 %7878  ;;  %v7886_v20 = vunpack.i.h.bf16 %v7884_v14  ;;  %v7885_v18 = vunpack.i.l.bf16 %v7884_v14 }
0x1d78   : > { %v7881_v51 = vunpack.i.h.bf16 %v7879_v37  ;;  %v7880_v45 = vunpack.i.l.bf16 %v7879_v37 }
0x1d79   : > { %v7619_v42 = vpack.c.bf16 %v7886_v20, %v7885_v18 }
0x1d7a   : > { %v7615_v21 = vpack.c.bf16 %v7881_v51, %v7880_v45  ;;  %v7889_v57 = vpop.permute.xlu1 %7888 }
0x1d7b   : > { %v7891_v48 = vunpack.i.h.bf16 %v7889_v57  ;;  %v7890_v56 = vunpack.i.l.bf16 %v7889_v57 }
0x1d7c   : > { %7616 = vmatprep.subr.bf16.mxu0 %v7615_v21 }
0x1d7d   : > { %7618 = vmatpush3.bf16.msra.mxu0 %v7615_v21  ;;  %v7625_v39 = vpack.c.bf16 %v7891_v48, %v7890_v56 }
0x1d7e   : > { %v8112_v28 = vpop.eup %8111  ;;  %7621 = vmatprep.subr.msk.bf16.mxu0 %vm8619_vm6, %v7619_v42  ;;  %v7894_v19 = vpop.permute.xlu1 %7893 }
0x1d7f   : > { %v8114_v27 = vpop.eup %8113  ;;  %v4475_v63 = vmul.f32 %v8112_v28, %v8106_v38  ;;  %v7896_v17 = vunpack.i.h.bf16 %v7894_v19  ;;  %v7895_v14 = vunpack.i.l.bf16 %v7894_v19 }
0x1d80   : > { %v4476_v47 = vmul.f32 %v8114_v27, %v8104_v41 }
0x1d81   : > { %7624 = vmatpush3.bf16.msk.msra.mxu0 %vm8619_vm6, %v7619_v42  ;;  %6889 = vmatprep.mubr.msk.f32.mxu0 %vm905_vm2, %v4475_v63  ;;  %v7631_v37 = vpack.c.bf16 %v7896_v17, %v7895_v14 }
0x1d82   : > { %7627 = vmatprep.subr.msk.bf16.mxu0 %vm8490_vm1, %v7625_v39 }
0x1d84   : > { %6890 = vmatmul.mubr.msk.f32.vlgmr.msra.gmra.mrb[56].mxu0 %vm905_vm2, %v4476_v47 }
0x1d8a   : > { %7630 = vmatpush3.bf16.xpose.msk.msra.mxu0 %vm8490_vm1, %v7625_v39 }
0x1d8b   : > { %7633 = vmatprep.subr.msk.bf16.mxu0 %vm8490_vm1, %v7631_v37 }
0x1d92   : > { %7636 = vmatpush3.bf16.xpose.msk.msra.mxu0 %vm8490_vm1, %v7631_v37 }
0x1da8   : > { %v4467_v38 = vpop.xlane.xlu0 %4466 }
0x1da9   : > { %8115 = vrcp.f32 %v4467_v38 }
0x1dac   : > { %v4613_v45 = vpop.permute.xlu0 %4612 }
0x1daf   : > { %v4470_v41 = vpop.xlane.xlu1 %4469 }
0x1db0   : > { %8117 = vrcp.f32 %v4470_v41  ;;  %v4617_v42 = vpop.permute.xlu0 %4616 }
0x1db3   : > { %v8116_v20 = vpop.eup %8115  ;;  %v4615_v57 = vpop.permute.xlu1 %4614 }
0x1db4   : > { %v4477_v18 = vmul.f32 %v8116_v20, %v8108_v5 }
0x1db6   : > { %6892 = vmatprep.mubr.msk.f32.mxu0 %vm905_vm2, %v4477_v18 }
0x1db7   : > { %v4619_v48 = vpop.permute.xlu1 %4618 }
0x1dba   : > { %v8118_v51 = vpop.eup %8117 }
0x1dbb   : > { %v4478_v21 = vmul.f32 %v8118_v51, %v8110_v54 }
0x1dbd   : > { %6893 = vmatmul.mubr.msk.f32.gmra.mrb[58].mxu0 %vm905_vm2, %v4478_v21 }
0x1dbe   : > { %6903 = vmatprep.mubr.msk.f32.mxu0 %vm795_vm0, %v4613_v45 }
0x1dc1   : > { %6904 = vmatmul.mubr.msk.f32.vlgmr.msra.gmra.mrb[60].mxu0 %vm795_vm0, %v4615_v57 }
0x1dc2   : > { %6906 = vmatprep.mubr.msk.f32.mxu0 %vm795_vm0, %v4617_v42 }
0x1dc5   : > { %6907 = vmatmul.mubr.msk.f32.gmra.mrb[62].mxu0 %vm795_vm0, %v4619_v48 }
0x1e57   : > { %v9671_v56 = vpop.f32.mrb[56].mxu0 }
0x1e58   : > { %v9673_v5 = vpop.f32.mrb[57].mxu0 }
0x1e90   : > { %v9675_v28 = vpop.f32.mrb[58].mxu0 }
0x1e91   : > { %v9677_v54 = vpop.f32.mrb[59].mxu0 }
0x1e94   : > { %v6905_v27 = vpop.f32.mrb[60].mxu0 }
0x1e95   : > { %v4710_v63 = vpop.f32.mrb[61].mxu0  ;;  %v4732_v39 = vsel %vm905_vm2, %v6905_v27, -inf }
0x1e96   : > { %4733 = vmax.xlane.f32.xlu1 %v4732_v39  ;;  %v4729_v47 = vsel %vm905_vm2, %v4710_v63, -inf }
0x1e97   : > { %4730 = vmax.xlane.f32.xlu0 %v4729_v47 }
0x1e98   : > { %v6908_v19 = vpop.f32.mrb[62].mxu0 }
0x1e99   : > { %v4720_v17 = vpop.f32.mrb[63].mxu0  ;;  %v4738_v37 = vsel %vm915_vm3, %v6908_v19, -inf }
0x1e9a   : > { %v4735_v14 = vsel %vm905_vm2, %v4720_v17, -inf }
0x1e9b   : > { %4736 = vmax.xlane.f32.xlu0 %v4735_v14 }
0x1e9f   : > { %4739 = vmax.xlane.f32.xlu0 %v4738_v37 }
0x1f23   : > { %v4734_v38 = vpop.xlane.xlu1 %4733 }
0x1f24   : > { %v4742_v41 = vsub.f32 %v6905_v27, %v4734_v38  ;;  %v4731_v20 = vpop.xlane.xlu0 %4730 }
0x1f25   : > { %v4741_v18 = vsub.f32 %v4710_v63, %v4731_v20 }
0x1f26   : > { %v4747_v51 = vmul.f32 1.442695, %v4742_v41 }
0x1f27   : > { %v4745_v45 = vmul.f32 1.442695, %v4741_v18 }
0x1f28   : > { %8119 = vpow2.f32 %v4747_v51  ;;  %v4737_v27 = vpop.xlane.xlu0 %4736 }
0x1f29   : > { %8121 = vpow2.f32 %v4745_v45  ;;  %v4743_v63 = vsub.f32 %v4720_v17, %v4737_v27 }
0x1f2b   : > { %v4749_v39 = vmul.f32 1.442695, %v4743_v63 }
0x1f2c   : > { %v4740_v47 = vpop.xlane.xlu0 %4739 }
0x1f2d   : > { %v4744_v14 = vsub.f32 %v6908_v19, %v4740_v47  ;;  %8123 = vpow2.f32 %v4749_v39 }
0x1f2f   : > { %v4751_v37 = vmul.f32 1.442695, %v4744_v14 }
0x1f31   : > { %8125 = vpow2.f32 %v4751_v37 }
0x1f32   : > { %v8120_v21 = vpop.eup %8119 }
0x1f33   : > { %v8122_v57 = vpop.eup %8121  ;;  %v4756_v42 = vsel %vm905_vm2, %v8120_v21, 0.0 }
0x1f34   : > { %4757 = vadd.xlane.f32.xlu1 %v4756_v42  ;;  %v4753_v48 = vsel %vm905_vm2, %v8122_v57, 0.0 }
0x1f35   : > { %4754 = vadd.xlane.f32.xlu0 %v4753_v48 }
0x1f37   : > { %v8124_v38 = vpop.eup %8123 }
0x1f38   : > { %v4759_v41 = vsel %vm905_vm2, %v8124_v38, 0.0 }
0x1f3b   : > { %v8126_v20 = vpop.eup %8125 }
0x1f45   : > { %7903 = vrot.lane.b32.xlu1 %v9587_v26, %s8217_s23 }
0x1f49   : > { %7908 = vrot.lane.b32.xlu1 %v9527_v33, %s8218_s24  ;;  %v4762_v33 = vsel %vm915_vm3, %v8126_v20, 0.0 }
0x1f4b   : > { %7898 = vrot.lane.b32.xlu0 %v9635_v13, %s8217_s23 }
0x1f4d   : > { %7913 = vrot.lane.b32.xlu1 %v9535_v34, %s8218_s24 }
0x1f6a   : > { %4760 = vadd.xlane.f32.xlu0 %v4759_v41 }
0x1f71   : > { %4763 = vadd.xlane.f32.xlu1 %v4762_v33 }
0x1f80   : > { %4903 = vrot.lane.b32.xlu0 %v9498_v10, %s8218_s24 }
0x1f82   : > { %4905 = vrot.lane.b32.xlu1 %v9558_v1, %s8218_s24 }
0x1f84   : > { %4907 = vrot.lane.b32.xlu0 %v9556_v53, %s8218_s24 }
0x1f86   : > { %4909 = vrot.lane.b32.xlu1 %v9560_v40, %s8218_s24 }
0x1fc1   : > { %v4758_v34 = vpop.xlane.xlu1 %4757 }
0x1fc2   : > { %v4755_v19 = vpop.xlane.xlu0 %4754 }
0x1fc3   : > { %8127 = vrcp.f32 %v4755_v19 }
0x1fc4   : > { %8129 = vrcp.f32 %v4758_v34 }
0x1fc5   : > { %v7904_v17 = vpop.permute.xlu1 %7903 }
0x1fc6   : > { %v7899_v18 = vpop.permute.xlu0 %7898  ;;  %v7906_v51 = vunpack.i.h.bf16 %v7904_v17  ;;  %v7905_v45 = vunpack.i.l.bf16 %v7904_v17 }
0x1fc7   : > { %v7901_v42 = vunpack.i.h.bf16 %v7899_v18  ;;  %v7900_v48 = vunpack.i.l.bf16 %v7899_v18 }
0x1fc8   : > { %v7641_v63 = vpack.c.bf16 %v7906_v51, %v7905_v45 }
0x1fc9   : > { %v7637_v10 = vpack.c.bf16 %v7901_v42, %v7900_v48  ;;  %v7909_v27 = vpop.permute.xlu1 %7908 }
0x1fca   : > { %v7911_v1 = vunpack.i.h.bf16 %v7909_v27  ;;  %v7910_v39 = vunpack.i.l.bf16 %v7909_v27 }
0x1fcb   : > { %7638 = vmatprep.subr.bf16.mxu1 %v7637_v10 }
0x1fcc   : > { %7640 = vmatpush3.bf16.msra.mxu1 %v7637_v10  ;;  %v7647_v14 = vpack.c.bf16 %v7911_v1, %v7910_v39 }
0x1fcd   : > { %v8128_v53 = vpop.eup %8127  ;;  %7643 = vmatprep.subr.msk.bf16.mxu1 %vm8619_vm6, %v7641_v63  ;;  %v7914_v41 = vpop.permute.xlu1 %7913 }
0x1fce   : > { %v8130_v40 = vpop.eup %8129  ;;  %v4769_v47 = vmul.f32 %v8128_v53, %v8122_v57  ;;  %v7916_v33 = vunpack.i.h.bf16 %v7914_v41  ;;  %v7915_v34 = vunpack.i.l.bf16 %v7914_v41 }
0x1fcf   : > { %v4770_v37 = vmul.f32 %v8130_v40, %v8120_v21 }
0x1fd0   : > { %7646 = vmatpush3.bf16.msk.msra.mxu1 %vm8619_vm6, %v7641_v63  ;;  %6917 = vmatprep.mubr.msk.f32.mxu1 %vm905_vm2, %v4769_v47  ;;  %v7653_v19 = vpack.c.bf16 %v7916_v33, %v7915_v34 }
0x1fd1   : > { %7649 = vmatprep.subr.msk.bf16.mxu1 %vm8490_vm1, %v7647_v14 }
0x1fd3   : > { %6918 = vmatmul.mubr.msk.f32.vlgmr.msra.gmra.mrb[80].mxu1 %vm905_vm2, %v4770_v37 }
0x1fd9   : > { %7652 = vmatpush3.bf16.xpose.msk.msra.mxu1 %vm8490_vm1, %v7647_v14 }
0x1fda   : > { %7655 = vmatprep.subr.msk.bf16.mxu1 %vm8490_vm1, %v7653_v19 }
0x1fe1   : > { %7658 = vmatpush3.bf16.xpose.msk.msra.mxu1 %vm8490_vm1, %v7653_v19 }
0x1fe2   : > { %7702 = vmatprep.subr.bf16.mxu1 %v8891_v46 }
0x1ff7   : > { %v4761_v21 = vpop.xlane.xlu0 %4760 }
0x1ff8   : > { %8131 = vrcp.f32 %v4761_v21 }
0x1ffb   : > { %v4904_v45 = vpop.permute.xlu0 %4903 }
0x1ffe   : > { %v4764_v57 = vpop.xlane.xlu1 %4763 }
0x1fff   : > { %8133 = vrcp.f32 %v4764_v57  ;;  %v4908_v58 = vpop.permute.xlu0 %4907 }
0x2002   : > { %v8132_v17 = vpop.eup %8131  ;;  %v4906_v48 = vpop.permute.xlu1 %4905 }
0x2003   : > { %v4771_v18 = vmul.f32 %v8132_v17, %v8124_v38 }
0x2005   : > { %6920 = vmatprep.mubr.msk.f32.mxu1 %vm905_vm2, %v4771_v18 }
0x2006   : > { %v4910_v46 = vpop.permute.xlu1 %4909 }
0x2009   : > { %v8134_v51 = vpop.eup %8133 }
0x200a   : > { %v4772_v42 = vmul.f32 %v8134_v51, %v8126_v20 }
0x200c   : > { %6921 = vmatmul.mubr.msk.f32.gmra.mrb[82].mxu1 %vm905_vm2, %v4772_v42 }
0x200d   : > { %6931 = vmatprep.mubr.msk.f32.mxu1 %vm795_vm0, %v4904_v45 }
0x2010   : > { %6932 = vmatmul.mubr.msk.f32.vlgmr.msra.gmra.mrb[84].mxu1 %vm795_vm0, %v4906_v48 }
0x2011   : > { %6934 = vmatprep.mubr.msk.f32.mxu1 %vm795_vm0, %v4908_v58  ;;  %7704 = vmatpush1.bf16.msra.mxu1 %v8902_v30 }
0x2012   : > { %7706 = vmatprep.subr.bf16.mxu1 %v8904_v31 }
0x2014   : > { %6935 = vmatmul.mubr.msk.f32.gmra.mrb[86].mxu1 %vm795_vm0, %v4910_v46 }
0x2015   : > { %7708 = vmatpush1.bf16.msra.mxu1 %v8922_v61  ;;  %5352 = vmatprep.mubr.f32.mxu1 %v9951_v43 }
0x2016   : > { %7710 = vmatprep.subr.bf16.mxu1 %v8925_v2 }
0x2019   : > { %7712 = vmatpush1.bf16.msra.mxu1 %v8940_v16 }
0x201a   : > { %7714 = vmatprep.subr.bf16.mxu1 %v8943_v23 }
0x201d   : > { %7716 = vmatpush1.bf16.msra.mxu1 %v8958_v9 }
0x201e   : > { %7718 = vmatprep.subr.bf16.mxu1 %v8961_v36 }
0x2021   : > { %7720 = vmatpush1.bf16.msra.mxu1 %v8976_v60 }
0x2022   : > { %7722 = vmatprep.subr.bf16.mxu1 %v8979_v12 }
0x2025   : > { %7724 = vmatpush1.bf16.msra.mxu1 %v8994_v35 }
0x2026   : > { %7726 = vmatprep.subr.bf16.mxu1 %v8997_v55 }
0x2029   : > { %7728 = vmatpush1.bf16.msra.mxu1 %v9006_v8 }
0x202a   : > { %7730 = vmatprep.subr.bf16.mxu1 %v9040_v59 }
0x202d   : > { %7732 = vmatpush1.bf16.msra.mxu1 %v9048_v4 }
0x20a6   : > { %v6919_v30 = vpop.f32.mrb[80].mxu1 }
0x20a7   : > { %v4864_v31 = vpop.f32.mrb[81].mxu1 }
0x20df   : > { %v9740_v61 = vpop.f32.mrb[82].mxu1 }
0x20e0   : > { %v9742_v2 = vpop.f32.mrb[83].mxu1 }
0x20e3   : > { %v6933_v16 = vpop.f32.mrb[84].mxu1 }
0x20e4   : > { %v5001_v23 = vpop.f32.mrb[85].mxu1  ;;  %v5023_v9 = vsel %vm905_vm2, %v6933_v16, -inf }
0x20e5   : > { %5024 = vmax.xlane.f32.xlu1 %v5023_v9  ;;  %v5020_v36 = vsel %vm905_vm2, %v5001_v23, -inf }
0x20e6   : > { %5021 = vmax.xlane.f32.xlu0 %v5020_v36 }
0x20e7   : > { %v6936_v60 = vpop.f32.mrb[86].mxu1 }
0x20e8   : > { %v5011_v12 = vpop.f32.mrb[87].mxu1  ;;  %v5029_v55 = vsel %vm915_vm3, %v6936_v60, -inf }
0x20e9   : > { %v5026_v35 = vsel %vm905_vm2, %v5011_v12, -inf }
0x20ea   : > { %5027 = vmax.xlane.f32.xlu0 %v5026_v35 }
0x20ee   : > { %5030 = vmax.xlane.f32.xlu0 %v5029_v55 }
0x2172   : > { %v5025_v8 = vpop.xlane.xlu1 %5024 }
0x2173   : > { %v5033_v59 = vsub.f32 %v6933_v16, %v5025_v8  ;;  %v5022_v4 = vpop.xlane.xlu0 %5021 }
0x2174   : > { %v5032_v38 = vsub.f32 %v5001_v23, %v5022_v4 }
0x2175   : > { %v5038_v20 = vmul.f32 1.442695, %v5033_v59 }
0x2176   : > { %v5036_v10 = vmul.f32 1.442695, %v5032_v38 }
0x2177   : > { %8135 = vpow2.f32 %v5038_v20  ;;  %v5028_v27 = vpop.xlane.xlu0 %5027 }
0x2178   : > { %8137 = vpow2.f32 %v5036_v10  ;;  %v5034_v63 = vsub.f32 %v5011_v12, %v5028_v27  ;;  %v8206_v10 = vld [vmem:[%s9875_s8] ss:$0 sm:$0xff] }
0x217a   : > { %v5040_v1 = vmul.f32 1.442695, %v5034_v63 }
0x217b   : > { %v5031_v39 = vpop.xlane.xlu0 %5030 }
0x217c   : > { %8139 = vpow2.f32 %v5040_v1  ;;  %v5035_v53 = vsub.f32 %v6936_v60, %v5031_v39 }
0x217e   : > { %v5042_v40 = vmul.f32 1.442695, %v5035_v53 }
0x2180   : > { %8141 = vpow2.f32 %v5042_v40 }
0x2181   : > { %v8136_v47 = vpop.eup %8135 }
0x2182   : > { %v8138_v14 = vpop.eup %8137  ;;  %v5047_v37 = vsel %vm905_vm2, %v8136_v47, 0.0 }
0x2183   : > { %5048 = vadd.xlane.f32.xlu1 %v5047_v37  ;;  %v5044_v41 = vsel %vm905_vm2, %v8138_v14, 0.0 }
0x2184   : > { %5045 = vadd.xlane.f32.xlu0 %v5044_v41 }
0x2186   : > { %v8140_v33 = vpop.eup %8139 }
0x2187   : > { %v5050_v34 = vsel %vm905_vm2, %v8140_v33, 0.0 }
0x2188   : > { %5051 = vadd.xlane.f32.xlu0 %v5050_v34 }
0x218a   : > { %v8142_v19 = vpop.eup %8141 }
0x218b   : > { %v5053_v21 = vsel %vm915_vm3, %v8142_v19, 0.0 }
0x218c   : > { %5054 = vadd.xlane.f32.xlu1 %v5053_v21 }
0x219d   : > { %7923 = vrot.lane.b32.xlu1 %v9587_v26, %s8218_s24 }
0x219e   : > { %7918 = vrot.lane.b32.xlu0 %v9635_v13, %s8218_s24 }
0x21a1   : > { %4596 = vrot.lane.b32.xlu1 %v9673_v5, %s8218_s24 }
0x21a2   : > { %4887 = vrot.lane.b32.xlu0 %v4864_v31, %s8217_s23 }
0x21a5   : > { %4598 = vrot.lane.b32.xlu1 %v9671_v56, %s8218_s24 }
0x21a6   : > { %4600 = vrot.lane.b32.xlu0 %v9677_v54, %s8218_s24 }
0x21a9   : > { %4889 = vrot.lane.b32.xlu1 %v6919_v30, %s8217_s23 }
0x21ad   : > { %4602 = vrot.lane.b32.xlu1 %v9675_v28, %s8218_s24  ;;  %s5594_s24 = sshll.u32 %s9978_s22, 2 }
0x21ae   : > { %s411_s16 = scalar_lea.vmem %s9879_s12, %s5594_s24 }
0x2210   : > { %v5049_v57 = vpop.xlane.xlu1 %5048 }
0x2211   : > { %v5046_v26 = vpop.xlane.xlu0 %5045 }
0x2212   : > { %8143 = vrcp.f32 %v5046_v26 }
0x2213   : > { %8145 = vrcp.f32 %v5049_v57 }
0x2215   : > { %v5052_v13 = vpop.xlane.xlu0 %5051 }
0x2216   : > { %8147 = vrcp.f32 %v5052_v13 }
0x2219   : > { %v5055_v5 = vpop.xlane.xlu1 %5054  ;;  %v7919_v17 = vpop.permute.xlu0 %7918 }
0x221a   : > { %v7921_v18 = vunpack.i.h.bf16 %v7919_v17  ;;  %v7920_v51 = vunpack.i.l.bf16 %v7919_v17  ;;  %8149 = vrcp.f32 %v5055_v5 }
0x221c   : > { %v8144_v56 = vpop.eup %8143  ;;  %v7659_v45 = vpack.c.bf16 %v7921_v18, %v7920_v51 }
0x221d   : > { %v7924_v42 = vpop.permute.xlu1 %7923  ;;  %v4888_v54 = vpop.permute.xlu0 %4887  ;;  %v5060_v48 = vmul.f32 %v8144_v56, %v8138_v14 }
0x221e   : > { %v7926_v58 = vunpack.i.h.bf16 %v7924_v42  ;;  %v7925_v46 = vunpack.i.l.bf16 %v7924_v42  ;;  %7660 = vmatprep.subr.bf16.mxu0 %v7659_v45  ;;  %v8146_v30 = vpop.eup %8145 }
0x221f   : > { %7662 = vmatpush3.bf16.msra.mxu0 %v7659_v45  ;;  %6945 = vmatprep.mubr.msk.f32.mxu0 %vm905_vm2, %v5060_v48  ;;  %v5061_v9 = vmul.f32 %v8146_v30, %v8136_v47  ;;  %v9976_v48 = vld [vmem:[#allocation23_spill] sm:$0xff] }
0x2220   : > { %v7663_v28 = vpack.c.bf16 %v7926_v58, %v7925_v46  ;;  %v8148_v23 = vpop.eup %8147 }
0x2221   : > { %v4597_v31 = vpop.permute.xlu1 %4596  ;;  %v4601_v16 = vpop.permute.xlu0 %4600  ;;  %v5062_v12 = vmul.f32 %v8148_v23, %v8140_v33 }
0x2222   : > { %4608 = vst.msk [vmem:[#allocation2] sm:$0xff] %vm1347_vm8, %v4597_v31  ;;  %4610 = vst.msk [vmem:[#allocation2 + $0x10] sm:$0xff] %vm1347_vm8, %v4601_v16  ;;  %7665 = vmatprep.subr.msk.bf16.mxu0 %vm8619_vm6, %v7663_v28 }
0x2223   : > { %4899 = vst.msk [vmem:[#allocation2] sm:$0xff] %vm1640_vm9, %v4888_v54  ;;  %7668 = vmatpush3.bf16.msk.msra.mxu0 %vm8619_vm6, %v7663_v28 }
0x2224   : > { %7670 = vmatprep.subr.bf16.mxu0 %v8800_v52  ;;  %v8150_v36 = vpop.eup %8149 }
0x2225   : > { %v4599_v60 = vpop.permute.xlu1 %4598  ;;  %v5063_v35 = vmul.f32 %v8150_v36, %v8142_v19 }
0x2226   : > { %4609 = vst.msk [vmem:[#allocation2 + $0x8] sm:$0xff] %vm1347_vm8, %v4599_v60  ;;  %6946 = vmatmul.mubr.msk.f32.vlgmr.msra.gmra.mrb[64].mxu0 %vm905_vm2, %v5061_v9 }
0x2227   : > { %6948 = vmatprep.mubr.msk.f32.mxu0 %vm905_vm2, %v5062_v12  ;;  %7672 = vmatpush3.bf16.msra.mxu0 %v8800_v52 }
0x2228   : > { %7674 = vmatprep.subr.bf16.mxu0 %v8805_v62 }
0x2229   : > { %v4890_v55 = vpop.permute.xlu1 %4889 }
0x222a   : > { %4900 = vst.msk [vmem:[#allocation2 + $0x8] sm:$0xff] %vm1640_vm9, %v4890_v55  ;;  %6949 = vmatmul.mubr.msk.f32.gmra.mrb[66].mxu0 %vm905_vm2, %v5063_v35 }
0x222b   : > { %7676 = vmatpush3.bf16.msra.mxu0 %v8805_v62 }
0x222c   : > { %7678 = vmatprep.subr.bf16.mxu0 %v8816_v11 }
0x222d   : > { %v4603_v49 = vpop.permute.xlu1 %4602 }
0x222e   : > { %4611 = vst.msk [vmem:[#allocation2 + $0x18] sm:$0x3f] %vm1351_vm11, %v4603_v49 }
0x222f   : > { %7680 = vmatpush3.bf16.msra.mxu0 %v8816_v11 }
0x2230   : > { %7682 = vmatprep.subr.bf16.mxu0 %v8826_v7 }
0x2233   : > { %7684 = vmatpush3.bf16.msra.mxu0 %v8826_v7 }
0x2234   : > { %7686 = vmatprep.subr.bf16.mxu0 %v8836_v22 }
0x2237   : > { %7688 = vmatpush3.bf16.msra.mxu0 %v8836_v22  ;;  %v9972_v22 = vld [vmem:[#allocation24_spill] sm:$0xff] }
0x2238   : > { %7690 = vmatprep.subr.bf16.mxu0 %v8846_v24 }
0x223b   : > { %7692 = vmatpush3.bf16.msra.mxu0 %v8846_v24  ;;  %v9973_v24 = vld [vmem:[#allocation25_spill] sm:$0xff] }
0x223c   : > { %7694 = vmatprep.subr.bf16.mxu0 %v8857_v50 }
0x223f   : > { %7696 = vmatpush3.bf16.msra.mxu0 %v8857_v50  ;;  %v9974_v50 = vld [vmem:[#allocation26_spill] sm:$0xff] }
0x2240   : > { %7698 = vmatprep.subr.bf16.mxu0 %v8867_v0 }
0x2243   : > { %7700 = vmatpush3.bf16.msra.mxu0 %v8867_v0  ;;  %v9975_v0 = vld [vmem:[#allocation27_spill] sm:$0xff] }
0x22f9   : > { %v6947_v52 = vpop.f32.mrb[64].mxu0 }
0x22fa   : > { %5180 = vrot.lane.b32.xlu1 %v6947_v52, %s8216_s19  ;;  %v5155_v62 = vpop.f32.mrb[65].mxu0 }
0x22fb   : > { %5178 = vrot.lane.b32.xlu0 %v5155_v62, %s8216_s19 }
0x22fd   : > { %v6950_v11 = vpop.f32.mrb[66].mxu0 }
0x22fe   : > { %4893 = vrot.lane.b32.xlu1 %v9740_v61, %s8217_s23  ;;  %v5165_v7 = vpop.f32.mrb[67].mxu0 }
0x22ff   : > { %4891 = vrot.lane.b32.xlu0 %v9742_v2, %s8217_s23 }
0x2302   : > { %5184 = vrot.lane.b32.xlu1 %v6950_v11, %s8216_s19 }
0x2303   : > { %5182 = vrot.lane.b32.xlu0 %v5165_v7, %s8216_s19 }
0x2322   : > { %2168 = vadd.xlane.f32.xlu0 %v9972_v22 }
0x2326   : > { %2172 = vadd.xlane.f32.xlu1 %v9973_v24  ;;  %3782 = vadd.xlane.f32.xlu0 %v9513_v29 }
0x232a   : > { %3790 = vadd.xlane.f32.xlu1 %v9540_v6  ;;  %3786 = vadd.xlane.f32.xlu0 %v9518_v3 }
0x232e   : > { %3795 = vadd.xlane.f32.xlu1 %v9546_v25  ;;  %2176 = vadd.xlane.f32.xlu0 %v9974_v50 }
0x2332   : > { %2182 = vadd.xlane.f32.xlu0 %v9975_v0 }
0x236c   : > { %v5181_v61 = vpop.permute.xlu1 %5180 }
0x236d   : > { %5191 = vst.msk [vmem:[#allocation2 + $0x8] sm:$0xff] %vm1933_vm10, %v5181_v61  ;;  %v5179_v2 = vpop.permute.xlu0 %5178 }
0x236e   : > { %5190 = vst.msk [vmem:[#allocation2] sm:$0xff] %vm1933_vm10, %v5179_v2 }
0x2370   : > { %v4894_v8 = vpop.permute.xlu1 %4893 }
0x2371   : > { %4902 = vst.msk [vmem:[#allocation2 + $0x18] sm:$0x3f] %vm1644_vm12, %v4894_v8  ;;  %v4892_v29 = vpop.permute.xlu0 %4891 }
0x2372   : > { %4901 = vst.msk [vmem:[#allocation2 + $0x10] sm:$0xff] %vm1640_vm9, %v4892_v29 }
0x2374   : > { %v5185_v6 = vpop.permute.xlu1 %5184  ;;  %v5195_v59 = vld [vmem:[#allocation2 + $0x8] sm:$0xff] }
0x2375   : > { %5193 = vst.msk [vmem:[#allocation2 + $0x18] sm:$0x3f] %vm1937_vm13, %v5185_v6  ;;  %v5183_v3 = vpop.permute.xlu0 %5182  ;;  %v5194_v25 = vld [vmem:[#allocation2] sm:$0xff] }
0x2376   : > { %5192 = vst.msk [vmem:[#allocation2 + $0x10] sm:$0xff] %vm1933_vm10, %v5183_v3  ;;  %6983 = vmatprep.mubr.f32.mxu0 %v5194_v25 }
0x2377   : > { %6984 = vmatmul.mubr.f32.vlgmr.msra.gmra.mrb[68].mxu0 %v5195_v59 }
0x237c   : > { %v5197_v38 = vld [vmem:[#allocation2 + $0x18] sm:$0x3f] }
0x237d   : > { %v5196_v4 = vld [vmem:[#allocation2 + $0x10] sm:$0xff] }
0x237e   : > { %6986 = vmatprep.mubr.f32.mxu0 %v5196_v4 }
0x237f   : > { %6987 = vmatmul.mubr.f32.gmra.mrb[70].mxu0 %v5197_v38 }
0x23af   : > { %v2169_v50 = vpop.xlane.xlu0 %2168 }
0x23b3   : > { %v3783_v0 = vpop.xlane.xlu0 %3782  ;;  %v2173_v2 = vpop.xlane.xlu1 %2172 }
0x23b4   : > { %v5410_v3 = vmax.f32 %v2169_v50, %v3783_v0 }
0x23b7   : > { %v3787_v61 = vpop.xlane.xlu0 %3786  ;;  %v3791_v29 = vpop.xlane.xlu1 %3790 }
0x23b8   : > { %v5411_v38 = vmax.f32 %v2173_v2, %v3787_v61 }
0x23bb   : > { %v2177_v8 = vpop.xlane.xlu0 %2176  ;;  %v3796_v25 = vpop.xlane.xlu1 %3795 }
0x23bf   : > { %v2183_v6 = vpop.xlane.xlu0 %2182 }
0x244a   : > { %v6985_v20 = vpop.f32.mrb[68].mxu0 }
0x244b   : > { %v9821_v27 = vadd.f32 %v8206_v10, %v6985_v20  ;;  %v5264_v63 = vpop.f32.mrb[69].mxu0 }
0x244c   : > { %v9823_v1 = vadd.f32 %v8206_v10, %v5264_v63 }
0x244e   : > { %5353 = vmatmul.mubr.f32.vlgmr.msra.gmra.mrb[88].mxu1 %v9823_v1 }
0x244f   : > { %5358 = vmatprep.mubr.f32.mxu1 %v9951_v43 }
0x2452   : > { %v6988_v39 = vpop.f32.mrb[70].mxu0  ;;  %5359 = vmatmul.mubr.f32.gmra.mrb[90].mxu1 %v9821_v27 }
0x2453   : > { %v5280_v53 = vadd.f32 %v8206_v10, %v6988_v39  ;;  %v5274_v40 = vpop.f32.mrb[71].mxu0  ;;  %5364 = vmatprep.mubr.f32.mxu1 %v9951_v43 }
0x2454   : > { %v9829_v47 = vadd.f32 %v8206_v10, %v5274_v40 }
0x2455   : > { %5287 = vst [vmem:[#allocation3 + $0x58] sm:$0x3f] %v5280_v53 }
0x2456   : > { %5365 = vmatmul.mubr.f32.gmra.mrb[92].mxu1 %v9829_v47 }
0x2457   : > { %5370 = vmatprep.mubr.f32.mxu1 %v9951_v43 }
0x245a   : > { %5371 = vmatmul.mubr.f32.gmra.mrb[94].mxu1 %v5280_v53 }
0x2521   : > { %v5354_v14 = vpop.f32.mrb[88].mxu1 }
0x2522   : > { %v5355_v37 = vadd.f32 %v5354_v14, %v9968_v32  ;;  %v5356_v41 = vpop.f32.mrb[89].mxu1 }
0x2523   : > { %v5357_v33 = vadd.f32 %v5356_v41, %v9969_v44 }
0x2524   : > { %8151 = vtanh.f32 %v5355_v37 }
0x2525   : > { %8153 = vtanh.f32 %v5357_v33  ;;  %v5360_v34 = vpop.f32.mrb[90].mxu1 }
0x2526   : > { %v5361_v19 = vadd.f32 %v5360_v34, %v9968_v32  ;;  %v5362_v21 = vpop.f32.mrb[91].mxu1  ;;  %v5412_v34 = vmax.f32 %v2177_v8, %v3791_v29 }
0x2527   : > { %v5363_v26 = vadd.f32 %v5362_v21, %v9969_v44 }
0x2528   : > { %8155 = vtanh.f32 %v5361_v19 }
0x2529   : > { %8157 = vtanh.f32 %v5363_v26  ;;  %v5366_v57 = vpop.f32.mrb[92].mxu1 }
0x252a   : > { %v5367_v43 = vadd.f32 %v5366_v57, %v9968_v32  ;;  %v5368_v13 = vpop.f32.mrb[93].mxu1 }
0x252b   : > { %v5369_v5 = vadd.f32 %v5368_v13, %v9969_v44  ;;  %v5413_v13 = vmax.f32 %v2183_v6, %v3796_v25 }
0x252c   : > { %8159 = vtanh.f32 %v5367_v43 }
0x252d   : > { %8161 = vtanh.f32 %v5369_v5  ;;  %v5372_v17 = vpop.f32.mrb[94].mxu1 }
0x252e   : > { %v8152_v18 = vpop.eup %8151  ;;  %v5373_v51 = vadd.f32 %v5372_v17, %v9968_v32  ;;  %v5374_v56 = vpop.f32.mrb[95].mxu1 }
0x252f   : > { %v8154_v45 = vpop.eup %8153  ;;  %v5375_v42 = vadd.f32 %v5374_v56, %v9969_v44  ;;  %v5385_v58 = vmul.f32 %v8152_v18, %v9976_v48 }
0x2530   : > { %8163 = vtanh.f32 %v5373_v51  ;;  %v5386_v54 = vmul.f32 %v8154_v45, %v9970_v15 }
0x2531   : > { %8165 = vtanh.f32 %v5375_v42 }
0x2532   : > { %v8156_v46 = vpop.eup %8155  ;;  %v5393_v28 = vsel %vm2165_vm14, %v5386_v54, 0.0 }
0x2533   : > { %v8158_v30 = vpop.eup %8157  ;;  %v5394_v31 = vadd.f32 %v5393_v28, %v5385_v58  ;;  %v5387_v32 = vmul.f32 %v8156_v46, %v9976_v48 }
0x2534   : > { %v5388_v16 = vmul.f32 %v8158_v30, %v9970_v15 }
0x2535   : > { %5395 = vadd.xlane.f32.xlu0 %v5394_v31 }
0x2536   : > { %v8160_v23 = vpop.eup %8159  ;;  %v5397_v9 = vsel %vm2165_vm14, %v5388_v16, 0.0 }
0x2537   : > { %v8162_v44 = vpop.eup %8161  ;;  %v5398_v36 = vadd.f32 %v5397_v9, %v5387_v32  ;;  %v5389_v12 = vmul.f32 %v8160_v23, %v9976_v48 }
0x2538   : > { %v5390_v60 = vmul.f32 %v8162_v44, %v9970_v15 }
0x2539   : > { %5399 = vadd.xlane.f32.xlu1 %v5398_v36 }
0x253a   : > { %v8164_v35 = vpop.eup %8163  ;;  %v5401_v55 = vsel %vm2165_vm14, %v5390_v60, 0.0 }
0x253b   : > { %v8166_v49 = vpop.eup %8165  ;;  %v5402_v52 = vadd.f32 %v5401_v55, %v5389_v12  ;;  %v5391_v62 = vmul.f32 %v8164_v35, %v9976_v48 }
0x253c   : > { %v5392_v11 = vmul.f32 %v8166_v49, %v9970_v15 }
0x253d   : > { %5403 = vadd.xlane.f32.xlu0 %v5402_v52  ;;  %v5405_v7 = vsel %vm963_vm4, %v5391_v62, 0.0 }
0x253e   : > { %v5406_v22 = vsel %vm2179_vm15, %v5392_v11, 0.0 }
0x253f   : > { %v5407_v24 = vadd.f32 %v5406_v22, %v5405_v7 }
0x2541   : > { %5408 = vadd.xlane.f32.xlu1 %v5407_v24 }
0x25c2   : > { %v5396_v59 = vpop.xlane.xlu0 %5395 }
0x25c3   : > { %v5414_v4 = vmax.f32 %v5410_v3, %v5396_v59 }
0x25c5   : > { %v5418_v15 = vsub.f32 %v2169_v50, %v5414_v4  ;;  %v5430_v20 = vsub.f32 %v3783_v0, %v5414_v4  ;;  %v5442_v10 = vsub.f32 %v5396_v59, %v5414_v4 }
0x25c6   : > { %v5400_v63 = vpop.xlane.xlu1 %5399 }
0x25c7   : > { %v5422_v39 = vmul.f32 1.442695, %v5418_v15  ;;  %v5434_v53 = vmul.f32 1.442695, %v5430_v20  ;;  %v5415_v40 = vmax.f32 %v5411_v38, %v5400_v63  ;;  %v5446_v14 = vmul.f32 1.442695, %v5442_v10 }
0x25c8   : > { %v5471_v38 = vld [vmem:[#allocation3 + $0x8] sm:$0xff] }
0x25c9   : > { %8167 = vpow2.f32 %v5422_v39  ;;  %v5419_v37 = vsub.f32 %v2173_v2, %v5415_v40  ;;  %v5431_v41 = vsub.f32 %v3787_v61, %v5415_v40  ;;  %v5443_v33 = vsub.f32 %v5400_v63, %v5415_v40  ;;  %v5494_v15 = vld [vmem:[#allocation3 + $0x28] sm:$0xff]  ;;  %v5493_v39 = vld [vmem:[#allocation3 + $0x20] sm:$0xff] }
0x25ca   : > { %8169 = vpow2.f32 %v5434_v53  ;;  %v5404_v19 = vpop.xlane.xlu0 %5403  ;;  %v5470_v53 = vld [vmem:[#allocation3] sm:$0xff] }
0x25cb   : > { %v5424_v21 = vmul.f32 1.442695, %v5419_v37  ;;  %v5436_v26 = vmul.f32 1.442695, %v5431_v41  ;;  %8171 = vpow2.f32 %v5446_v14  ;;  %v5448_v57 = vmul.f32 1.442695, %v5443_v33 }
0x25cc   : > { %v5416_v43 = vmax.f32 %v5412_v34, %v5404_v19 }
0x25cd   : > { %8173 = vpow2.f32 %v5424_v21  ;;  %v5495_v21 = vld [vmem:[#allocation3 + $0x30] sm:$0xff] }
0x25ce   : > { %8175 = vpow2.f32 %v5436_v26  ;;  %v5420_v5 = vsub.f32 %v2177_v8, %v5416_v43  ;;  %v5432_v17 = vsub.f32 %v3791_v29, %v5416_v43  ;;  %v5444_v18 = vsub.f32 %v5404_v19, %v5416_v43  ;;  %v5409_v51 = vpop.xlane.xlu1 %5408  ;;  %v5472_v19 = vld [vmem:[#allocation3 + $0x10] sm:$0xff] }
0x25cf   : > { %v5417_v56 = vmax.f32 %v5413_v13, %v5409_v51  ;;  %8177 = vpow2.f32 %v5448_v57 }
0x25d0   : > { %v5426_v45 = vmul.f32 1.442695, %v5420_v5  ;;  %v5438_v42 = vmul.f32 1.442695, %v5432_v17  ;;  %v5450_v54 = vmul.f32 1.442695, %v5444_v18 }
0x25d1   : > { %v5421_v48 = vsub.f32 %v2183_v6, %v5417_v56  ;;  %v5433_v58 = vsub.f32 %v3796_v25, %v5417_v56  ;;  %v5445_v46 = vsub.f32 %v5409_v51, %v5417_v56 }
0x25d2   : > { %8179 = vpow2.f32 %v5426_v45 }
0x25d3   : > { %v8168_v28 = vpop.eup %8167  ;;  %8181 = vpow2.f32 %v5438_v42  ;;  %v5428_v30 = vmul.f32 1.442695, %v5421_v48  ;;  %v5440_v31 = vmul.f32 1.442695, %v5433_v58  ;;  %v5452_v32 = vmul.f32 1.442695, %v5445_v46 }
0x25d4   : > { %v8170_v16 = vpop.eup %8169  ;;  %8183 = vpow2.f32 %v5450_v54  ;;  %v5473_v42 = vld [vmem:[#allocation3 + $0x18] sm:$0x3f] }
0x25d5   : > { %v5454_v23 = vadd.f32 %v8170_v16, %v8168_v28  ;;  %8185 = vpow2.f32 %v5428_v30  ;;  %v8172_v9 = vpop.eup %8171  ;;  %v5496_v54 = vld [vmem:[#allocation3 + $0x38] sm:$0x3f] }
0x25d6   : > { %8187 = vpow2.f32 %v5440_v31  ;;  %v5519_v48 = vld [vmem:[#allocation3 + $0x58] sm:$0x3f] }
0x25d7   : > { %v8174_v44 = vpop.eup %8173  ;;  %v5458_v60 = vadd.f32 %v8172_v9, %v5454_v23  ;;  %8189 = vpow2.f32 %v5452_v32 }
0x25d8   : > { %v8176_v36 = vpop.eup %8175 }
0x25d9   : > { %v5455_v12 = vadd.f32 %v8176_v36, %v8174_v44  ;;  %v8178_v35 = vpop.eup %8177  ;;  %8191 = vrcp.f32 %v5458_v60 }
0x25db   : > { %v5459_v55 = vadd.f32 %v8178_v35, %v5455_v12 }
0x25dc   : > { %v8180_v49 = vpop.eup %8179 }
0x25dd   : > { %v8182_v52 = vpop.eup %8181  ;;  %8193 = vrcp.f32 %v5459_v55 }
0x25de   : > { %v8184_v62 = vpop.eup %8183  ;;  %v5456_v11 = vadd.f32 %v8182_v52, %v8180_v49 }
0x25df   : > { %v8186_v7 = vpop.eup %8185 }
0x25e0   : > { %v8188_v22 = vpop.eup %8187  ;;  %v5460_v24 = vadd.f32 %v8184_v62, %v5456_v11 }
0x25e1   : > { %v5457_v50 = vadd.f32 %v8188_v22, %v8186_v7  ;;  %v8190_v0 = vpop.eup %8189 }
0x25e2   : > { %8195 = vrcp.f32 %v5460_v24 }
0x25e3   : > { %v5461_v61 = vadd.f32 %v8190_v0, %v5457_v50  ;;  %v8192_v2 = vpop.eup %8191 }
0x25e4   : > { %v5466_v25 = vmul.f32 %v8192_v2, %v8168_v28  ;;  %v5489_v59 = vmul.f32 %v8192_v2, %v8170_v16  ;;  %v5512_v4 = vmul.f32 %v8192_v2, %v8172_v9 }
0x25e5   : > { %8197 = vrcp.f32 %v5461_v61 }
0x25e6   : > { %v5474_v33 = vmul.f32 %v5470_v53, %v5466_v25  ;;  %v5497_v34 = vmul.f32 %v5493_v39, %v5489_v59  ;;  %v5520_v57 = vmul.f32 %v5512_v4, %v9823_v1 }
0x25e7   : > { %v8194_v8 = vpop.eup %8193 }
0x25e8   : > { %v5467_v29 = vmul.f32 %v8194_v8, %v8174_v44  ;;  %v5490_v6 = vmul.f32 %v8194_v8, %v8176_v36  ;;  %v5513_v3 = vmul.f32 %v8194_v8, %v8178_v35 }
0x25ea   : > { %v5475_v10 = vmul.f32 %v5471_v38, %v5467_v29  ;;  %v5498_v63 = vmul.f32 %v5494_v15, %v5490_v6  ;;  %v5521_v40 = vmul.f32 %v5513_v3, %v9821_v27 }
0x25ec   : > { %v8196_v20 = vpop.eup %8195  ;;  %v5478_v56 = vadd.f32 %v5475_v10, %v5474_v33  ;;  %v5501_v45 = vadd.f32 %v5498_v63, %v5497_v34  ;;  %v5524_v27 = vadd.f32 %v5521_v40, %v5520_v57 }
0x25ed   : > { %v5468_v14 = vmul.f32 %v8196_v20, %v8180_v49  ;;  %v5491_v37 = vmul.f32 %v8196_v20, %v8182_v52  ;;  %v5514_v41 = vmul.f32 %v8196_v20, %v8184_v62 }
0x25ef   : > { %v8198_v26 = vpop.eup %8197  ;;  %v5476_v43 = vmul.f32 %v5472_v19, %v5468_v14  ;;  %v5499_v13 = vmul.f32 %v5495_v21, %v5491_v37  ;;  %v5522_v5 = vmul.f32 %v5514_v41, %v9829_v47 }
0x25f0   : > { %v5469_v17 = vmul.f32 %v8198_v26, %v8186_v7  ;;  %v5492_v18 = vmul.f32 %v8198_v26, %v8188_v22  ;;  %v5515_v51 = vmul.f32 %v8198_v26, %v8190_v0 }
0x25f1   : > { %v5479_v30 = vadd.f32 %v5478_v56, %v5476_v43  ;;  %v5502_v31 = vadd.f32 %v5501_v45, %v5499_v13  ;;  %v5525_v16 = vadd.f32 %v5524_v27, %v5522_v5 }
0x25f2   : > { %v5477_v58 = vmul.f32 %v5473_v42, %v5469_v17  ;;  %v5500_v46 = vmul.f32 %v5496_v54, %v5492_v18  ;;  %v5523_v28 = vmul.f32 %v5519_v48, %v5515_v51 }
0x25f4   : > { %v5480_v1 = vsel %vm963_vm4, %v5477_v58, 0.0  ;;  %v5503_v47 = vsel %vm963_vm4, %v5500_v46, 0.0  ;;  %v5526_v32 = vsel %vm963_vm4, %v5523_v28, 0.0 }
0x25f5   : > { %v5481_v23 = vadd.f32 %v5480_v1, %v5479_v30  ;;  %v5504_v9 = vadd.f32 %v5503_v47, %v5502_v31  ;;  %v5527_v44 = vadd.f32 %v5526_v32, %v5525_v16 }
0x25f7   : > { %v5482_v36 = vrot.slane %v5481_v23, 4  ;;  %v5505_v60 = vrot.slane %v5504_v9, 4  ;;  %v5528_v12 = vrot.slane %v5527_v44, 4 }
0x25f9   : > { %v5483_v35 = vadd.f32 %v5482_v36, %v5481_v23  ;;  %v5506_v55 = vadd.f32 %v5505_v60, %v5504_v9  ;;  %v5529_v49 = vadd.f32 %v5528_v12, %v5527_v44 }
0x25fb   : > { %v5484_v52 = vrot.slane %v5483_v35, 2  ;;  %v5507_v62 = vrot.slane %v5506_v55, 2  ;;  %v5530_v11 = vrot.slane %v5529_v49, 2 }
0x25fd   : > { %v5485_v7 = vadd.f32 %v5484_v52, %v5483_v35  ;;  %v5508_v22 = vadd.f32 %v5507_v62, %v5506_v55  ;;  %v5531_v24 = vadd.f32 %v5530_v11, %v5529_v49 }
0x25ff   : > { %v5486_v50 = vrot.slane %v5485_v7, 1  ;;  %v5509_v0 = vrot.slane %v5508_v22, 1  ;;  %v5532_v61 = vrot.slane %v5531_v24, 1 }
0x2601   : > { %v5487_v2 = vadd.f32 %v5486_v50, %v5485_v7  ;;  %v5510_v8 = vadd.f32 %v5509_v0, %v5508_v22  ;;  %v5533_v29 = vadd.f32 %v5532_v61, %v5531_v24 }
0x2603   : > { %5488 = vst [vmem:[%s411_s16] sm:$0x1] %v5487_v2  ;;  %5511 = vst [vmem:[%s411_s16 + $0x1] sm:$0x1] %v5510_v8 }
0x2604   : > { %5534 = vst [vmem:[%s411_s16 + $0x2] sm:$0x1] %v5533_v29 }
0x2605 PF: > { %s22_s21 = sadd.s32 1, %s8213_s21  }
0x2606   : > { %p19_p4 = scmp.ge.s32.totalorder %s22_s21, 4  }
0x2608   :  { %21 = sbr.rel (!%p19_p4) target bundleno = 1 (0x1), region = 102 }

</bundles_post_ra>
